<compile_context>
chip_gen: v7x
topology: tpu7x:2x2x1
jax: 0.10.0
libtpu: 0.0.40
codegen_flags: <defaults>
</compile_context>

<pallas_src>
import jax
import jax.numpy as jnp
import numpy as np
from jax.experimental import pallas as pl
from jax.experimental.pallas import tpu as pltpu


# ---------------------------------------------------------------------------
# Kernel A: latent head, single invocation over all B*S rows.
#   h   = LeakyReLU(LayerNorm(s_face @ W1a + s_hair @ W1b + b1))
#   out = h @ W2 + (latent_avg + b2)
# ---------------------------------------------------------------------------
def _latent_kernel(sf_ref, sh_ref, w1f_ref, w1h_ref, lnp_ref, w2_ref, avg_ref,
                   out_ref):
    sf = sf_ref[...].astype(jnp.bfloat16)                              # (N, D)
    sh = sh_ref[...].astype(jnp.bfloat16)                              # (N, D)
    # Fused "concat" matmul: cat(sf, sh) @ W1 == sf @ W1[:D] + sh @ W1[D:]
    h = (jnp.dot(sf, w1f_ref[...], preferred_element_type=jnp.float32)
         + jnp.dot(sh, w1h_ref[...], preferred_element_type=jnp.float32)
         + lnp_ref[0:1, :])                                            # + b1
    # LayerNorm over last dim (eps = 1e-5, affine) in f32.
    mu = jnp.mean(h, axis=-1, keepdims=True)
    var = jnp.mean(jnp.square(h - mu), axis=-1, keepdims=True)
    h = (h - mu) * jax.lax.rsqrt(var + 1e-5)
    h = h * lnp_ref[1:2, :] + lnp_ref[2:3, :]                          # gamma, beta
    # LeakyReLU (PyTorch default negative_slope = 0.01)
    h = jnp.where(h >= 0.0, h, 0.01 * h)
    y = jnp.dot(h.astype(jnp.bfloat16), w2_ref[...],
                preferred_element_type=jnp.float32)                    # (N, D) f32
    out_ref[...] = y + avg_ref[...]                                    # + (latent_avg + b2)


def latent_path(s_face, s_hair, p, latent_avg):
    B, S, D = s_face.shape                                             # (B, 18, 512)
    N = B * S
    # Single grid step: all operands (~3.3 MiB at demo/typical B) stay resident in
    # VMEM; the bf16 weights are fetched exactly once and M = B*S for the MXU.
    # TODO(synk): for very large B (activations approaching the scoped VMEM limit)
    #             add a row-tiled grid; unnecessary at typical batch sizes.
    sf = s_face.reshape(N, D)
    sh = s_hair.reshape(N, D)
    # Fold b2 into latent_avg and pre-broadcast over batch (tiny: N*D*4 bytes).
    avg_b2 = jnp.broadcast_to(latent_avg + p["b2"], (B, S, D)).reshape(N, D)
    out = pl.pallas_call(
        _latent_kernel,
        out_shape=jax.ShapeDtypeStruct((N, D), jnp.float32),
    )(sf, sh, p["w1_face"], p["w1_hair"], p["ln_pack"], p["w2"], avg_b2)
    return out.reshape(B, S, D)


# ---------------------------------------------------------------------------
# Kernel B: feature path, gridded over (batch, spatial tiles).
# Mask commutes out of the channel contraction, so no in-kernel concat copy:
#   out_tile = yh + m * (yf - yh) + b,   yf = W_face @ ff,  yh = W_hair @ fh
# ---------------------------------------------------------------------------
def _feature_kernel(ff_ref, fh_ref, m_ref, wf_ref, wh_ref, b_ref, out_ref):
    ff = ff_ref[0].astype(jnp.bfloat16)                                # (C, T)
    fh = fh_ref[0].astype(jnp.bfloat16)                                # (C, T)
    m = m_ref[0]                                                       # (1, T) f32
    yf = jnp.dot(wf_ref[...], ff, preferred_element_type=jnp.float32)  # (Cout, T)
    yh = jnp.dot(wh_ref[...], fh, preferred_element_type=jnp.float32)  # (Cout, T)
    # m*yf + (1-m)*yh + b  ==  yh + m*(yf - yh) + b
    out_ref[0] = (yh + m * (yf - yh) + b_ref[...]).astype(out_ref.dtype)


def _pick_spatial_tile(hw, tile_hw):
    """Largest divisor of hw that is a multiple of 128 and <= tile_hw."""
    t = min(tile_hw, hw)
    t -= t % 128
    while t >= 128:
        if hw % t == 0:
            return t
        t -= 128
    return hw  # hw has no multiple-of-128 divisor (tiny feature map): single block


def feature_path(f_face, f_hair, t_mask64, w_face, w_hair, b_feat,
                 tile_hw=1024, out_dtype=jnp.bfloat16):
    B, C, H, W = f_face.shape
    HW = H * W
    Cout = w_face.shape[0]
    # Lane-dense spatial tile. 1024 is the safe default for v7x (64 MiB VMEM); on v6e
    # (128 MiB) tile_hw=2048-4096 amortizes per-step overhead further.  Regime note:
    # at C~1024 this kernel is MXU-bound on v5e (keep C/Cout multiples of 128, bf16
    # operands); it is HBM-bound on v6e/v7x and at small C everywhere.
    T = _pick_spatial_tile(HW, tile_hw)

    ff = f_face.reshape(B, C, HW)
    fh = f_hair.reshape(B, C, HW)
    # Mask stays f32 on purpose (see header); bytes are negligible vs feature maps.
    m = t_mask64.reshape(B, 1, HW).astype(jnp.float32)
    inv = lambda b, t: (0, 0)

    # Scoped-VMEM budget: double-buffered in/out tiles + (double-buffered) weights,
    # with 2x headroom.  Keeps large-C configs compiling on v5e's 16 MiB default and
    # stays within v7x's 64 MiB physical VMEM at the default tile size.
    est = (2 * (2 * C * T * ff.dtype.itemsize                      # ff + fh tiles
                + T * 4                                             # mask tile (f32)
                + Cout * T * np.dtype(out_dtype).itemsize)          # output tile
           + 2 * (2 * Cout * C * w_face.dtype.itemsize + Cout * 4)) # weights + bias
    vmem_limit = int(min(max(32 << 20, 2 * est), 100 << 20))

    out = pl.pallas_call(
        _feature_kernel,
        out_shape=jax.ShapeDtypeStruct((B, Cout, HW), out_dtype),
        grid=(B, HW // T),
        in_specs=[
            pl.BlockSpec((1, C, T), lambda b, t: (b, 0, t)),          # f_face tile
            pl.BlockSpec((1, C, T), lambda b, t: (b, 0, t)),          # f_hair tile
            pl.BlockSpec((1, 1, T), lambda b, t: (b, 0, t)),          # mask tile
            pl.BlockSpec((Cout, C), inv),                             # W_face (bf16)
            pl.BlockSpec((Cout, C), inv),                             # W_hair (bf16)
            pl.BlockSpec((Cout, 1), inv),                             # bias
        ],
        out_specs=pl.BlockSpec((1, Cout, T), lambda b, t: (b, 0, t)),
        compiler_params=pltpu.CompilerParams(
            dimension_semantics=("parallel", "parallel"),
            vmem_limit_bytes=vmem_limit),
    )(ff, fh, m, w_face, w_hair, b_feat)
    return out.reshape(B, Cout, H, W)


def nearest_interp_to_64(mask):
    """F.interpolate(mask, size=(64,64), mode='nearest'): floor-index gather, matching
    PyTorch for arbitrary (not just integer-factor) source sizes.  Done as a tiny XLA
    gather in the wrapper."""
    B, C, H, W = mask.shape
    hi = (jnp.arange(64) * H) // 64
    wi = (jnp.arange(64) * W) // 64
    return mask[:, :, hi[:, None], wi[None, :]]


@jax.jit
def post_process_forward(s_face, s_hair, f_face, f_hair, target_mask,
                         latent_params, latent_avg, feature_params):
    finall_s = latent_path(s_face, s_hair, latent_params, latent_avg)
    t_mask = nearest_interp_to_64(target_mask)
    finall_f = feature_path(f_face, f_hair, t_mask,
                            feature_params["w_face"], feature_params["w_hair"],
                            feature_params["b"])
    return finall_s, finall_f


if __name__ == "__main__":
    key = jax.random.PRNGKey(0)
    ks = jax.random.split(key, 10)

    # Small demo shapes consistent with the module's conventions.
    B, S, D = 2, 18, 512          # W+ latent: 18 styles x 512 (baked into the Linears)
    C, H, W = 32, 64, 64          # small stand-in channel count; 64x64 is hard-coded
                                  # by the interpolate target in forward()

    # Encoder outputs (stand-ins for FeatureEncoderMult(source/target)).
    # Activations and feature maps arrive in bf16 (producer-side cast) to halve the
    # activation HBM bytes; the kernels also accept f32 (in-register cast for the MXU).
    s_face = jax.random.normal(ks[0], (B, S, D), jnp.float32).astype(jnp.bfloat16)
    s_hair = jax.random.normal(ks[1], (B, S, D), jnp.float32).astype(jnp.bfloat16)
    f_face = jax.random.normal(ks[2], (B, C, H, W), jnp.float32).astype(jnp.bfloat16)
    f_hair = jax.random.normal(ks[3], (B, C, H, W), jnp.float32).astype(jnp.bfloat16)
    target_mask = (jax.random.uniform(ks[4], (B, 1, 16, 16)) > 0.5).astype(jnp.float32)

    # latent_avg (torch.load in the original) -> deterministic random init, (S, D).
    latent_avg = jax.random.normal(ks[5], (S, D), jnp.float32)

    # to_latent parameters: Linear(1024,1024), LayerNorm(1024), Linear(1024,512).
    # W1 is stored pre-split along its input dim (concat fused into two MXU dots);
    # matmul weights stored bf16 (f32 accumulation in-kernel); LN/bias stay f32 and
    # are packed into one (3, 1024) array; b2 is folded into latent_avg in the wrapper.
    w1_full = jax.random.normal(ks[6], (2 * D, 2 * D), jnp.float32) * 0.02
    latent_params = {
        "w1_face": w1_full[:D].astype(jnp.bfloat16),
        "w1_hair": w1_full[D:].astype(jnp.bfloat16),
        "ln_pack": jnp.stack([jnp.zeros((2 * D,), jnp.float32),   # b1
                              jnp.ones((2 * D,), jnp.float32),    # LN gamma
                              jnp.zeros((2 * D,), jnp.float32)]), # LN beta
        "w2": (jax.random.normal(ks[7], (2 * D, D), jnp.float32) * 0.02
               ).astype(jnp.bfloat16),
        "b2": jnp.zeros((1, D), jnp.float32),
    }

    # to_feature stand-in: pointwise channel mix (2C -> C), stored pre-split.
    w_feat = jax.random.normal(ks[8], (C, 2 * C), jnp.float32) * 0.05
    feature_params = {
        "w_face": w_feat[:, :C].astype(jnp.bfloat16),
        "w_hair": w_feat[:, C:].astype(jnp.bfloat16),
        "b": jnp.zeros((C, 1), jnp.float32),
    }

    finall_s, finall_f = post_process_forward(
        s_face, s_hair, f_face, f_hair, target_mask,
        latent_params, latent_avg, feature_params)
    jax.block_until_ready((finall_s, finall_f))

    assert finall_s.shape == (B, S, D)
    assert finall_f.shape == (B, C, H, W)
    print("KERNEL_OK")
</pallas_src>

<mosaic_0001>
module attributes {stable_mosaic.version = 11 : i64} {
  func.func @_feature_kernel(%arg0: i32, %arg1: i32, %arg2: memref<1x32x1024xbf16, #tpu.memory_space<vmem>>, %arg3: memref<1x32x1024xbf16, #tpu.memory_space<vmem>>, %arg4: memref<1x1x1024xf32, #tpu.memory_space<vmem>>, %arg5: memref<32x32xbf16, #tpu.memory_space<vmem>>, %arg6: memref<32x32xbf16, #tpu.memory_space<vmem>>, %arg7: memref<32x1xf32, #tpu.memory_space<vmem>>, %arg8: memref<1x32x1024xbf16, #tpu.memory_space<vmem>>) attributes {dimension_semantics = [#tpu.dimension_semantics<parallel>, #tpu.dimension_semantics<parallel>], iteration_bounds = array<i64: 2, 4>, scalar_prefetch = 0 : i64, scratch_operands = 0 : i64, tpu.core_type = #tpu.core_type<tc>, window_params = [{transform_indices = @transform_0, window_bounds = array<i64: 1, 32, 1024>}, {transform_indices = @transform_1, window_bounds = array<i64: 1, 32, 1024>}, {transform_indices = @transform_2, window_bounds = array<i64: 1, 1, 1024>}, {pipeline_mode = #tpu.pipeline_mode<synchronous>, transform_indices = @transform_3, window_bounds = array<i64: 32, 32>}, {pipeline_mode = #tpu.pipeline_mode<synchronous>, transform_indices = @transform_4, window_bounds = array<i64: 32, 32>}, {pipeline_mode = #tpu.pipeline_mode<synchronous>, transform_indices = @transform_5, window_bounds = array<i64: 32, 1>}, {transform_indices = @transform_6, window_bounds = array<i64: 1, 32, 1024>}]} {
    %c0 = arith.constant 0 : index
    %c0_0 = arith.constant 0 : index
    %c0_1 = arith.constant 0 : index
    %0 = vector.load %arg2[%c0, %c0_0, %c0_1] : memref<1x32x1024xbf16, #tpu.memory_space<vmem>>, vector<1x32x1024xbf16>
    %1 = vector.shape_cast %0 : vector<1x32x1024xbf16> to vector<32x1024xbf16>
    %c0_2 = arith.constant 0 : index
    %c0_3 = arith.constant 0 : index
    %c0_4 = arith.constant 0 : index
    %2 = vector.load %arg3[%c0_2, %c0_3, %c0_4] : memref<1x32x1024xbf16, #tpu.memory_space<vmem>>, vector<1x32x1024xbf16>
    %3 = vector.shape_cast %2 : vector<1x32x1024xbf16> to vector<32x1024xbf16>
    %c0_5 = arith.constant 0 : index
    %c0_6 = arith.constant 0 : index
    %c0_7 = arith.constant 0 : index
    %4 = vector.load %arg4[%c0_5, %c0_6, %c0_7] : memref<1x1x1024xf32, #tpu.memory_space<vmem>>, vector<1x1x1024xf32>
    %5 = vector.shape_cast %4 : vector<1x1x1024xf32> to vector<1x1024xf32>
    %c0_8 = arith.constant 0 : index
    %c0_9 = arith.constant 0 : index
    %6 = vector.load %arg5[%c0_8, %c0_9] : memref<32x32xbf16, #tpu.memory_space<vmem>>, vector<32x32xbf16>
    %cst = arith.constant dense<0.000000e+00> : vector<32x1024xf32>
    %7 = tpu.matmul %6, %1, %cst {dimension_numbers = #tpu.dot_dimension_numbers<[1], [0], [0], [1], [0, 0, 1, 1], [], []>} : vector<32x32xbf16>, vector<32x1024xbf16>, vector<32x1024xf32> -> vector<32x1024xf32>
    %c0_10 = arith.constant 0 : index
    %c0_11 = arith.constant 0 : index
    %8 = vector.load %arg6[%c0_10, %c0_11] : memref<32x32xbf16, #tpu.memory_space<vmem>>, vector<32x32xbf16>
    %cst_12 = arith.constant dense<0.000000e+00> : vector<32x1024xf32>
    %9 = tpu.matmul %8, %3, %cst_12 {dimension_numbers = #tpu.dot_dimension_numbers<[1], [0], [0], [1], [0, 0, 1, 1], [], []>} : vector<32x32xbf16>, vector<32x1024xbf16>, vector<32x1024xf32> -> vector<32x1024xf32>
    %10 = arith.subf %7, %9 : vector<32x1024xf32>
    %11 = vector.broadcast %5 : vector<1x1024xf32> to vector<32x1024xf32>
    %12 = arith.mulf %11, %10 : vector<32x1024xf32>
    %13 = arith.addf %9, %12 : vector<32x1024xf32>
    %c0_13 = arith.constant 0 : index
    %c0_14 = arith.constant 0 : index
    %14 = vector.load %arg7[%c0_13, %c0_14] : memref<32x1xf32, #tpu.memory_space<vmem>>, vector<32x1xf32>
    %15 = vector.broadcast %14 : vector<32x1xf32> to vector<32x1024xf32>
    %16 = arith.addf %13, %15 : vector<32x1024xf32>
    %17 = arith.truncf %16 : vector<32x1024xf32> to vector<32x1024xbf16>
    %c0_15 = arith.constant 0 : index
    %c0_16 = arith.constant 0 : index
    %c0_17 = arith.constant 0 : index
    %18 = vector.load %arg8[%c0_15, %c0_16, %c0_17] : memref<1x32x1024xbf16, #tpu.memory_space<vmem>>, vector<1x32x1024xbf16>
    %19 = vector.shape_cast %18 : vector<1x32x1024xbf16> to vector<32x1024xbf16>
    %20 = vector.shape_cast %17 : vector<32x1024xbf16> to vector<1x32x1024xbf16>
    tpu.vector_store %arg8[%c0_15, %c0_16, %c0_17], %20 {strides = array<i32>} : memref<1x32x1024xbf16, #tpu.memory_space<vmem>>, vector<1x32x1024xbf16>,
    return
  }
  func.func @transform_0(%arg0: i32, %arg1: i32) -> (i32, i32, i32) {
    %c0_i32 = arith.constant 0 : i32
    %c0_i32_0 = arith.constant 0 : i32
    return %arg0, %c0_i32, %arg1 : i32, i32, i32
  }
  func.func @transform_1(%arg0: i32, %arg1: i32) -> (i32, i32, i32) {
    %c0_i32 = arith.constant 0 : i32
    %c0_i32_0 = arith.constant 0 : i32
    return %arg0, %c0_i32, %arg1 : i32, i32, i32
  }
  func.func @transform_2(%arg0: i32, %arg1: i32) -> (i32, i32, i32) {
    %c0_i32 = arith.constant 0 : i32
    %c0_i32_0 = arith.constant 0 : i32
    return %arg0, %c0_i32, %arg1 : i32, i32, i32
  }
  func.func @transform_3(%arg0: i32, %arg1: i32) -> (i32, i32) {
    %c0_i32 = arith.constant 0 : i32
    %c0_i32_0 = arith.constant 0 : i32
    %c0_i32_1 = arith.constant 0 : i32
    return %c0_i32, %c0_i32_0 : i32, i32
  }
  func.func @transform_4(%arg0: i32, %arg1: i32) -> (i32, i32) {
    %c0_i32 = arith.constant 0 : i32
    %c0_i32_0 = arith.constant 0 : i32
    %c0_i32_1 = arith.constant 0 : i32
    return %c0_i32, %c0_i32_0 : i32, i32
  }
  func.func @transform_5(%arg0: i32, %arg1: i32) -> (i32, i32) {
    %c0_i32 = arith.constant 0 : i32
    %c0_i32_0 = arith.constant 0 : i32
    %c0_i32_1 = arith.constant 0 : i32
    return %c0_i32, %c0_i32_0 : i32, i32
  }
  func.func @transform_6(%arg0: i32, %arg1: i32) -> (i32, i32, i32) {
    %c0_i32 = arith.constant 0 : i32
    %c0_i32_0 = arith.constant 0 : i32
    return %arg0, %c0_i32, %arg1 : i32, i32, i32
  }
}

module attributes {stable_mosaic.version = 11 : i64} {
  func.func @_latent_kernel(%arg0: memref<36x512xbf16, #tpu.memory_space<vmem>>, %arg1: memref<36x512xbf16, #tpu.memory_space<vmem>>, %arg2: memref<512x1024xbf16, #tpu.memory_space<vmem>>, %arg3: memref<512x1024xbf16, #tpu.memory_space<vmem>>, %arg4: memref<3x1024xf32, #tpu.memory_space<vmem>>, %arg5: memref<1024x512xbf16, #tpu.memory_space<vmem>>, %arg6: memref<36x512xf32, #tpu.memory_space<vmem>>, %arg7: memref<36x512xf32, #tpu.memory_space<vmem>>) attributes {dimension_semantics = [], scalar_prefetch = 0 : i64, scratch_operands = 0 : i64, tpu.core_type = #tpu.core_type<tc>} {
    %c0 = arith.constant 0 : index
    %c0_0 = arith.constant 0 : index
    %0 = vector.load %arg0[%c0, %c0_0] : memref<36x512xbf16, #tpu.memory_space<vmem>>, vector<36x512xbf16>
    %c0_1 = arith.constant 0 : index
    %c0_2 = arith.constant 0 : index
    %1 = vector.load %arg1[%c0_1, %c0_2] : memref<36x512xbf16, #tpu.memory_space<vmem>>, vector<36x512xbf16>
    %c0_3 = arith.constant 0 : index
    %c0_4 = arith.constant 0 : index
    %2 = vector.load %arg2[%c0_3, %c0_4] : memref<512x1024xbf16, #tpu.memory_space<vmem>>, vector<512x1024xbf16>
    %cst = arith.constant dense<0.000000e+00> : vector<36x1024xf32>
    %3 = tpu.matmul %0, %2, %cst {dimension_numbers = #tpu.dot_dimension_numbers<[1], [0], [0], [1], [0, 0, 1, 1], [], []>} : vector<36x512xbf16>, vector<512x1024xbf16>, vector<36x1024xf32> -> vector<36x1024xf32>
    %c0_5 = arith.constant 0 : index
    %c0_6 = arith.constant 0 : index
    %4 = vector.load %arg3[%c0_5, %c0_6] : memref<512x1024xbf16, #tpu.memory_space<vmem>>, vector<512x1024xbf16>
    %cst_7 = arith.constant dense<0.000000e+00> : vector<36x1024xf32>
    %5 = tpu.matmul %1, %4, %cst_7 {dimension_numbers = #tpu.dot_dimension_numbers<[1], [0], [0], [1], [0, 0, 1, 1], [], []>} : vector<36x512xbf16>, vector<512x1024xbf16>, vector<36x1024xf32> -> vector<36x1024xf32>
    %6 = arith.addf %3, %5 : vector<36x1024xf32>
    %c0_8 = arith.constant 0 : index
    %c0_9 = arith.constant 0 : index
    %7 = vector.load %arg4[%c0_8, %c0_9] : memref<3x1024xf32, #tpu.memory_space<vmem>>, vector<1x1024xf32>
    %8 = vector.broadcast %7 : vector<1x1024xf32> to vector<36x1024xf32>
    %9 = arith.addf %6, %8 : vector<36x1024xf32>
    %cst_10 = arith.constant dense<0.000000e+00> : vector<36xf32>
    %10 = vector.multi_reduction <add>, %9, %cst_10 [1] : vector<36x1024xf32> to vector<36xf32>
    %11 = vector.shape_cast %10 : vector<36xf32> to vector<36x1xf32>
    %cst_11 = arith.constant 1.024000e+03 : f32
    %12 = vector.broadcast %cst_11 : f32 to vector<36x1xf32>
    %13 = arith.divf %11, %12 : vector<36x1xf32>
    %14 = vector.broadcast %13 : vector<36x1xf32> to vector<36x1024xf32>
    %15 = arith.subf %9, %14 : vector<36x1024xf32>
    %16 = arith.mulf %15, %15 : vector<36x1024xf32>
    %cst_12 = arith.constant dense<0.000000e+00> : vector<36xf32>
    %17 = vector.multi_reduction <add>, %16, %cst_12 [1] : vector<36x1024xf32> to vector<36xf32>
    %18 = vector.shape_cast %17 : vector<36xf32> to vector<36x1xf32>
    %cst_13 = arith.constant 1.024000e+03 : f32
    %19 = vector.broadcast %cst_13 : f32 to vector<36x1xf32>
    %20 = arith.divf %18, %19 : vector<36x1xf32>
    %21 = vector.broadcast %13 : vector<36x1xf32> to vector<36x1024xf32>
    %22 = arith.subf %9, %21 : vector<36x1024xf32>
    %cst_14 = arith.constant 9.99999974E-6 : f32
    %23 = vector.broadcast %cst_14 : f32 to vector<36x1xf32>
    %24 = arith.addf %20, %23 : vector<36x1xf32>
    %25 = math.rsqrt %24 : vector<36x1xf32>
    %26 = vector.broadcast %25 : vector<36x1xf32> to vector<36x1024xf32>
    %27 = arith.mulf %22, %26 : vector<36x1024xf32>
    %c1 = arith.constant 1 : index
    %c0_15 = arith.constant 0 : index
    %28 = vector.load %arg4[%c1, %c0_15] : memref<3x1024xf32, #tpu.memory_space<vmem>>, vector<1x1024xf32>
    %29 = vector.broadcast %28 : vector<1x1024xf32> to vector<36x1024xf32>
    %30 = arith.mulf %27, %29 : vector<36x1024xf32>
    %c2 = arith.constant 2 : index
    %c0_16 = arith.constant 0 : index
    %31 = vector.load %arg4[%c2, %c0_16] : memref<3x1024xf32, #tpu.memory_space<vmem>>, vector<1x1024xf32>
    %32 = vector.broadcast %31 : vector<1x1024xf32> to vector<36x1024xf32>
    %33 = arith.addf %30, %32 : vector<36x1024xf32>
    %cst_17 = arith.constant 0.000000e+00 : f32
    %34 = vector.broadcast %cst_17 : f32 to vector<36x1024xf32>
    %35 = arith.cmpf oge, %33, %34 : vector<36x1024xf32>
    %cst_18 = arith.constant 0.00999999977 : f32
    %36 = vector.broadcast %cst_18 : f32 to vector<36x1024xf32>
    %37 = arith.mulf %36, %33 : vector<36x1024xf32>
    %38 = arith.select %35, %33, %37 : vector<36x1024xi1>, vector<36x1024xf32>
    %39 = arith.truncf %38 : vector<36x1024xf32> to vector<36x1024xbf16>
    %c0_19 = arith.constant 0 : index
    %c0_20 = arith.constant 0 : index
    %40 = vector.load %arg5[%c0_19, %c0_20] : memref<1024x512xbf16, #tpu.memory_space<vmem>>, vector<1024x512xbf16>
    %cst_21 = arith.constant dense<0.000000e+00> : vector<36x512xf32>
    %41 = tpu.matmul %39, %40, %cst_21 {dimension_numbers = #tpu.dot_dimension_numbers<[1], [0], [0], [1], [0, 0, 1, 1], [], []>} : vector<36x1024xbf16>, vector<1024x512xbf16>, vector<36x512xf32> -> vector<36x512xf32>
    %c0_22 = arith.constant 0 : index
    %c0_23 = arith.constant 0 : index
    %42 = vector.load %arg6[%c0_22, %c0_23] : memref<36x512xf32, #tpu.memory_space<vmem>>, vector<36x512xf32>
    %43 = arith.addf %41, %42 : vector<36x512xf32>
    %c0_24 = arith.constant 0 : index
    %c0_25 = arith.constant 0 : index
    %44 = vector.load %arg7[%c0_24, %c0_25] : memref<36x512xf32, #tpu.memory_space<vmem>>, vector<36x512xf32>
    tpu.vector_store %arg7[%c0_24, %c0_25], %43 {strides = array<i32>} : memref<36x512xf32, #tpu.memory_space<vmem>>, vector<36x512xf32>,
    return
  }
}

</mosaic_0001>

<bundles_post_ra>
// kernel: post_process_forward.3
= control target key start
LH: loop header
LB: loop body
LE: loop exit
PB: predicated region body
PF: predicated region fallthrough
CT: control target
= control target key end

     0   :  { %s1820_s21 = smov 0   ;;  %s1822_s22 = smov 0   ;;  %s2293_s0 = inlined_call_operand.vmem [shape: bf16[2,32,4096], index: 0, kind: input, shape index: {}]   ;;  %s2294_s1 = inlined_call_operand.vmem [shape: bf16[2,32,4096], index: 1, kind: input, shape index: {}]   ;;  %s2295_s2 = inlined_call_operand.vmem [shape: f32[2,1,4096], index: 2, kind: input, shape index: {}]   ;;  %s2296_s3 = inlined_call_operand.vmem [shape: bf16[32,32], index: 3, kind: input, shape index: {}]   ;;  %s2297_s4 = inlined_call_operand.vmem [shape: bf16[32,32], index: 4, kind: input, shape index: {}]   ;;  %s2298_s5 = inlined_call_operand.vmem [shape: f32[32,1], index: 5, kind: input, shape index: {}]   ;;  %s2299_s6 = inlined_call_operand.vmem [shape: bf16[2,32,4096], index: 6, kind: output, shape index: {}]  }
   0x1   :  { %s1824_s23 = smov 0   ;;  %s1826_s24 = smov 0  }
   0x2   :  { %s1828_s25 = smov 0   ;;  %s1830_s26 = smov 0  }
   0x3   :  { %s1832_s27 = smov 0  }
   0x4 LB: > { %s25_s28 = sadd.s32 1, %s1774_s25  ;;  %s28_s29 = sadd.s32 1, %s1778_s26  ;;  %s1782_s27 = sphi %s1832_s27, %s16_s27   ;;  %s1778_s26 = sphi %s1830_s26, %s2307_s26   ;;  %s1774_s25 = sphi %s1828_s25, %s2306_s25   ;;  %s1770_s24 = sphi %s1826_s24, %s2305_s24   ;;  %s1766_s23 = sphi %s1824_s23, %s2304_s23   ;;  %s1762_s22 = sphi %s1822_s22, %s2303_s22   ;;  %s1758_s21 = sphi %s1820_s21, %s2302_s21  }
   0x5   : > { %p26_p0 = scmp.ge.s32.totalorder %s25_s28, 4  ;;  %s1557_s30 = sadd.s32 4294967295, %s1782_s27  }
   0x6   : > { %p44_p1 = scmp.ne.s32.totalorder %s1762_s22, %s1758_s21  ;;  %p45_p2 = scmp.eq.s32.totalorder %s1782_s27, 0 }
   0x7   : > { %s2309_s28 = smov (%p26_p0, %s25_s28), 0  ;;  %s2311_s29 = smov (!%p26_p0, %s28_s29), %s1778_s26 }
   0x8   : > { %p30_p3 = scmp.ge.s32.totalorder %s2311_s29, 2  ;;  %p195_p4 = scmp.eq.s32.totalorder %s1557_s30, 7 }
   0x9   : > { %s33_s7 = ssub.s32 %s1774_s25, %s2309_s28  ;;  %p1866_p5 = por %p45_p2, %p44_p1 }
   0xa   : > { %s2313_s29 = smov (%p30_p3, %s2311_s29), 0  ;;  %p1872_p6 = por %p195_p4, %p44_p1 }
   0xb   : > { %s32_s10 = ssub.s32 %s1778_s26, %s2313_s29  ;;  %s37_s12 = sadd.s32 1, %s1762_s22 }
   0xc   : > { %s34_s11 = sor.u32 %s33_s7, %s32_s10  ;;  %p1560_p8 = scmp.ge.s32.totalorder %s1782_s27, 8 }
   0xd   : > { %p35_p7 = scmp.eq.s32.totalorder %s34_s11, 0 }
   0xe   : > { %226 = sbr.rel (%p1560_p8) target bundleno = 51 (0x33), region = 28 }
   0xf   : > { %s1880_s13 = scalar_select %p35_p7, %s1762_s22, %s37_s12  }
  0x15   : > { %229 = sbr.rel (!%p1866_p5) target bundleno = 36 (0x24), region = 32  ;;  %s231_s14 = sand.u32 (%p1866_p5), 1, %s1762_s22  }
  0x16   : > { %s1562_s15 = sshll.u32 (%p1866_p5), %s1774_s25, 3  ;;  %s1561_s16 = sshll.u32 (%p1866_p5), %s231_s14, 7 }
  0x17   : > { %s1563_s17 = sshll.u32 (%p1866_p5), %s1778_s26, 7  ;;  %s233_s10 = scalar_lea.vmem (%p1866_p5), [#allocation2], %s1561_s16 }
  0x18   : > { %s236_s18 = sadd.s32 (%p1866_p5), %s1563_s17, %s1562_s15 }
  0x19   : > { %s1564_s19 = sshll.u32 (%p1866_p5), %s236_s18, 2 }
  0x1a   : > { %s1891_s7 = scalar_lea.vmem (%p1866_p5), %s2293_s0, %s1564_s19 }
  0x1b   : > { %v251_v0 = vld [vmem:[%s1891_s7] sm:$0xff] (%p1866_p5)  ;;  %v253_v1 = vld [vmem:[%s1891_s7 + $0x8] sm:$0xff] (%p1866_p5)  ;;  %v255_v2 = vld [vmem:[%s1891_s7 + $0x10] sm:$0xff] (%p1866_p5) }
  0x1c   : > { %252 = vst [vmem:[%s233_s10] sm:$0xff] %v251_v0  ;;  %254 = vst [vmem:[%s233_s10 + $0x8] sm:$0xff] %v253_v1  ;;  %v257_v3 = vld [vmem:[%s1891_s7 + $0x18] sm:$0xff]  ;;  %v259_v4 = vld [vmem:[%s1891_s7 + $0x80] sm:$0xff] }
  0x1d   : > { %256 = vst [vmem:[%s233_s10 + $0x10] sm:$0xff] %v255_v2  ;;  %v261_v5 = vld [vmem:[%s1891_s7 + $0x88] sm:$0xff]  ;;  %258 = vst [vmem:[%s233_s10 + $0x18] sm:$0xff] %v257_v3  ;;  %v263_v6 = vld [vmem:[%s1891_s7 + $0x90] sm:$0xff] }
  0x1e   : > { %260 = vst [vmem:[%s233_s10 + $0x20] sm:$0xff] %v259_v4  ;;  %262 = vst [vmem:[%s233_s10 + $0x28] sm:$0xff] %v261_v5  ;;  %v265_v7 = vld [vmem:[%s1891_s7 + $0x98] sm:$0xff]  ;;  %v267_v8 = vld [vmem:[%s1891_s7 + $0x100] sm:$0xff] }
  0x1f   : > { %264 = vst [vmem:[%s233_s10 + $0x30] sm:$0xff] %v263_v6  ;;  %266 = vst [vmem:[%s233_s10 + $0x38] sm:$0xff] %v265_v7  ;;  %v269_v9 = vld [vmem:[%s1891_s7 + $0x108] sm:$0xff]  ;;  %v271_v10 = vld [vmem:[%s1891_s7 + $0x110] sm:$0xff] }
  0x20   : > { %268 = vst [vmem:[%s233_s10 + $0x40] sm:$0xff] %v267_v8  ;;  %v273_v11 = vld [vmem:[%s1891_s7 + $0x118] sm:$0xff]  ;;  %270 = vst [vmem:[%s233_s10 + $0x48] sm:$0xff] %v269_v9  ;;  %v275_v12 = vld [vmem:[%s1891_s7 + $0x180] sm:$0xff] }
  0x21   : > { %272 = vst [vmem:[%s233_s10 + $0x50] sm:$0xff] %v271_v10  ;;  %274 = vst [vmem:[%s233_s10 + $0x58] sm:$0xff] %v273_v11  ;;  %v277_v13 = vld [vmem:[%s1891_s7 + $0x188] sm:$0xff]  ;;  %v279_v14 = vld [vmem:[%s1891_s7 + $0x190] sm:$0xff] }
  0x22   : > { %276 = vst [vmem:[%s233_s10 + $0x60] sm:$0xff] %v275_v12  ;;  %278 = vst [vmem:[%s233_s10 + $0x68] sm:$0xff] %v277_v13  ;;  %v281_v15 = vld [vmem:[%s1891_s7 + $0x198] sm:$0xff] }
  0x23   : > { %280 = vst [vmem:[%s233_s10 + $0x70] sm:$0xff] %v279_v14  ;;  %282 = vst [vmem:[%s233_s10 + $0x78] sm:$0xff] %v281_v15 }
  0x24 PF: > { %288 = sbr.rel (!%p1866_p5) target bundleno = 51 (0x33), region = 55  ;;  %s290_s11 = sand.u32 (%p1866_p5), 1, %s1762_s22  }
  0x25   : > { %s1566_s12 = sshll.u32 (%p1866_p5), %s1774_s25, 3  ;;  %s1565_s14 = sshll.u32 (%p1866_p5), %s290_s11, 7 }
  0x26   : > { %s1567_s15 = sshll.u32 (%p1866_p5), %s1778_s26, 7  ;;  %s292_s8 = scalar_lea.vmem (%p1866_p5), [#allocation3], %s1565_s14 }
  0x27   : > { %s295_s16 = sadd.s32 (%p1866_p5), %s1567_s15, %s1566_s12 }
  0x28   : > { %s1568_s17 = sshll.u32 (%p1866_p5), %s295_s16, 2 }
  0x29   : > { %s1917_s20 = scalar_lea.vmem (%p1866_p5), %s2294_s1, %s1568_s17 }
  0x2a   : > { %v310_v16 = vld [vmem:[%s1917_s20] sm:$0xff] (%p1866_p5)  ;;  %v312_v17 = vld [vmem:[%s1917_s20 + $0x8] sm:$0xff] (%p1866_p5)  ;;  %v314_v18 = vld [vmem:[%s1917_s20 + $0x10] sm:$0xff] (%p1866_p5) }
  0x2b   : > { %311 = vst [vmem:[%s292_s8] sm:$0xff] %v310_v16  ;;  %313 = vst [vmem:[%s292_s8 + $0x8] sm:$0xff] %v312_v17  ;;  %v316_v19 = vld [vmem:[%s1917_s20 + $0x18] sm:$0xff]  ;;  %v318_v20 = vld [vmem:[%s1917_s20 + $0x80] sm:$0xff] }
  0x2c   : > { %315 = vst [vmem:[%s292_s8 + $0x10] sm:$0xff] %v314_v18  ;;  %v320_v21 = vld [vmem:[%s1917_s20 + $0x88] sm:$0xff]  ;;  %317 = vst [vmem:[%s292_s8 + $0x18] sm:$0xff] %v316_v19  ;;  %v322_v22 = vld [vmem:[%s1917_s20 + $0x90] sm:$0xff] }
  0x2d   : > { %319 = vst [vmem:[%s292_s8 + $0x20] sm:$0xff] %v318_v20  ;;  %321 = vst [vmem:[%s292_s8 + $0x28] sm:$0xff] %v320_v21  ;;  %v324_v23 = vld [vmem:[%s1917_s20 + $0x98] sm:$0xff]  ;;  %v326_v24 = vld [vmem:[%s1917_s20 + $0x100] sm:$0xff] }
  0x2e   : > { %323 = vst [vmem:[%s292_s8 + $0x30] sm:$0xff] %v322_v22  ;;  %325 = vst [vmem:[%s292_s8 + $0x38] sm:$0xff] %v324_v23  ;;  %v328_v25 = vld [vmem:[%s1917_s20 + $0x108] sm:$0xff]  ;;  %v330_v26 = vld [vmem:[%s1917_s20 + $0x110] sm:$0xff] }
  0x2f   : > { %327 = vst [vmem:[%s292_s8 + $0x40] sm:$0xff] %v326_v24  ;;  %v332_v27 = vld [vmem:[%s1917_s20 + $0x118] sm:$0xff]  ;;  %329 = vst [vmem:[%s292_s8 + $0x48] sm:$0xff] %v328_v25  ;;  %v334_v28 = vld [vmem:[%s1917_s20 + $0x180] sm:$0xff] }
  0x30   : > { %331 = vst [vmem:[%s292_s8 + $0x50] sm:$0xff] %v330_v26  ;;  %333 = vst [vmem:[%s292_s8 + $0x58] sm:$0xff] %v332_v27  ;;  %v336_v29 = vld [vmem:[%s1917_s20 + $0x188] sm:$0xff]  ;;  %v338_v30 = vld [vmem:[%s1917_s20 + $0x190] sm:$0xff] }
  0x31   : > { %335 = vst [vmem:[%s292_s8 + $0x60] sm:$0xff] %v334_v28  ;;  %337 = vst [vmem:[%s292_s8 + $0x68] sm:$0xff] %v336_v29  ;;  %v340_v31 = vld [vmem:[%s1917_s20 + $0x198] sm:$0xff] }
  0x32   : > { %339 = vst [vmem:[%s292_s8 + $0x70] sm:$0xff] %v338_v30  ;;  %341 = vst [vmem:[%s292_s8 + $0x78] sm:$0xff] %v340_v31 }
  0x33 PF: > { %p1569_p9 = scmp.ge.s32.totalorder %s1782_s27, 1  ;;  %p358_p10 = scmp.lt.s32.totalorder %s1782_s27, 9 }
  0x35   : > { %p359_p11 = pnand %p1569_p9, %p358_p10 }
  0x36   : > { %s365_s30 = sand.u32 (!%p359_p11), 1, %s1758_s21   ;;  %v1784_v32 = vmov (!%p359_p11), 0   ;;  %v1724_v55 = vld [vmem:[%s2296_s3] sm:$0xff] (!%p359_p11)   ;;  %vm552_vm0 = vcmask (!%p359_p11), 261120   ;;  %v1222_v8 = vld [vmem:[%s2298_s5 + $0x10] sm:$0xff] (!%p359_p11)  ;;  %v1725_v10 = vld [vmem:[%s2296_s3 + $0x8] sm:$0xff] (!%p359_p11)  }
  0x37   : > { %362 = sbr.rel (%p359_p11) target bundleno = 365 (0x16d), region = 82  ;;  %s1938_s7 = sshll.u32 (!%p359_p11), %s365_s30, 7  ;;  %591 = vmatprep.mubr.bf16.mxu0 (!%p359_p11), %v1784_v32  ;;  %644 = vmatprep.mubr.bf16.mxu1 (!%p359_p11), %v1784_v32  ;;  %v1220_v5 = vld [vmem:[%s2298_s5] sm:$0xff] (!%p359_p11)  ;;  %v1221_v11 = vld [vmem:[%s2298_s5 + $0x8] sm:$0xff] (!%p359_p11)  ;;  %v1223_v12 = vld [vmem:[%s2298_s5 + $0x18] sm:$0xff] (!%p359_p11) }
  0x38   : > { %1722 = vset.pattern.permute.xlu0 (!%p359_p11), %v1784_v32  ;;  %1723 = vset.pattern.permute.xlu1 (!%p359_p11), %v1784_v32  ;;  %s1945_s10 = scalar_lea.vmem (!%p359_p11), [#allocation2], %s1938_s7  ;;  %s1967_s12 = scalar_lea.vmem (!%p359_p11), [#allocation3], %s1938_s7  ;;  %v1726_v29 = vld [vmem:[%s2297_s4] sm:$0xff] (!%p359_p11)  }
  0x39   : > { %v425_v33 = vld [vmem:[%s1945_s10] sm:$0xff] (!%p359_p11)  ;;  %v426_v35 = vld [vmem:[%s1945_s10 + $0x8] sm:$0xff] (!%p359_p11)  ;;  %v427_v46 = vld [vmem:[%s1945_s10 + $0x10] sm:$0xff] (!%p359_p11)  ;;  %1226 = vperm.xlu0 (!%p359_p11), %1722, %v1220_v5   ;;  %1236 = vperm.xlu1 (!%p359_p11), %1723, %v1222_v8   ;;  %p415_p12 = scmp.lt.s32.totalorder (!%p359_p11), %s1770_s24, 1  ;;  %s2161_s30 = scalar_lea.vmem (!%p359_p11), [#allocation4], %s1938_s7 }
  0x3a   : > { %v429_v34 = vld [vmem:[%s1945_s10 + $0x20] sm:$0xff] (!%p359_p11)  ;;  %v430_v37 = vld [vmem:[%s1945_s10 + $0x28] sm:$0xff] (!%p359_p11)  ;;  %v431_v48 = vld [vmem:[%s1945_s10 + $0x30] sm:$0xff] (!%p359_p11) }
  0x3b   : > { %v1578_v36 = vcombine.high (!%p359_p11), %v425_v33, %v429_v34  ;;  %v1577_v38 = vcombine.low (!%p359_p11), %v425_v33, %v429_v34  ;;  %v433_v39 = vld [vmem:[%s1945_s10 + $0x40] sm:$0xff] (!%p359_p11)  ;;  %v1580_v41 = vcombine.high (!%p359_p11), %v426_v35, %v430_v37  ;;  %v1579_v42 = vcombine.low (!%p359_p11), %v426_v35, %v430_v37  ;;  %v434_v44 = vld [vmem:[%s1945_s10 + $0x48] sm:$0xff] (!%p359_p11)  ;;  %v428_v49 = vld [vmem:[%s1945_s10 + $0x18] sm:$0xff] (!%p359_p11) }
  0x3c   : > { %v437_v40 = vld [vmem:[%s1945_s10 + $0x60] sm:$0xff] (!%p359_p11)  ;;  %v438_v45 = vld [vmem:[%s1945_s10 + $0x68] sm:$0xff] (!%p359_p11)  ;;  %v432_v50 = vld [vmem:[%s1945_s10 + $0x38] sm:$0xff] (!%p359_p11)  ;;  %v1582_v53 = vcombine.high (!%p359_p11), %v427_v46, %v431_v48  ;;  %v1581_v58 = vcombine.low (!%p359_p11), %v427_v46, %v431_v48 }
  0x3d   : > { %v1586_v43 = vcombine.high (!%p359_p11), %v433_v39, %v437_v40  ;;  %559 = vmatprep.subr.bf16.mxu0 (!%p359_p11), %v1578_v36  ;;  %v1588_v47 = vcombine.high (!%p359_p11), %v434_v44, %v438_v45  ;;  %612 = vmatprep.subr.bf16.mxu1 (!%p359_p11), %v1580_v41  ;;  %v1585_v51 = vcombine.low (!%p359_p11), %v433_v39, %v437_v40  ;;  %v435_v56 = vld [vmem:[%s1945_s10 + $0x50] sm:$0xff] (!%p359_p11)  ;;  %v436_v59 = vld [vmem:[%s1945_s10 + $0x58] sm:$0xff] (!%p359_p11)  ;;  %v441_v62 = vld [vmem:[%s1967_s12] sm:$0xff] (!%p359_p11) }
  0x3e   : > { %560 = vmatpush1.bf16.msra.mxu0 %v1577_v38  ;;  %613 = vmatpush1.bf16.msra.mxu1 %v1579_v42  ;;  %v1587_v52 = vcombine.low %v434_v44, %v438_v45  ;;  %v1584_v54 = vcombine.high %v428_v49, %v432_v50  ;;  %v439_v57 = vld [vmem:[%s1945_s10 + $0x70] sm:$0xff]  ;;  %v440_v60 = vld [vmem:[%s1945_s10 + $0x78] sm:$0xff]  ;;  %v1583_v61 = vcombine.low %v428_v49, %v432_v50  ;;  %v445_v0 = vld [vmem:[%s1967_s12 + $0x20] sm:$0xff]  ;;  %s416_s16 = scalar_select %p415_p12, %s1770_s24, 1 }
  0x3f   : > { %561 = vmatprep.subr.bf16.mxu0 %v1586_v43  ;;  %614 = vmatprep.subr.bf16.mxu1 %v1588_v47  ;;  %v1590_v63 = vcombine.high %v435_v56, %v439_v57  ;;  %v1592_v1 = vcombine.high %v436_v59, %v440_v60  ;;  %v442_v2 = vld [vmem:[%s1967_s12 + $0x8] sm:$0xff]  ;;  %v1589_v4 = vcombine.low %v435_v56, %v439_v57  ;;  %v449_v13 = vld [vmem:[%s1967_s12 + $0x40] sm:$0xff]  ;;  %v443_v20 = vld [vmem:[%s1967_s12 + $0x10] sm:$0xff]  ;;  %s1645_s7 = sshll.u32 (%p1872_p6), %s1770_s24, 7 }
  0x40   : > { %v446_v3 = vld [vmem:[%s1967_s12 + $0x28] sm:$0xff]  ;;  %v1591_v6 = vcombine.low %v436_v59, %v440_v60  ;;  %v1604_v7 = vcombine.high %v441_v62, %v445_v0  ;;  %1231 = vperm.xlu0 %1722, %v1221_v11   ;;  %1241 = vperm.xlu1 %1723, %v1223_v12   ;;  %v453_v14 = vld [vmem:[%s1967_s12 + $0x60] sm:$0xff]  ;;  %v1603_v15 = vcombine.low %v441_v62, %v445_v0  ;;  %v447_v21 = vld [vmem:[%s1967_s12 + $0x30] sm:$0xff]  ;;  %v1116_v0 = vlaneseq }
  0x41   : > { %v1606_v9 = vcombine.high %v442_v2, %v446_v3  ;;  %v450_v16 = vld [vmem:[%s1967_s12 + $0x48] sm:$0xff]  ;;  %v1605_v18 = vcombine.low %v442_v2, %v446_v3  ;;  %v1612_v19 = vcombine.high %v449_v13, %v453_v14  ;;  %v444_v23 = vld [vmem:[%s1967_s12 + $0x18] sm:$0xff]  ;;  %v1611_v25 = vcombine.low %v449_v13, %v453_v14  ;;  %v451_v30 = vld [vmem:[%s1967_s12 + $0x50] sm:$0xff] }
  0x42   : > { %562 = vmatpush1.bf16.msra.mxu0 %v1585_v51  ;;  %615 = vmatpush1.bf16.msra.mxu1 %v1587_v52  ;;  %v454_v17 = vld [vmem:[%s1967_s12 + $0x68] sm:$0xff]  ;;  %v448_v24 = vld [vmem:[%s1967_s12 + $0x38] sm:$0xff]  ;;  %v1608_v27 = vcombine.high %v443_v20, %v447_v21  ;;  %v455_v31 = vld [vmem:[%s1967_s12 + $0x70] sm:$0xff]  ;;  %v1607_v33 = vcombine.low %v443_v20, %v447_v21  ;;  %v1117_v2 = vshrl.u32 %v1116_v0, 7 }
  0x43   : > { %665 = vmatprep.subr.bf16.mxu0 %v1582_v53  ;;  %718 = vmatprep.subr.bf16.mxu1 %v1584_v54  ;;  %v1614_v22 = vcombine.high %v450_v16, %v454_v17  ;;  %v1613_v26 = vcombine.low %v450_v16, %v454_v17  ;;  %v1610_v28 = vcombine.high %v444_v23, %v448_v24  ;;  %v452_v34 = vld [vmem:[%s1967_s12 + $0x58] sm:$0xff]  ;;  %v1727_v41 = vld [vmem:[%s2297_s4 + $0x8] sm:$0xff]  }
  0x44   : > { %v456_v35 = vld [vmem:[%s1967_s12 + $0x78] sm:$0xff]  ;;  %v1609_v36 = vcombine.low %v444_v23, %v448_v24  ;;  %v1616_v37 = vcombine.high %v451_v30, %v455_v31  ;;  %v1615_v39 = vcombine.low %v451_v30, %v455_v31  ;;  %s2067_s12 = sshll.u32 %s1766_s23, 3  ;;  %s1574_s23 = sshll.u32 %s416_s16, 5  ;;  %v1126_v13 = vsub.s32 2, %v1117_v2 }
  0x45   : > { %1593 = vmatmul.mubr.msk.bf16.vlgmr.msra.gmra.mrb[0].mxu0 %vm552_vm0, %v1724_v55  ;;  %1595 = vmatmul.mubr.msk.bf16.vlgmr.msra.gmra.mrb[0].mxu1 %vm552_vm0, %v1724_v55  ;;  %v1618_v38 = vcombine.high %v452_v34, %v456_v35  ;;  %v1617_v40 = vcombine.low %v452_v34, %v456_v35  ;;  %p417_p13 = scmp.lt.s32.totalorder %s2067_s12, 31  ;;  %v1122_v14 = vsub.s32 1, %v1117_v2  ;;  %v1134_v16 = vsub.s32 4, %v1117_v2  ;;  %s1397_s9 = sadd.s32 (%p1872_p6), %s1645_s7, %s2067_s12 }
  0x46   : > { %666 = vmatpush1.bf16.msra.mxu0 %v1581_v58  ;;  %719 = vmatpush1.bf16.msra.mxu1 %v1583_v61  ;;  %v1142_v17 = vsub.s32 6, %v1117_v2  ;;  %v1146_v20 = vsub.s32 7, %v1117_v2  ;;  %s1646_s10 = sshll.u32 (%p1872_p6), %s1397_s9, 2 }
  0x47   : > { %601 = vmatprep.mubr.bf16.mxu0 %v1784_v32  ;;  %654 = vmatprep.mubr.bf16.mxu1 %v1784_v32  ;;  %s418_s17 = scalar_select %p417_p13, %s2067_s12, 31 }
  0x48   : > { %667 = vmatprep.subr.bf16.mxu0 %v1590_v63  ;;  %720 = vmatprep.subr.bf16.mxu1 %v1592_v1  ;;  %s1399_s14 = scalar_lea.vmem (%p1872_p6), %s2299_s6, %s1646_s10 }
  0x49   : > { %s420_s18 = sadd.s32 %s1574_s23, %s418_s17 }
  0x4a   : > { %668 = vmatpush1.bf16.msra.mxu0 %v1589_v4  ;;  %721 = vmatpush1.bf16.msra.mxu1 %v1591_v6  ;;  %s421_s8 = scalar_lea.vmem %s2295_s2, %s420_s18 }
  0x4b   : > { %871 = vmatprep.subr.bf16.mxu0 %v1604_v7  ;;  %924 = vmatprep.subr.bf16.mxu1 %v1606_v9  ;;  %v457_v12 = vld [vmem:[%s421_s8] sm:$0xff] }
  0x4c   : > { %v2114_v23 = vrot.slane %v457_v12, %v1122_v14  ;;  %v2125_v35 = vrot.slane %v457_v12, %v1142_v17 }
  0x4d   : > { %1594 = vmatmul.mubr.msk.bf16.gmra.mrb[4].mxu0 %vm552_vm0, %v1725_v10  ;;  %1596 = vmatmul.mubr.msk.bf16.gmra.mrb[4].mxu1 %vm552_vm0, %v1725_v10 }
  0x4e   : > { %697 = vmatprep.mubr.bf16.mxu0 %v1784_v32  ;;  %750 = vmatprep.mubr.bf16.mxu1 %v1784_v32 }
  0x55   : > { %1597 = vmatmul.mubr.msk.bf16.vlgmr.msra.gmra.mrb[8].mxu0 %vm552_vm0, %v1724_v55  ;;  %1599 = vmatmul.mubr.msk.bf16.vlgmr.msra.gmra.mrb[8].mxu1 %vm552_vm0, %v1724_v55 }
  0x56   : > { %872 = vmatpush1.bf16.msra.mxu0 %v1603_v15  ;;  %925 = vmatpush1.bf16.msra.mxu1 %v1605_v18  ;;  %v1130_v15 = vsub.s32 3, %v1117_v2  ;;  %v1138_v18 = vsub.s32 5, %v1117_v2 }
  0x57   : > { %707 = vmatprep.mubr.bf16.mxu0 %v1784_v32  ;;  %760 = vmatprep.mubr.bf16.mxu1 %v1784_v32 }
  0x58   : > { %873 = vmatprep.subr.bf16.mxu0 %v1612_v19  ;;  %926 = vmatprep.subr.bf16.mxu1 %v1614_v22  ;;  %v2112_v22 = vrot.slane %v457_v12, %v1126_v13 }
  0x5a   : > { %874 = vmatpush1.bf16.msra.mxu0 %v1611_v25  ;;  %927 = vmatpush1.bf16.msra.mxu1 %v1613_v26 }
  0x5b   : > { %977 = vmatprep.subr.bf16.mxu0 %v1608_v27  ;;  %1030 = vmatprep.subr.bf16.mxu1 %v1610_v28  ;;  %v2119_v28 = vrot.slane %v457_v12, %v1130_v15 }
  0x5d   : > { %1598 = vmatmul.mubr.msk.bf16.gmra.mrb[12].mxu0 %vm552_vm0, %v1725_v10  ;;  %1600 = vmatmul.mubr.msk.bf16.gmra.mrb[12].mxu1 %vm552_vm0, %v1725_v10  ;;  %v1118_v10 = vsub.s32 0, %v1117_v2 }
  0x5e   : > { %903 = vmatprep.mubr.bf16.mxu0 %v1784_v32  ;;  %956 = vmatprep.mubr.bf16.mxu1 %v1784_v32 }
  0x5f   : > { %v2110_v19 = vrot.slane %v457_v12, %v1118_v10 }
  0x65   : > { %1619 = vmatmul.mubr.msk.bf16.vlgmr.msra.gmra.mrb[16].mxu0 %vm552_vm0, %v1726_v29  ;;  %1621 = vmatmul.mubr.msk.bf16.vlgmr.msra.gmra.mrb[16].mxu1 %vm552_vm0, %v1726_v29 }
  0x66   : > { %978 = vmatpush1.bf16.msra.mxu0 %v1607_v33  ;;  %1031 = vmatpush1.bf16.msra.mxu1 %v1609_v36  ;;  %v2127_v36 = vrot.slane %v457_v12, %v1138_v18 }
  0x67   : > { %913 = vmatprep.mubr.bf16.mxu0 %v1784_v32  ;;  %966 = vmatprep.mubr.bf16.mxu1 %v1784_v32 }
  0x68   : > { %979 = vmatprep.subr.bf16.mxu0 %v1616_v37  ;;  %1032 = vmatprep.subr.bf16.mxu1 %v1618_v38 }
  0x6a   : > { %980 = vmatpush1.bf16.msra.mxu0 %v1615_v39  ;;  %1033 = vmatpush1.bf16.msra.mxu1 %v1617_v40 }
  0x6d   : > { %1620 = vmatmul.mubr.msk.bf16.gmra.mrb[20].mxu0 %vm552_vm0, %v1727_v41  ;;  %1622 = vmatmul.mubr.msk.bf16.gmra.mrb[20].mxu1 %vm552_vm0, %v1727_v41 }
  0x6e   : > { %1009 = vmatprep.mubr.bf16.mxu0 %v1784_v32  ;;  %1062 = vmatprep.mubr.bf16.mxu1 %v1784_v32 }
  0x75   : > { %1623 = vmatmul.mubr.msk.bf16.vlgmr.msra.gmra.mrb[24].mxu0 %vm552_vm0, %v1726_v29  ;;  %1625 = vmatmul.mubr.msk.bf16.vlgmr.msra.gmra.mrb[24].mxu1 %vm552_vm0, %v1726_v29  ;;  %v2121_v29 = vrot.slane %v457_v12, %v1134_v16 }
  0x76   : > { %1019 = vmatprep.mubr.bf16.mxu0 %v1784_v32  ;;  %1072 = vmatprep.mubr.bf16.mxu1 %v1784_v32 }
  0x7d   : > { %1624 = vmatmul.mubr.msk.bf16.gmra.mrb[28].mxu0 %vm552_vm0, %v1727_v41  ;;  %1626 = vmatmul.mubr.msk.bf16.gmra.mrb[28].mxu1 %vm552_vm0, %v1727_v41 }
  0xb8   : > { %v2116_v24 = vpop.permute.xlu0 %1226 }
  0xbf   : > { %v2143_v18 = vpop.permute.xlu0 %1231 }
 0x118   : > { %v2036_v42 = vpop.f32.mrb[0].mxu0  ;;  %v2038_v43 = vpop.f32.mrb[0].mxu1 }
 0x119   : > { %v2040_v44 = vpop.f32.mrb[1].mxu0  ;;  %v2042_v45 = vpop.f32.mrb[1].mxu1 }
 0x11a   : > { %v2044_v46 = vpop.f32.mrb[2].mxu0  ;;  %v2046_v47 = vpop.f32.mrb[2].mxu1 }
 0x11b   : > { %v2048_v32 = vpop.f32.mrb[3].mxu0  ;;  %v2050_v48 = vpop.f32.mrb[3].mxu1 }
 0x120   : > { %v2052_v49 = vpop.f32.mrb[4].mxu0  ;;  %v2054_v50 = vpop.f32.mrb[4].mxu1 }
 0x121   : > { %v2056_v51 = vpop.f32.mrb[5].mxu0  ;;  %v2058_v52 = vpop.f32.mrb[5].mxu1 }
 0x122   : > { %v2060_v53 = vpop.f32.mrb[6].mxu0  ;;  %v2062_v54 = vpop.f32.mrb[6].mxu1 }
 0x123   : > { %v2064_v55 = vpop.f32.mrb[7].mxu0  ;;  %v2070_v56 = vpop.f32.mrb[7].mxu1 }
 0x128   : > { %v2074_v57 = vpop.f32.mrb[8].mxu0  ;;  %v2076_v58 = vpop.f32.mrb[8].mxu1 }
 0x129   : > { %v2078_v59 = vpop.f32.mrb[9].mxu0  ;;  %v2080_v60 = vpop.f32.mrb[9].mxu1 }
 0x12a   : > { %v2082_v61 = vpop.f32.mrb[10].mxu0  ;;  %v2085_v62 = vpop.f32.mrb[10].mxu1 }
 0x12b   : > { %v2087_v63 = vpop.f32.mrb[11].mxu0  ;;  %v2089_v1 = vpop.f32.mrb[11].mxu1 }
 0x130   : > { %v2091_v3 = vpop.f32.mrb[12].mxu0  ;;  %v2093_v4 = vpop.f32.mrb[12].mxu1 }
 0x131   : > { %v2095_v5 = vpop.f32.mrb[13].mxu0  ;;  %v2100_v6 = vpop.f32.mrb[13].mxu1 }
 0x132   : > { %v2102_v7 = vpop.f32.mrb[14].mxu0  ;;  %v2104_v8 = vpop.f32.mrb[14].mxu1 }
 0x133   : > { %v2106_v9 = vpop.f32.mrb[15].mxu0  ;;  %v2108_v11 = vpop.f32.mrb[15].mxu1 }
 0x138   : > { %v905_v21 = vpop.f32.mrb[16].mxu0  ;;  %v958_v26 = vpop.f32.mrb[16].mxu1 }
 0x139   : > { %v1083_v25 = vsub.f32 %v2036_v42, %v905_v21  ;;  %v907_v27 = vpop.f32.mrb[17].mxu0  ;;  %v1085_v30 = vsub.f32 %v2038_v43, %v958_v26  ;;  %v960_v33 = vpop.f32.mrb[17].mxu1  ;;  %v2132_v42 = vrot.slane %v457_v12, %v1146_v20 }
 0x13a   : > { %v1084_v31 = vsub.f32 %v2040_v44, %v907_v27  ;;  %v909_v34 = vpop.f32.mrb[18].mxu0  ;;  %v1086_v38 = vsub.f32 %v2042_v45, %v960_v33  ;;  %v962_v40 = vpop.f32.mrb[18].mxu1 }
 0x13b   : > { %v1156_v37 = vmul.f32 %v2110_v19, %v1083_v25  ;;  %v1091_v39 = vsub.f32 %v2044_v46, %v909_v34  ;;  %v911_v41 = vpop.f32.mrb[19].mxu0  ;;  %v1158_v43 = vmul.f32 %v2112_v22, %v1085_v30  ;;  %v1093_v0 = vsub.f32 %v2046_v47, %v962_v40  ;;  %v964_v10 = vpop.f32.mrb[19].mxu1 }
 0x13c   : > { %v1157_v44 = vmul.f32 %v2114_v23, %v1084_v31  ;;  %v1092_v2 = vsub.f32 %v2048_v32, %v911_v41  ;;  %v1159_v14 = vmul.f32 %v2119_v28, %v1086_v38  ;;  %v1094_v46 = vsub.f32 %v2050_v48, %v964_v10 }
 0x13d   : > { %v1188_v13 = vadd.f32 %v1156_v37, %v905_v21  ;;  %v1164_v45 = vmul.f32 %v2110_v19, %v1091_v39  ;;  %v1190_v15 = vadd.f32 %v1158_v43, %v958_v26  ;;  %v1166_v12 = vmul.f32 %v2112_v22, %v1093_v0 }
 0x13e   : > { %v1189_v16 = vadd.f32 %v1157_v44, %v907_v27  ;;  %v1165_v17 = vmul.f32 %v2114_v23, %v1092_v2  ;;  %v1191_v20 = vadd.f32 %v1159_v14, %v960_v33  ;;  %v1167_v32 = vmul.f32 %v2119_v28, %v1094_v46  ;;  %v2149_v27 = vpop.permute.xlu1 %1236 }
 0x13f   : > { %v1196_v47 = vadd.f32 %v1164_v45, %v909_v34  ;;  %v1244_v21 = vadd.f32 %v2116_v24, %v1188_v13  ;;  %v1198_v25 = vadd.f32 %v1166_v12, %v962_v40  ;;  %v1246_v48 = vadd.f32 %v2116_v24, %v1190_v15 }
 0x140   : > { %v1197_v30 = vadd.f32 %v1165_v17, %v911_v41  ;;  %v1245_v31 = vadd.f32 %v2116_v24, %v1189_v16  ;;  %v915_v26 = vpop.f32.mrb[20].mxu0  ;;  %v1199_v37 = vadd.f32 %v1167_v32, %v964_v10  ;;  %v1247_v38 = vadd.f32 %v2116_v24, %v1191_v20  ;;  %v968_v34 = vpop.f32.mrb[20].mxu1 }
 0x141   : > { %v1252_v39 = vadd.f32 %v2143_v18, %v1196_v47  ;;  %v1099_v33 = vsub.f32 %v2052_v49, %v915_v26  ;;  %v917_v43 = vpop.f32.mrb[21].mxu0  ;;  %v1254_v41 = vadd.f32 %v2143_v18, %v1198_v25  ;;  %v1101_v0 = vsub.f32 %v2054_v50, %v968_v34  ;;  %v970_v2 = vpop.f32.mrb[21].mxu1 }
 0x142   : > { %v1649_v44 = vpack.c.bf16 %v1245_v31, %v1244_v21  ;;  %v1253_v40 = vadd.f32 %v2143_v18, %v1197_v30  ;;  %v919_v13 = vpop.f32.mrb[22].mxu0  ;;  %v1650_v14 = vpack.c.bf16 %v1247_v38, %v1246_v48  ;;  %v1255_v10 = vadd.f32 %v2143_v18, %v1199_v37  ;;  %v972_v15 = vpop.f32.mrb[22].mxu1 }
 0x143   : > { %v1172_v45 = vmul.f32 %v2110_v19, %v1099_v33  ;;  %v1100_v46 = vsub.f32 %v2056_v51, %v917_v43  ;;  %v921_v49 = vpop.f32.mrb[23].mxu0  ;;  %v1174_v50 = vmul.f32 %v2112_v22, %v1101_v0  ;;  %v1102_v12 = vsub.f32 %v2058_v52, %v970_v2  ;;  %v974_v20 = vpop.f32.mrb[23].mxu1 }
 0x144   : > { %1372 = vst [vmem:[%s2161_s30] sm:$0xff] %v1649_v44  ;;  %v1653_v16 = vpack.c.bf16 %v1253_v40, %v1252_v39  ;;  %v1107_v17 = vsub.f32 %v2060_v53, %v919_v13  ;;  %1373 = vst [vmem:[%s2161_s30 + $0x8] sm:$0xff] %v1650_v14  ;;  %v1654_v47 = vpack.c.bf16 %v1255_v10, %v1254_v41  ;;  %v2178_v38 = vpop.permute.xlu1 %1241 }
 0x145   : > { %v1204_v51 = vadd.f32 %v1172_v45, %v915_v26  ;;  %v1173_v32 = vmul.f32 %v2114_v23, %v1100_v46  ;;  %v1109_v21 = vsub.f32 %v2062_v54, %v972_v15  ;;  %v1206_v25 = vadd.f32 %v1174_v50, %v968_v34 }
 0x146   : > { %1376 = vst [vmem:[%s2161_s30 + $0x20] sm:$0xff] %v1653_v16  ;;  %v1175_v30 = vmul.f32 %v2119_v28, %v1102_v12  ;;  %v1180_v31 = vmul.f32 %v2110_v19, %v1107_v17  ;;  %v1108_v48 = vsub.f32 %v2064_v55, %v921_v49  ;;  %1377 = vst [vmem:[%s2161_s30 + $0x28] sm:$0xff] %v1654_v47 }
 0x147   : > { %v1205_v52 = vadd.f32 %v1173_v32, %v917_v43  ;;  %v1182_v53 = vmul.f32 %v2112_v22, %v1109_v21  ;;  %v1110_v37 = vsub.f32 %v2070_v56, %v974_v20  ;;  %v1260_v26 = vadd.f32 %v2149_v27, %v1204_v51 }
 0x148   : > { %v1207_v39 = vadd.f32 %v1175_v30, %v970_v2  ;;  %v1212_v54 = vadd.f32 %v1180_v31, %v919_v13  ;;  %v1181_v33 = vmul.f32 %v2114_v23, %v1108_v48  ;;  %v1262_v34 = vadd.f32 %v2149_v27, %v1206_v25  ;;  %v1011_v44 = vpop.f32.mrb[24].mxu0  ;;  %v1064_v40 = vpop.f32.mrb[24].mxu1 }
 0x149   : > { %v1214_v19 = vadd.f32 %v1182_v53, %v972_v15  ;;  %v1183_v55 = vmul.f32 %v2119_v28, %v1110_v37  ;;  %v1261_v43 = vadd.f32 %v2149_v27, %v1205_v52  ;;  %v1087_v22 = vsub.f32 %v2074_v57, %v1011_v44  ;;  %v1013_v56 = vpop.f32.mrb[25].mxu0  ;;  %v1066_v13 = vpop.f32.mrb[25].mxu1 }
 0x14a   : > { %v1213_v41 = vadd.f32 %v1181_v33, %v921_v49  ;;  %v1263_v0 = vadd.f32 %v2149_v27, %v1207_v39  ;;  %v1268_v2 = vadd.f32 %v2178_v38, %v1212_v54  ;;  %v1089_v23 = vsub.f32 %v2076_v58, %v1064_v40  ;;  %v1015_v14 = vpop.f32.mrb[26].mxu0  ;;  %v1068_v57 = vpop.f32.mrb[26].mxu1 }
 0x14b   : > { %v1215_v10 = vadd.f32 %v1183_v55, %v974_v20  ;;  %v1657_v45 = vpack.c.bf16 %v1261_v43, %v1260_v26  ;;  %v1270_v28 = vadd.f32 %v2178_v38, %v1214_v19  ;;  %v1160_v46 = vmul.f32 %v2121_v29, %v1087_v22  ;;  %v1017_v15 = vpop.f32.mrb[27].mxu0  ;;  %v1070_v58 = vpop.f32.mrb[27].mxu1 }
 0x14c   : > { %v1658_v16 = vpack.c.bf16 %v1263_v0, %v1262_v34  ;;  %v1269_v49 = vadd.f32 %v2178_v38, %v1213_v41  ;;  %v1162_v50 = vmul.f32 %v2125_v35, %v1089_v23  ;;  %v1088_v12 = vsub.f32 %v2078_v59, %v1013_v56 }
 0x14d   : > { %1380 = vst [vmem:[%s2161_s30 + $0x40] sm:$0xff] %v1657_v45  ;;  %v1271_v17 = vadd.f32 %v2178_v38, %v1215_v10  ;;  %v1192_v20 = vadd.f32 %v1160_v46, %v1011_v44  ;;  %v1090_v47 = vsub.f32 %v2080_v60, %v1066_v13  ;;  %v1095_v51 = vsub.f32 %v2082_v61, %v1015_v14 }
 0x14e   : > { %1381 = vst [vmem:[%s2161_s30 + $0x48] sm:$0xff] %v1658_v16  ;;  %v1661_v32 = vpack.c.bf16 %v1269_v49, %v1268_v2  ;;  %v1194_v21 = vadd.f32 %v1162_v50, %v1064_v40  ;;  %v1161_v25 = vmul.f32 %v2127_v36, %v1088_v12  ;;  %v1097_v30 = vsub.f32 %v2085_v62, %v1068_v57 }
 0x14f   : > { %v1662_v31 = vpack.c.bf16 %v1271_v17, %v1270_v28  ;;  %v1248_v59 = vadd.f32 %v2116_v24, %v1192_v20  ;;  %v1163_v48 = vmul.f32 %v2132_v42, %v1090_v47  ;;  %v1168_v52 = vmul.f32 %v2121_v29, %v1095_v51 }
 0x150   : > { %1384 = vst [vmem:[%s2161_s30 + $0x60] sm:$0xff] %v1661_v32  ;;  %v1250_v60 = vadd.f32 %v2116_v24, %v1194_v21  ;;  %v1193_v53 = vadd.f32 %v1161_v25, %v1013_v56  ;;  %v1170_v61 = vmul.f32 %v2125_v35, %v1097_v30  ;;  %v1096_v37 = vsub.f32 %v2087_v63, %v1017_v15  ;;  %v1021_v26 = vpop.f32.mrb[28].mxu0  ;;  %v1074_v34 = vpop.f32.mrb[28].mxu1 }
 0x151   : > { %1385 = vst [vmem:[%s2161_s30 + $0x68] sm:$0xff] %v1662_v31  ;;  %v1195_v39 = vadd.f32 %v1163_v48, %v1066_v13  ;;  %v1200_v54 = vadd.f32 %v1168_v52, %v1015_v14  ;;  %v1098_v62 = vsub.f32 %v2089_v1, %v1070_v58  ;;  %v1103_v33 = vsub.f32 %v2091_v3, %v1021_v26  ;;  %v1023_v44 = vpop.f32.mrb[29].mxu0  ;;  %v1076_v40 = vpop.f32.mrb[29].mxu1 }
 0x152   : > { %v1249_v19 = vadd.f32 %v2116_v24, %v1193_v53  ;;  %v1202_v55 = vadd.f32 %v1170_v61, %v1068_v57  ;;  %v1169_v43 = vmul.f32 %v2127_v36, %v1096_v37  ;;  %v1105_v22 = vsub.f32 %v2093_v4, %v1074_v34  ;;  %v1025_v56 = vpop.f32.mrb[30].mxu0  ;;  %v1078_v0 = vpop.f32.mrb[30].mxu1 }
 0x153   : > { %v1251_v63 = vadd.f32 %v2116_v24, %v1195_v39  ;;  %v1256_v41 = vadd.f32 %v2143_v18, %v1200_v54  ;;  %v1171_v1 = vmul.f32 %v2132_v42, %v1098_v62  ;;  %v1176_v3 = vmul.f32 %v2121_v29, %v1103_v33  ;;  %v1027_v2 = vpop.f32.mrb[31].mxu0  ;;  %v1080_v10 = vpop.f32.mrb[31].mxu1  ;;  %v1420_v54 = vld [vmem:[%s2161_s30 + $0x20] sm:$0xff] (%p1872_p6)  ;;  %v1422_v62 = vld [vmem:[%s2161_s30 + $0x28] sm:$0xff] (%p1872_p6) }
 0x154   : > { %v1651_v23 = vpack.c.bf16 %v1249_v19, %v1248_v59  ;;  %v1258_v13 = vadd.f32 %v2143_v18, %v1202_v55  ;;  %v1201_v14 = vadd.f32 %v1169_v43, %v1017_v15  ;;  %v1178_v4 = vmul.f32 %v2125_v35, %v1105_v22  ;;  %1421 = vst [vmem:[%s1399_s14 + $0x80] sm:$0xff] (%p1872_p6), %v1420_v54 }
 0x155   : > { %v1652_v45 = vpack.c.bf16 %v1251_v63, %v1250_v60  ;;  %v1203_v28 = vadd.f32 %v1171_v1, %v1070_v58  ;;  %v1208_v46 = vadd.f32 %v1176_v3, %v1021_v26  ;;  %v1104_v24 = vsub.f32 %v2095_v5, %v1023_v44  ;;  %v1430_v19 = vld [vmem:[%s2161_s30 + $0x48] sm:$0xff] (%p1872_p6)  ;;  %1423 = vst [vmem:[%s1399_s14 + $0x88] sm:$0xff] (%p1872_p6), %v1422_v62 }
 0x156   : > { %1374 = vst [vmem:[%s2161_s30 + $0x10] sm:$0xff] %v1651_v23  ;;  %v1257_v57 = vadd.f32 %v2143_v18, %v1201_v14  ;;  %v1210_v16 = vadd.f32 %v1178_v4, %v1074_v34  ;;  %v1106_v49 = vsub.f32 %v2100_v6, %v1076_v40  ;;  %v1111_v50 = vsub.f32 %v2102_v7, %v1025_v56 }
 0x157   : > { %1375 = vst [vmem:[%s2161_s30 + $0x18] sm:$0xff] %v1652_v45  ;;  %v1259_v15 = vadd.f32 %v2143_v18, %v1203_v28  ;;  %v1177_v12 = vmul.f32 %v2127_v36, %v1104_v24  ;;  %v1113_v58 = vsub.f32 %v2104_v8, %v1078_v0  ;;  %v1264_v5 = vadd.f32 %v2149_v27, %v1208_v46  ;;  %v1436_v22 = vld [vmem:[%s2161_s30 + $0x60] sm:$0xff] (%p1872_p6) }
 0x158   : > { %v1655_v17 = vpack.c.bf16 %v1257_v57, %v1256_v41  ;;  %v1179_v20 = vmul.f32 %v2132_v42, %v1106_v49  ;;  %v1184_v47 = vmul.f32 %v2121_v29, %v1111_v50  ;;  %v1112_v7 = vsub.f32 %v2106_v9, %v1027_v2  ;;  %1431 = vst [vmem:[%s1399_s14 + $0x108] sm:$0xff] (%p1872_p6), %v1430_v19 }
 0x159   : > { %v1656_v51 = vpack.c.bf16 %v1259_v15, %v1258_v13  ;;  %v1209_v32 = vadd.f32 %v1177_v12, %v1023_v44  ;;  %v1186_v6 = vmul.f32 %v2125_v35, %v1113_v58  ;;  %v1266_v18 = vadd.f32 %v2149_v27, %v1210_v16  ;;  %v1428_v44 = vld [vmem:[%s2161_s30 + $0x40] sm:$0xff] (%p1872_p6)  ;;  %1437 = vst [vmem:[%s1399_s14 + $0x180] sm:$0xff] (%p1872_p6), %v1436_v22 }
 0x15a   : > { %1378 = vst [vmem:[%s2161_s30 + $0x30] sm:$0xff] %v1655_v17  ;;  %v1211_v21 = vadd.f32 %v1179_v20, %v1076_v40  ;;  %v1216_v25 = vadd.f32 %v1184_v47, %v1025_v56  ;;  %v1114_v8 = vsub.f32 %v2108_v11, %v1080_v10  ;;  %v1185_v29 = vmul.f32 %v2127_v36, %v1112_v7  ;;  %v1438_v40 = vld [vmem:[%s2161_s30 + $0x68] sm:$0xff] (%p1872_p6) }
 0x15b   : > { %1379 = vst [vmem:[%s2161_s30 + $0x38] sm:$0xff] %v1656_v51  ;;  %v1265_v30 = vadd.f32 %v2149_v27, %v1209_v32  ;;  %v1218_v31 = vadd.f32 %v1186_v6, %v1078_v0  ;;  %1429 = vst [vmem:[%s1399_s14 + $0x100] sm:$0xff] (%p1872_p6), %v1428_v44 }
 0x15c   : > { %v1267_v35 = vadd.f32 %v2149_v27, %v1211_v21  ;;  %v1187_v9 = vmul.f32 %v2132_v42, %v1114_v8  ;;  %v1272_v48 = vadd.f32 %v2178_v38, %v1216_v25  ;;  %v1217_v52 = vadd.f32 %v1185_v29, %v1027_v2  ;;  %v1412_v42 = vld [vmem:[%s2161_s30] sm:$0xff] (%p1872_p6)  ;;  %v1414_v27 = vld [vmem:[%s2161_s30 + $0x8] sm:$0xff] (%p1872_p6)  ;;  %1439 = vst [vmem:[%s1399_s14 + $0x188] sm:$0xff] (%p1872_p6), %v1438_v40 }
 0x15d   : > { %v1659_v59 = vpack.c.bf16 %v1265_v30, %v1264_v5  ;;  %v1274_v53 = vadd.f32 %v2178_v38, %v1218_v31  ;;  %1413 = vst [vmem:[%s1399_s14] sm:$0xff] (%p1872_p6), %v1412_v42  ;;  %1415 = vst [vmem:[%s1399_s14 + $0x8] sm:$0xff] (%p1872_p6), %v1414_v27 }
 0x15e   : > { %v1660_v60 = vpack.c.bf16 %v1267_v35, %v1266_v18  ;;  %v1219_v11 = vadd.f32 %v1187_v9, %v1080_v10  ;;  %v1273_v61 = vadd.f32 %v2178_v38, %v1217_v52  ;;  %1394 = sbr.rel (!%p1872_p6) target bundleno = 365 (0x16d), region = 94  ;;  %v1418_v39 = vld [vmem:[%s2161_s30 + $0x18] sm:$0xff] (%p1872_p6) }
 0x15f   : > { %1382 = vst [vmem:[%s2161_s30 + $0x50] sm:$0xff] %v1659_v59  ;;  %1419 = vst [vmem:[%s1399_s14 + $0x18] sm:$0xff] (%p1872_p6), %v1418_v39 }
 0x160   : > { %1383 = vst [vmem:[%s2161_s30 + $0x58] sm:$0xff] %v1660_v60  ;;  %v1275_v37 = vadd.f32 %v2178_v38, %v1219_v11  ;;  %v1663_v36 = vpack.c.bf16 %v1273_v61, %v1272_v48  ;;  %v1416_v38 = vld [vmem:[%s2161_s30 + $0x10] sm:$0xff] (%p1872_p6) }
 0x161   : > { %v1424_v33 = vld [vmem:[%s2161_s30 + $0x30] sm:$0xff] (%p1872_p6)  ;;  %1417 = vst [vmem:[%s1399_s14 + $0x10] sm:$0xff] (%p1872_p6), %v1416_v38 }
 0x162   : > { %v1664_v26 = vpack.c.bf16 %v1275_v37, %v1274_v53  ;;  %1386 = vst [vmem:[%s2161_s30 + $0x70] sm:$0xff] %v1663_v36  ;;  %v1426_v34 = vld [vmem:[%s2161_s30 + $0x38] sm:$0xff] (%p1872_p6)  ;;  %1425 = vst [vmem:[%s1399_s14 + $0x90] sm:$0xff] (%p1872_p6), %v1424_v33 }
 0x163   : > { %1427 = vst [vmem:[%s1399_s14 + $0x98] sm:$0xff] (%p1872_p6), %v1426_v34 }
 0x164   : > { %1387 = vst [vmem:[%s2161_s30 + $0x78] sm:$0xff] %v1664_v26 }
 0x166   : > { %v1432_v55 = vld [vmem:[%s2161_s30 + $0x50] sm:$0xff] }
 0x167   : > { %v1434_v43 = vld [vmem:[%s2161_s30 + $0x58] sm:$0xff]  ;;  %1433 = vst [vmem:[%s1399_s14 + $0x110] sm:$0xff] %v1432_v55 }
 0x168   : > { %1435 = vst [vmem:[%s1399_s14 + $0x118] sm:$0xff] %v1434_v43 }
 0x169   : > { %v1440_v56 = vld [vmem:[%s2161_s30 + $0x70] sm:$0xff] }
 0x16a   : > { %1441 = vst [vmem:[%s1399_s14 + $0x190] sm:$0xff] %v1440_v56 }
 0x16b   : > { %v1442_v63 = vld [vmem:[%s2161_s30 + $0x78] sm:$0xff] }
 0x16c   : > { %1443 = vst [vmem:[%s1399_s14 + $0x198] sm:$0xff] %v1442_v63 }
 0x16d PF: > { %s16_s27 = sadd.s32 1, %s1782_s27   ;;  %s2302_s21 = smov %s1762_s22 }
 0x16e   : > { %p13_p0 = scmp.ge.s32.totalorder %s16_s27, 10   ;;  %s2303_s22 = smov %s1880_s13 }
 0x16f   : > { %s2304_s23 = smov %s1774_s25  ;;  %s2305_s24 = smov %s1778_s26 }
 0x170   : > { %s2306_s25 = smov %s2309_s28  ;;  %s2307_s26 = smov %s2313_s29 }
 0x171   :  { %15 = sbr.rel (!%p13_p0) target bundleno = 4 (0x4), region = 159 }

// kernel: post_process_forward.2
= control target key start
LH: loop header
LB: loop body
LE: loop exit
PB: predicated region body
PF: predicated region fallthrough
CT: control target
= control target key end

     0   :  { %vm4320_vm0 = vcmask 1043456   ;;  %s11822_s3 = inlined_call_operand.vmem [shape: bf16[512,1024], index: 3, kind: input, shape index: {}]   ;;  %s11823_s1 = inlined_call_operand.vmem [shape: bf16[36,512], index: 1, kind: input, shape index: {}]   ;;  %s11824_s0 = inlined_call_operand.vmem [shape: bf16[36,512], index: 0, kind: input, shape index: {}]   ;;  %s11825_s2 = inlined_call_operand.vmem [shape: bf16[512,1024], index: 2, kind: input, shape index: {}]   ;;  %s11826_s4 = inlined_call_operand.vmem [shape: f32[3,1024], index: 4, kind: input, shape index: {}]   ;;  %s11827_s5 = inlined_call_operand.vmem [shape: bf16[1024,512], index: 5, kind: input, shape index: {}]   ;;  %s11828_s6 = inlined_call_operand.vmem [shape: f32[36,512], index: 6, kind: input, shape index: {}]   ;;  %s11829_s7 = inlined_call_operand.vmem [shape: f32[36,512], index: 7, kind: output, shape index: {}]  }
   0x1   :  { %v302_v0 = vld [vmem:[%s11822_s3] sm:$0xff]  ;;  %v303_v2 = vld [vmem:[%s11822_s3 + $0x8] sm:$0xff] }
   0x2   :  { %v306_v1 = vld [vmem:[%s11822_s3 + $0x20] sm:$0xff]  ;;  %v307_v4 = vld [vmem:[%s11822_s3 + $0x28] sm:$0xff] }
   0x3   :  { %v6923_v3 = vcombine.high %v302_v0, %v306_v1  ;;  %v6922_v5 = vcombine.low %v302_v0, %v306_v1  ;;  %v310_v6 = vld [vmem:[%s11822_s3 + $0x40] sm:$0xff]  ;;  %v6925_v8 = vcombine.high %v303_v2, %v307_v4  ;;  %v6924_v9 = vcombine.low %v303_v2, %v307_v4  ;;  %v311_v11 = vld [vmem:[%s11822_s3 + $0x48] sm:$0xff] }
   0x4   :  { %v314_v7 = vld [vmem:[%s11822_s3 + $0x60] sm:$0xff]  ;;  %v315_v12 = vld [vmem:[%s11822_s3 + $0x68] sm:$0xff] }
   0x5   :  { %v6931_v10 = vcombine.high %v310_v6, %v314_v7  ;;  %v318_v13 = vld [vmem:[%s11822_s3 + $0x80] sm:$0xff]  ;;  %1892 = vmatprep.subr.bf16.mxu0 %v6923_v3  ;;  %v6933_v14 = vcombine.high %v311_v11, %v315_v12  ;;  %v319_v16 = vld [vmem:[%s11822_s3 + $0x88] sm:$0xff]  ;;  %2014 = vmatprep.subr.bf16.mxu1 %v6925_v8  ;;  %v6930_v18 = vcombine.low %v310_v6, %v314_v7 }
   0x6   :  { %v322_v15 = vld [vmem:[%s11822_s3 + $0xa0] sm:$0xff]  ;;  %v323_v17 = vld [vmem:[%s11822_s3 + $0xa8] sm:$0xff]  ;;  %1893 = vmatpush1.bf16.msra.mxu0 %v6922_v5  ;;  %2015 = vmatpush1.bf16.msra.mxu1 %v6924_v9  ;;  %v6932_v19 = vcombine.low %v311_v11, %v315_v12 }
   0x7   :  { %1894 = vmatprep.subr.bf16.mxu0 %v6931_v10  ;;  %v6939_v20 = vcombine.high %v318_v13, %v322_v15  ;;  %2016 = vmatprep.subr.bf16.mxu1 %v6933_v14  ;;  %v6941_v21 = vcombine.high %v319_v16, %v323_v17  ;;  %v326_v22 = vld [vmem:[%s11822_s3 + $0xc0] sm:$0xff]  ;;  %v327_v24 = vld [vmem:[%s11822_s3 + $0xc8] sm:$0xff]  ;;  %v6938_v26 = vcombine.low %v318_v13, %v322_v15 }
   0x8   :  { %v330_v23 = vld [vmem:[%s11822_s3 + $0xe0] sm:$0xff]  ;;  %v331_v25 = vld [vmem:[%s11822_s3 + $0xe8] sm:$0xff]  ;;  %v6940_v27 = vcombine.low %v319_v16, %v323_v17 }
   0x9   :  { %v6947_v28 = vcombine.high %v326_v22, %v330_v23  ;;  %v6949_v29 = vcombine.high %v327_v24, %v331_v25  ;;  %v334_v30 = vld [vmem:[%s11822_s3 + $0x100] sm:$0xff]  ;;  %v335_v32 = vld [vmem:[%s11822_s3 + $0x108] sm:$0xff]  ;;  %v6946_v34 = vcombine.low %v326_v22, %v330_v23  ;;  %v6948_v35 = vcombine.low %v327_v24, %v331_v25 }
   0xa   :  { %1895 = vmatpush1.bf16.msra.mxu0 %v6930_v18  ;;  %2017 = vmatpush1.bf16.msra.mxu1 %v6932_v19  ;;  %v338_v31 = vld [vmem:[%s11822_s3 + $0x120] sm:$0xff]  ;;  %v339_v33 = vld [vmem:[%s11822_s3 + $0x128] sm:$0xff] }
   0xb   :  { %1896 = vmatprep.subr.bf16.mxu0 %v6939_v20  ;;  %2018 = vmatprep.subr.bf16.mxu1 %v6941_v21  ;;  %v6955_v36 = vcombine.high %v334_v30, %v338_v31  ;;  %v6957_v37 = vcombine.high %v335_v32, %v339_v33  ;;  %v342_v38 = vld [vmem:[%s11822_s3 + $0x140] sm:$0xff]  ;;  %v343_v40 = vld [vmem:[%s11822_s3 + $0x148] sm:$0xff]  ;;  %v6954_v42 = vcombine.low %v334_v30, %v338_v31 }
   0xc   :  { %v346_v39 = vld [vmem:[%s11822_s3 + $0x160] sm:$0xff]  ;;  %v347_v41 = vld [vmem:[%s11822_s3 + $0x168] sm:$0xff]  ;;  %v6956_v43 = vcombine.low %v335_v32, %v339_v33 }
   0xd   :  { %v6963_v44 = vcombine.high %v342_v38, %v346_v39  ;;  %v6965_v45 = vcombine.high %v343_v40, %v347_v41  ;;  %v350_v46 = vld [vmem:[%s11822_s3 + $0x180] sm:$0xff]  ;;  %v351_v48 = vld [vmem:[%s11822_s3 + $0x188] sm:$0xff]  ;;  %v6962_v50 = vcombine.low %v342_v38, %v346_v39  ;;  %v6964_v51 = vcombine.low %v343_v40, %v347_v41 }
   0xe   :  { %1897 = vmatpush1.bf16.msra.mxu0 %v6938_v26  ;;  %2019 = vmatpush1.bf16.msra.mxu1 %v6940_v27  ;;  %v354_v47 = vld [vmem:[%s11822_s3 + $0x1a0] sm:$0xff]  ;;  %v355_v49 = vld [vmem:[%s11822_s3 + $0x1a8] sm:$0xff] }
   0xf   :  { %1898 = vmatprep.subr.bf16.mxu0 %v6947_v28  ;;  %2020 = vmatprep.subr.bf16.mxu1 %v6949_v29  ;;  %v6971_v52 = vcombine.high %v350_v46, %v354_v47  ;;  %v6973_v53 = vcombine.high %v351_v48, %v355_v49  ;;  %v358_v54 = vld [vmem:[%s11822_s3 + $0x1c0] sm:$0xff]  ;;  %v359_v57 = vld [vmem:[%s11822_s3 + $0x1c8] sm:$0xff]  ;;  %v6970_v59 = vcombine.low %v350_v46, %v354_v47 }
  0x10   :  { %v362_v55 = vld [vmem:[%s11822_s3 + $0x1e0] sm:$0xff]  ;;  %v363_v58 = vld [vmem:[%s11822_s3 + $0x1e8] sm:$0xff]  ;;  %v6972_v60 = vcombine.low %v351_v48, %v355_v49 }
  0x11   :  { %v8451_v56 = vld [vmem:[%s11823_s1 + $0x4] ss:$16 sps:$4 sm:$0xff]   ;;  %v6979_v61 = vcombine.high %v358_v54, %v362_v55  ;;  %v6981_v62 = vcombine.high %v359_v57, %v363_v58  ;;  %v367_v1 = vld [vmem:[%s11822_s3 + $0x208] sm:$0xff]  ;;  %v6978_v3 = vcombine.low %v358_v54, %v362_v55  ;;  %v6980_v4 = vcombine.low %v359_v57, %v363_v58 }
  0x12   :  { %1899 = vmatpush1.bf16.msra.mxu0 %v6946_v34  ;;  %2021 = vmatpush1.bf16.msra.mxu1 %v6948_v35  ;;  %v366_v63 = vld [vmem:[%s11822_s3 + $0x200] sm:$0xff]  ;;  %v371_v2 = vld [vmem:[%s11822_s3 + $0x228] sm:$0xff] }
  0x13   :  { %1900 = vmatprep.subr.bf16.mxu0 %v6955_v36  ;;  %2022 = vmatprep.subr.bf16.mxu1 %v6957_v37  ;;  %v370_v0 = vld [vmem:[%s11822_s3 + $0x220] sm:$0xff]  ;;  %v6989_v6 = vcombine.high %v367_v1, %v371_v2  ;;  %v375_v9 = vld [vmem:[%s11822_s3 + $0x248] sm:$0xff]  ;;  %v6988_v12 = vcombine.low %v367_v1, %v371_v2 }
  0x14   :  { %1924 = vmatprep.mubr.bf16.mxu0 %v8451_v56  ;;  %2046 = vmatprep.mubr.bf16.mxu1 %v8451_v56  ;;  %v6987_v5 = vcombine.high %v366_v63, %v370_v0  ;;  %v374_v7 = vld [vmem:[%s11822_s3 + $0x240] sm:$0xff]  ;;  %v379_v10 = vld [vmem:[%s11822_s3 + $0x268] sm:$0xff]  ;;  %v6986_v11 = vcombine.low %v366_v63, %v370_v0 }
  0x15   :  { %v378_v8 = vld [vmem:[%s11822_s3 + $0x260] sm:$0xff]  ;;  %v6997_v14 = vcombine.high %v375_v9, %v379_v10  ;;  %v383_v17 = vld [vmem:[%s11822_s3 + $0x288] sm:$0xff]  ;;  %v6996_v20 = vcombine.low %v375_v9, %v379_v10 }
  0x16   :  { %1901 = vmatpush1.bf16.msra.mxu0 %v6954_v42  ;;  %2023 = vmatpush1.bf16.msra.mxu1 %v6956_v43  ;;  %v6995_v13 = vcombine.high %v374_v7, %v378_v8  ;;  %v382_v15 = vld [vmem:[%s11822_s3 + $0x280] sm:$0xff]  ;;  %v387_v18 = vld [vmem:[%s11822_s3 + $0x2a8] sm:$0xff]  ;;  %v6994_v19 = vcombine.low %v374_v7, %v378_v8 }
  0x17   :  { %1902 = vmatprep.subr.bf16.mxu0 %v6963_v44  ;;  %2024 = vmatprep.subr.bf16.mxu1 %v6965_v45  ;;  %v386_v16 = vld [vmem:[%s11822_s3 + $0x2a0] sm:$0xff]  ;;  %v7005_v22 = vcombine.high %v383_v17, %v387_v18  ;;  %v391_v25 = vld [vmem:[%s11822_s3 + $0x2c8] sm:$0xff]  ;;  %v7004_v28 = vcombine.low %v383_v17, %v387_v18 }
  0x18   :  { %v7003_v21 = vcombine.high %v382_v15, %v386_v16  ;;  %v390_v23 = vld [vmem:[%s11822_s3 + $0x2c0] sm:$0xff]  ;;  %v395_v26 = vld [vmem:[%s11822_s3 + $0x2e8] sm:$0xff]  ;;  %v7002_v27 = vcombine.low %v382_v15, %v386_v16 }
  0x19   :  { %v394_v24 = vld [vmem:[%s11822_s3 + $0x2e0] sm:$0xff]  ;;  %v7013_v30 = vcombine.high %v391_v25, %v395_v26  ;;  %v399_v33 = vld [vmem:[%s11822_s3 + $0x308] sm:$0xff]  ;;  %v7012_v36 = vcombine.low %v391_v25, %v395_v26 }
  0x1a   :  { %1903 = vmatpush1.bf16.msra.mxu0 %v6962_v50  ;;  %2025 = vmatpush1.bf16.msra.mxu1 %v6964_v51  ;;  %v7011_v29 = vcombine.high %v390_v23, %v394_v24  ;;  %v398_v31 = vld [vmem:[%s11822_s3 + $0x300] sm:$0xff]  ;;  %v403_v34 = vld [vmem:[%s11822_s3 + $0x328] sm:$0xff]  ;;  %v7010_v35 = vcombine.low %v390_v23, %v394_v24 }
  0x1b   :  { %1904 = vmatprep.subr.bf16.mxu0 %v6971_v52  ;;  %2026 = vmatprep.subr.bf16.mxu1 %v6973_v53  ;;  %v402_v32 = vld [vmem:[%s11822_s3 + $0x320] sm:$0xff]  ;;  %v7021_v38 = vcombine.high %v399_v33, %v403_v34  ;;  %v407_v41 = vld [vmem:[%s11822_s3 + $0x348] sm:$0xff]  ;;  %v7020_v44 = vcombine.low %v399_v33, %v403_v34 }
  0x1c   :  { %v7019_v37 = vcombine.high %v398_v31, %v402_v32  ;;  %v406_v39 = vld [vmem:[%s11822_s3 + $0x340] sm:$0xff]  ;;  %v411_v42 = vld [vmem:[%s11822_s3 + $0x368] sm:$0xff]  ;;  %v7018_v43 = vcombine.low %v398_v31, %v402_v32 }
  0x1d   :  { %v410_v40 = vld [vmem:[%s11822_s3 + $0x360] sm:$0xff]  ;;  %v7029_v46 = vcombine.high %v407_v41, %v411_v42  ;;  %v415_v49 = vld [vmem:[%s11822_s3 + $0x388] sm:$0xff]  ;;  %v7028_v52 = vcombine.low %v407_v41, %v411_v42 }
  0x1e   :  { %1905 = vmatpush1.bf16.msra.mxu0 %v6970_v59  ;;  %2027 = vmatpush1.bf16.msra.mxu1 %v6972_v60  ;;  %v7027_v45 = vcombine.high %v406_v39, %v410_v40  ;;  %v414_v47 = vld [vmem:[%s11822_s3 + $0x380] sm:$0xff]  ;;  %v419_v50 = vld [vmem:[%s11822_s3 + $0x3a8] sm:$0xff]  ;;  %v7026_v51 = vcombine.low %v406_v39, %v410_v40 }
  0x1f   :  { %1906 = vmatprep.subr.bf16.mxu0 %v6979_v61  ;;  %2028 = vmatprep.subr.bf16.mxu1 %v6981_v62  ;;  %v418_v48 = vld [vmem:[%s11822_s3 + $0x3a0] sm:$0xff]  ;;  %v7037_v54 = vcombine.high %v415_v49, %v419_v50  ;;  %v423_v58 = vld [vmem:[%s11822_s3 + $0x3c8] sm:$0xff]  ;;  %v7036_v61 = vcombine.low %v415_v49, %v419_v50 }
  0x20   :  { %v7035_v53 = vcombine.high %v414_v47, %v418_v48  ;;  %v422_v55 = vld [vmem:[%s11822_s3 + $0x3c0] sm:$0xff]  ;;  %v427_v59 = vld [vmem:[%s11822_s3 + $0x3e8] sm:$0xff]  ;;  %v7034_v60 = vcombine.low %v414_v47, %v418_v48 }
  0x21   :  { %v426_v57 = vld [vmem:[%s11822_s3 + $0x3e0] sm:$0xff]  ;;  %v7045_v63 = vcombine.high %v423_v58, %v427_v59  ;;  %v431_v2 = vld [vmem:[%s11822_s3 + $0x408] sm:$0xff] }
  0x22   :  { %1907 = vmatpush1.bf16.msra.mxu0 %v6978_v3  ;;  %2029 = vmatpush1.bf16.msra.mxu1 %v6980_v4  ;;  %v7043_v62 = vcombine.high %v422_v55, %v426_v57  ;;  %v430_v0 = vld [vmem:[%s11822_s3 + $0x400] sm:$0xff]  ;;  %v435_v3 = vld [vmem:[%s11822_s3 + $0x428] sm:$0xff]  ;;  %v7042_v4 = vcombine.low %v422_v55, %v426_v57 }
  0x23   :  { %1908 = vmatprep.subr.bf16.mxu0 %v6987_v5  ;;  %2030 = vmatprep.subr.bf16.mxu1 %v6989_v6  ;;  %v434_v1 = vld [vmem:[%s11822_s3 + $0x420] sm:$0xff]  ;;  %v7044_v5 = vcombine.low %v423_v58, %v427_v59  ;;  %v7053_v7 = vcombine.high %v431_v2, %v435_v3  ;;  %v463_v39 = vld [vmem:[%s11822_s3 + $0x508] sm:$0xff] }
  0x24   :  { %v7051_v6 = vcombine.high %v430_v0, %v434_v1  ;;  %v438_v8 = vld [vmem:[%s11822_s3 + $0x440] sm:$0xff]  ;;  %v467_v40 = vld [vmem:[%s11822_s3 + $0x528] sm:$0xff] }
  0x25   :  { %v442_v9 = vld [vmem:[%s11822_s3 + $0x460] sm:$0xff]  ;;  %v471_v47 = vld [vmem:[%s11822_s3 + $0x548] sm:$0xff] }
  0x26   :  { %1909 = vmatpush1.bf16.msra.mxu0 %v6986_v11  ;;  %2031 = vmatpush1.bf16.msra.mxu1 %v6988_v12  ;;  %v8578_v10 = vld [vmem:[%s11823_s1] ss:$16 sps:$4 sm:$0xff]   ;;  %v439_v11 = vld [vmem:[%s11822_s3 + $0x448] sm:$0xff]  ;;  %v7059_v15 = vcombine.high %v438_v8, %v442_v9 }
  0x27   :  { %1910 = vmatprep.subr.bf16.mxu0 %v6995_v13  ;;  %2032 = vmatprep.subr.bf16.mxu1 %v6997_v14  ;;  %v443_v12 = vld [vmem:[%s11822_s3 + $0x468] sm:$0xff]  ;;  %v7050_v13 = vcombine.low %v430_v0, %v434_v1  ;;  %v7052_v14 = vcombine.low %v431_v2, %v435_v3  ;;  %v446_v17 = vld [vmem:[%s11822_s3 + $0x480] sm:$0xff] }
  0x28   :  { %v7061_v16 = vcombine.high %v439_v11, %v443_v12  ;;  %v450_v18 = vld [vmem:[%s11822_s3 + $0x4a0] sm:$0xff]  ;;  %v7060_v23 = vcombine.low %v439_v11, %v443_v12  ;;  %v475_v48 = vld [vmem:[%s11822_s3 + $0x568] sm:$0xff] }
  0x29   :  { %v7067_v24 = vcombine.high %v446_v17, %v450_v18  ;;  %v454_v26 = vld [vmem:[%s11822_s3 + $0x4c0] sm:$0xff]  ;;  %v7066_v32 = vcombine.low %v446_v17, %v450_v18  ;;  %v8668_v57 = vld [vmem:[%s11823_s1 + $0xc] ss:$16 sps:$4 sm:$0xff]  }
  0x2a   :  { %1911 = vmatpush1.bf16.msra.mxu0 %v6994_v19  ;;  %2033 = vmatpush1.bf16.msra.mxu1 %v6996_v20  ;;  %v8595_v19 = vld [vmem:[%s11823_s1 + $0x24] ss:$16 sps:$4 sm:$0xff]   ;;  %v447_v20 = vld [vmem:[%s11822_s3 + $0x488] sm:$0xff] }
  0x2b   :  { %1912 = vmatprep.subr.bf16.mxu0 %v7003_v21  ;;  %2034 = vmatprep.subr.bf16.mxu1 %v7005_v22  ;;  %v451_v21 = vld [vmem:[%s11822_s3 + $0x4a8] sm:$0xff]  ;;  %v7058_v22 = vcombine.low %v438_v8, %v442_v9  ;;  %v44_v31 = vld [vmem:[%s11823_s1 + $0x40] sm:$0x33] }
  0x2c   :  { %v7069_v25 = vcombine.high %v447_v20, %v451_v21  ;;  %v7068_v33 = vcombine.low %v447_v20, %v451_v21  ;;  %v8656_v49 = vcombine.low %v44_v31, %v44_v31  ;;  %v482_v55 = vld [vmem:[%s11822_s3 + $0x5a0] sm:$0xff]  ;;  %v479_v58 = vld [vmem:[%s11822_s3 + $0x588] sm:$0xff] }
  0x2d   :  { %v483_v59 = vld [vmem:[%s11822_s3 + $0x5a8] sm:$0xff]  ;;  %v486_v0 = vld [vmem:[%s11822_s3 + $0x5c0] sm:$0xff] }
  0x2e   :  { %1913 = vmatpush1.bf16.msra.mxu0 %v7002_v27  ;;  %2035 = vmatpush1.bf16.msra.mxu1 %v7004_v28  ;;  %v458_v27 = vld [vmem:[%s11822_s3 + $0x4e0] sm:$0xff]  ;;  %v455_v28 = vld [vmem:[%s11822_s3 + $0x4c8] sm:$0xff] }
  0x2f   :  { %1914 = vmatprep.subr.bf16.mxu0 %v7011_v29  ;;  %2036 = vmatprep.subr.bf16.mxu1 %v7013_v30  ;;  %v459_v29 = vld [vmem:[%s11822_s3 + $0x4e8] sm:$0xff]  ;;  %v8621_v30 = vld [vmem:[%s11823_s1 + $0x20] ss:$16 sps:$4 sm:$0xff]   ;;  %v7075_v34 = vcombine.high %v454_v26, %v458_v27  ;;  %v7074_v41 = vcombine.low %v454_v26, %v458_v27 }
  0x30   :  { %v7076_v42 = vcombine.low %v455_v28, %v459_v29  ;;  %v490_v1 = vld [vmem:[%s11822_s3 + $0x5e0] sm:$0xff]  ;;  %v487_v2 = vld [vmem:[%s11822_s3 + $0x5c8] sm:$0xff] }
  0x31   :  { %v491_v3 = vld [vmem:[%s11822_s3 + $0x5e8] sm:$0xff]  ;;  %v494_v8 = vld [vmem:[%s11822_s3 + $0x600] sm:$0xff] }
  0x32   :  { %1915 = vmatpush1.bf16.msra.mxu0 %v7010_v35  ;;  %2037 = vmatpush1.bf16.msra.mxu1 %v7012_v36  ;;  %v7077_v35 = vcombine.high %v455_v28, %v459_v29  ;;  %v462_v36 = vld [vmem:[%s11822_s3 + $0x500] sm:$0xff]  ;;  %v495_v11 = vld [vmem:[%s11822_s3 + $0x608] sm:$0xff] }
  0x33   :  { %1916 = vmatprep.subr.bf16.mxu0 %v7019_v37  ;;  %2038 = vmatprep.subr.bf16.mxu1 %v7021_v38  ;;  %v466_v37 = vld [vmem:[%s11822_s3 + $0x520] sm:$0xff]  ;;  %v8633_v38 = vcombine.high %v44_v31, %v44_v31  ;;  %v499_v12 = vld [vmem:[%s11822_s3 + $0x628] sm:$0xff] }
  0x34   :  { %v7082_v50 = vcombine.low %v462_v36, %v466_v37  ;;  %v498_v9 = vld [vmem:[%s11822_s3 + $0x620] sm:$0xff]  ;;  %v503_v20 = vld [vmem:[%s11822_s3 + $0x648] sm:$0xff] }
  0x35   :  { %v502_v17 = vld [vmem:[%s11822_s3 + $0x640] sm:$0xff]  ;;  %v507_v21 = vld [vmem:[%s11822_s3 + $0x668] sm:$0xff] }
  0x36   :  { %1917 = vmatpush1.bf16.msra.mxu0 %v7018_v43  ;;  %2039 = vmatpush1.bf16.msra.mxu1 %v7020_v44  ;;  %v7083_v43 = vcombine.high %v462_v36, %v466_v37  ;;  %v7085_v44 = vcombine.high %v463_v39, %v467_v40  ;;  %v506_v18 = vld [vmem:[%s11822_s3 + $0x660] sm:$0xff]  ;;  %v511_v28 = vld [vmem:[%s11822_s3 + $0x688] sm:$0xff] }
  0x37   :  { %1918 = vmatprep.subr.bf16.mxu0 %v7027_v45  ;;  %2040 = vmatprep.subr.bf16.mxu1 %v7029_v46  ;;  %v470_v45 = vld [vmem:[%s11822_s3 + $0x540] sm:$0xff]  ;;  %v515_v29 = vld [vmem:[%s11822_s3 + $0x6a8] sm:$0xff]  ;;  %v7122_v31 = vcombine.low %v502_v17, %v506_v18 }
  0x38   :  { %v474_v46 = vld [vmem:[%s11822_s3 + $0x560] sm:$0xff]  ;;  %v519_v37 = vld [vmem:[%s11822_s3 + $0x6c8] sm:$0xff] }
  0x39   :  { %v510_v26 = vld [vmem:[%s11822_s3 + $0x680] sm:$0xff] }
  0x3a   :  { %1919 = vmatpush1.bf16.msra.mxu0 %v7026_v51  ;;  %2041 = vmatpush1.bf16.msra.mxu1 %v7028_v52  ;;  %v7084_v51 = vcombine.low %v463_v39, %v467_v40  ;;  %v7091_v52 = vcombine.high %v470_v45, %v474_v46  ;;  %v514_v27 = vld [vmem:[%s11822_s3 + $0x6a0] sm:$0xff]  ;;  %v523_v39 = vld [vmem:[%s11822_s3 + $0x6e8] sm:$0xff] }
  0x3b   :  { %1920 = vmatprep.subr.bf16.mxu0 %v7035_v53  ;;  %2042 = vmatprep.subr.bf16.mxu1 %v7037_v54  ;;  %v7093_v53 = vcombine.high %v471_v47, %v475_v48  ;;  %v478_v54 = vld [vmem:[%s11822_s3 + $0x580] sm:$0xff]  ;;  %v7130_v40 = vcombine.low %v510_v26, %v514_v27 }
  0x3c   :  { %v522_v36 = vld [vmem:[%s11822_s3 + $0x6e0] sm:$0xff] }
  0x3e   :  { %1921 = vmatpush1.bf16.msra.mxu0 %v7034_v60  ;;  %2043 = vmatpush1.bf16.msra.mxu1 %v7036_v61  ;;  %v7090_v60 = vcombine.low %v470_v45, %v474_v46  ;;  %v7092_v61 = vcombine.low %v471_v47, %v475_v48  ;;  %v530_v45 = vld [vmem:[%s11822_s3 + $0x720] sm:$0xff]  ;;  %v527_v46 = vld [vmem:[%s11822_s3 + $0x708] sm:$0xff] }
  0x3f   :  { %1922 = vmatprep.subr.bf16.mxu0 %v7043_v62  ;;  %2044 = vmatprep.subr.bf16.mxu1 %v7045_v63  ;;  %v7099_v62 = vcombine.high %v478_v54, %v482_v55  ;;  %v7101_v63 = vcombine.high %v479_v58, %v483_v59  ;;  %v531_v47 = vld [vmem:[%s11822_s3 + $0x728] sm:$0xff] }
  0x42   :  { %1923 = vmatpush1.bf16.msra.mxu0 %v7042_v4  ;;  %2045 = vmatpush1.bf16.msra.mxu1 %v7044_v5  ;;  %v7098_v4 = vcombine.low %v478_v54, %v482_v55  ;;  %v7100_v5 = vcombine.low %v479_v58, %v483_v59  ;;  %v538_v54 = vld [vmem:[%s11822_s3 + $0x760] sm:$0xff]  ;;  %v535_v55 = vld [vmem:[%s11822_s3 + $0x748] sm:$0xff] }
  0x43   :  { %1953 = vmatprep.subr.bf16.mxu0 %v7051_v6  ;;  %2075 = vmatprep.subr.bf16.mxu1 %v7053_v7  ;;  %v7107_v6 = vcombine.high %v486_v0, %v490_v1  ;;  %v7109_v7 = vcombine.high %v487_v2, %v491_v3  ;;  %v539_v58 = vld [vmem:[%s11822_s3 + $0x768] sm:$0xff] }
  0x45   :  { %1925 = vmatmul.mubr.bf16.vlgmr.msra.gmra.mrb[0].mxu0 %v8578_v10  ;;  %2047 = vmatmul.mubr.bf16.vlgmr.msra.gmra.mrb[0].mxu1 %v8578_v10 }
  0x46   :  { %1954 = vmatpush1.bf16.msra.mxu0 %v7050_v13  ;;  %2076 = vmatpush1.bf16.msra.mxu1 %v7052_v14  ;;  %v7106_v13 = vcombine.low %v486_v0, %v490_v1  ;;  %v7108_v14 = vcombine.low %v487_v2, %v491_v3  ;;  %v546_v0 = vld [vmem:[%s11822_s3 + $0x7a0] sm:$0xff]  ;;  %v543_v1 = vld [vmem:[%s11822_s3 + $0x788] sm:$0xff] }
  0x47   :  { %1955 = vmatprep.subr.bf16.mxu0 %v7059_v15  ;;  %2077 = vmatprep.subr.bf16.mxu1 %v7061_v16  ;;  %v7115_v15 = vcombine.high %v494_v8, %v498_v9  ;;  %v7117_v16 = vcombine.high %v495_v11, %v499_v12  ;;  %v547_v2 = vld [vmem:[%s11822_s3 + $0x7a8] sm:$0xff] }
  0x48   :  { %1934 = vmatprep.mubr.bf16.mxu0 %v8595_v19  ;;  %2056 = vmatprep.mubr.bf16.mxu1 %v8595_v19 }
  0x4a   :  { %1956 = vmatpush1.bf16.msra.mxu0 %v7058_v22  ;;  %2078 = vmatpush1.bf16.msra.mxu1 %v7060_v23  ;;  %v7114_v22 = vcombine.low %v494_v8, %v498_v9  ;;  %v7116_v23 = vcombine.low %v495_v11, %v499_v12  ;;  %v554_v8 = vld [vmem:[%s11822_s3 + $0x7e0] sm:$0xff]  ;;  %v551_v9 = vld [vmem:[%s11822_s3 + $0x7c8] sm:$0xff] }
  0x4b   :  { %1957 = vmatprep.subr.bf16.mxu0 %v7067_v24  ;;  %2079 = vmatprep.subr.bf16.mxu1 %v7069_v25  ;;  %v7123_v24 = vcombine.high %v502_v17, %v506_v18  ;;  %v7125_v25 = vcombine.high %v503_v20, %v507_v21  ;;  %v555_v11 = vld [vmem:[%s11822_s3 + $0x7e8] sm:$0xff]  ;;  %v308_v17 = vld [vmem:[%s11822_s3 + $0x30] sm:$0xff]  ;;  %v305_v18 = vld [vmem:[%s11822_s3 + $0x18] sm:$0xff] }
  0x4d   :  { %1935 = vmatmul.mubr.bf16.gmra.mrb[4].mxu0 %v8621_v30  ;;  %2057 = vmatmul.mubr.bf16.gmra.mrb[4].mxu1 %v8621_v30 }
  0x4e   :  { %1958 = vmatpush1.bf16.msra.mxu0 %v7066_v32  ;;  %2080 = vmatpush1.bf16.msra.mxu1 %v7068_v33  ;;  %v7124_v32 = vcombine.low %v503_v20, %v507_v21  ;;  %v7131_v33 = vcombine.high %v510_v26, %v514_v27  ;;  %v309_v20 = vld [vmem:[%s11822_s3 + $0x38] sm:$0xff]  ;;  %v316_v26 = vld [vmem:[%s11822_s3 + $0x70] sm:$0xff] }
  0x4f   :  { %1959 = vmatprep.subr.bf16.mxu0 %v7075_v34  ;;  %2081 = vmatprep.subr.bf16.mxu1 %v7077_v35  ;;  %v7133_v34 = vcombine.high %v511_v28, %v515_v29  ;;  %v518_v35 = vld [vmem:[%s11822_s3 + $0x6c0] sm:$0xff]  ;;  %v8809_v27 = vld [vmem:[%s11823_s1 + $0x8] ss:$16 sps:$4 sm:$0xff]  }
  0x50   :  { %1944 = vmatprep.mubr.bf16.mxu0 %v8633_v38  ;;  %2066 = vmatprep.mubr.bf16.mxu1 %v8633_v38  ;;  %v7138_v48 = vcombine.low %v518_v35, %v522_v36 }
  0x52   :  { %1960 = vmatpush1.bf16.msra.mxu0 %v7074_v41  ;;  %2082 = vmatpush1.bf16.msra.mxu1 %v7076_v42  ;;  %v7132_v41 = vcombine.low %v511_v28, %v515_v29  ;;  %v7139_v42 = vcombine.high %v518_v35, %v522_v36  ;;  %v313_v28 = vld [vmem:[%s11822_s3 + $0x58] sm:$0xff]  ;;  %v320_v36 = vld [vmem:[%s11822_s3 + $0x90] sm:$0xff] }
  0x53   :  { %1961 = vmatprep.subr.bf16.mxu0 %v7083_v43  ;;  %2083 = vmatprep.subr.bf16.mxu1 %v7085_v44  ;;  %v7141_v43 = vcombine.high %v519_v37, %v523_v39  ;;  %v526_v44 = vld [vmem:[%s11822_s3 + $0x700] sm:$0xff]  ;;  %v317_v29 = vld [vmem:[%s11822_s3 + $0x78] sm:$0xff] }
  0x54   :  { %v7146_v59 = vcombine.low %v526_v44, %v530_v45  ;;  %v8820_v35 = vld [vmem:[%s11823_s1 + $0x2c] ss:$16 sps:$4 sm:$0xff]  }
  0x55   :  { %1945 = vmatmul.mubr.bf16.gmra.mrb[8].mxu0 %v8656_v49  ;;  %2067 = vmatmul.mubr.bf16.gmra.mrb[8].mxu1 %v8656_v49 }
  0x56   :  { %1962 = vmatpush1.bf16.msra.mxu0 %v7082_v50  ;;  %2084 = vmatpush1.bf16.msra.mxu1 %v7084_v51  ;;  %v7140_v50 = vcombine.low %v519_v37, %v523_v39  ;;  %v7147_v51 = vcombine.high %v526_v44, %v530_v45  ;;  %v324_v37 = vld [vmem:[%s11822_s3 + $0xb0] sm:$0xff]  ;;  %v321_v39 = vld [vmem:[%s11822_s3 + $0x98] sm:$0xff] }
  0x57   :  { %1963 = vmatprep.subr.bf16.mxu0 %v7091_v52  ;;  %2085 = vmatprep.subr.bf16.mxu1 %v7093_v53  ;;  %v7149_v52 = vcombine.high %v527_v46, %v531_v47  ;;  %v534_v53 = vld [vmem:[%s11822_s3 + $0x740] sm:$0xff]  ;;  %v8840_v44 = vld [vmem:[%s11823_s1 + $0x28] ss:$16 sps:$4 sm:$0xff]  }
  0x58   :  { %1985 = vmatprep.mubr.bf16.mxu0 %v8668_v57  ;;  %2107 = vmatprep.mubr.bf16.mxu1 %v8668_v57  ;;  %v7154_v3 = vcombine.low %v534_v53, %v538_v54 }
  0x5a   :  { %1964 = vmatpush1.bf16.msra.mxu0 %v7090_v60  ;;  %2086 = vmatpush1.bf16.msra.mxu1 %v7092_v61  ;;  %v7148_v60 = vcombine.low %v527_v46, %v531_v47  ;;  %v7155_v61 = vcombine.high %v534_v53, %v538_v54  ;;  %v328_v46 = vld [vmem:[%s11822_s3 + $0xd0] sm:$0xff] }
  0x5b   :  { %1965 = vmatprep.subr.bf16.mxu0 %v7099_v62  ;;  %2087 = vmatprep.subr.bf16.mxu1 %v7101_v63  ;;  %v7157_v62 = vcombine.high %v535_v55, %v539_v58  ;;  %v542_v63 = vld [vmem:[%s11822_s3 + $0x780] sm:$0xff]  ;;  %v332_v47 = vld [vmem:[%s11822_s3 + $0xf0] sm:$0xff] }
  0x5c   :  { %v7162_v12 = vcombine.low %v542_v63, %v546_v0  ;;  %v6951_v54 = vcombine.high %v328_v46, %v332_v47 }
  0x5e   :  { %1966 = vmatpush1.bf16.msra.mxu0 %v7098_v4  ;;  %2088 = vmatpush1.bf16.msra.mxu1 %v7100_v5  ;;  %v7156_v4 = vcombine.low %v535_v55, %v539_v58  ;;  %v7163_v5 = vcombine.high %v542_v63, %v546_v0  ;;  %v6950_v63 = vcombine.low %v328_v46, %v332_v47 }
  0x5f   :  { %1967 = vmatprep.subr.bf16.mxu0 %v7107_v6  ;;  %2089 = vmatprep.subr.bf16.mxu1 %v7109_v7  ;;  %v7165_v6 = vcombine.high %v543_v1, %v547_v2  ;;  %v550_v7 = vld [vmem:[%s11822_s3 + $0x7c0] sm:$0xff] }
  0x60   :  { %v7170_v21 = vcombine.low %v550_v7, %v554_v8 }
  0x62   :  { %1968 = vmatpush1.bf16.msra.mxu0 %v7106_v13  ;;  %2090 = vmatpush1.bf16.msra.mxu1 %v7108_v14  ;;  %v7164_v13 = vcombine.low %v543_v1, %v547_v2  ;;  %v7171_v14 = vcombine.high %v550_v7, %v554_v8  ;;  %v349_v7 = vld [vmem:[%s11822_s3 + $0x178] sm:$0xff] }
  0x63   :  { %1969 = vmatprep.subr.bf16.mxu0 %v7115_v15  ;;  %2091 = vmatprep.subr.bf16.mxu1 %v7117_v16  ;;  %v7173_v15 = vcombine.high %v551_v9, %v555_v11  ;;  %v304_v16 = vld [vmem:[%s11822_s3 + $0x10] sm:$0xff] }
  0x66   :  { %1970 = vmatpush1.bf16.msra.mxu0 %v7114_v22  ;;  %2092 = vmatpush1.bf16.msra.mxu1 %v7116_v23  ;;  %v7172_v22 = vcombine.low %v551_v9, %v555_v11  ;;  %v6927_v23 = vcombine.high %v304_v16, %v308_v17 }
  0x67   :  { %1971 = vmatprep.subr.bf16.mxu0 %v7123_v24  ;;  %2093 = vmatprep.subr.bf16.mxu1 %v7125_v25  ;;  %v6929_v24 = vcombine.high %v305_v18, %v309_v20  ;;  %v312_v25 = vld [vmem:[%s11822_s3 + $0x50] sm:$0xff] }
  0x6a   :  { %1972 = vmatpush1.bf16.msra.mxu0 %v7122_v31  ;;  %2094 = vmatpush1.bf16.msra.mxu1 %v7124_v32  ;;  %v6926_v31 = vcombine.low %v304_v16, %v308_v17  ;;  %v6928_v32 = vcombine.low %v305_v18, %v309_v20  ;;  %v357_v16 = vld [vmem:[%s11822_s3 + $0x1b8] sm:$0xff] }
  0x6b   :  { %1973 = vmatprep.subr.bf16.mxu0 %v7131_v33  ;;  %2095 = vmatprep.subr.bf16.mxu1 %v7133_v34  ;;  %v6935_v33 = vcombine.high %v312_v25, %v316_v26  ;;  %v6937_v34 = vcombine.high %v313_v28, %v317_v29 }
  0x6e   :  { %1974 = vmatpush1.bf16.msra.mxu0 %v7130_v40  ;;  %2096 = vmatpush1.bf16.msra.mxu1 %v7132_v41  ;;  %v325_v40 = vld [vmem:[%s11822_s3 + $0xb8] sm:$0xff]  ;;  %v6934_v41 = vcombine.low %v312_v25, %v316_v26 }
  0x6f   :  { %1975 = vmatprep.subr.bf16.mxu0 %v7139_v42  ;;  %2097 = vmatprep.subr.bf16.mxu1 %v7141_v43  ;;  %v6936_v42 = vcombine.low %v313_v28, %v317_v29  ;;  %v6943_v43 = vcombine.high %v320_v36, %v324_v37  ;;  %v6945_v45 = vcombine.high %v321_v39, %v325_v40  ;;  %v365_v25 = vld [vmem:[%s11822_s3 + $0x1f8] sm:$0xff] }
  0x70   :  { %v6944_v53 = vcombine.low %v321_v39, %v325_v40 }
  0x72   :  { %1976 = vmatpush1.bf16.msra.mxu0 %v7138_v48  ;;  %2098 = vmatpush1.bf16.msra.mxu1 %v7140_v50  ;;  %v329_v48 = vld [vmem:[%s11822_s3 + $0xd8] sm:$0xff] }
  0x73   :  { %1977 = vmatprep.subr.bf16.mxu0 %v7147_v51  ;;  %2099 = vmatprep.subr.bf16.mxu1 %v7149_v52  ;;  %v333_v50 = vld [vmem:[%s11822_s3 + $0xf8] sm:$0xff]  ;;  %v45_v51 = vld [vmem:[%s11823_s1 + $0x48] sm:$0x33]  ;;  %v6942_v52 = vcombine.low %v320_v36, %v324_v37 }
  0x74   :  { %v6953_v55 = vcombine.high %v329_v48, %v333_v50  ;;  %v8858_v58 = vcombine.high %v45_v51, %v45_v51  ;;  %v6952_v0 = vcombine.low %v329_v48, %v333_v50 }
  0x76   :  { %1978 = vmatpush1.bf16.msra.mxu0 %v7146_v59  ;;  %2100 = vmatpush1.bf16.msra.mxu1 %v7148_v60  ;;  %v336_v59 = vld [vmem:[%s11822_s3 + $0x110] sm:$0xff] }
  0x77   :  { %1979 = vmatprep.subr.bf16.mxu0 %v7155_v61  ;;  %2101 = vmatprep.subr.bf16.mxu1 %v7157_v62  ;;  %v340_v60 = vld [vmem:[%s11822_s3 + $0x130] sm:$0xff]  ;;  %v337_v61 = vld [vmem:[%s11822_s3 + $0x118] sm:$0xff] }
  0x78   :  { %v341_v62 = vld [vmem:[%s11822_s3 + $0x138] sm:$0xff]  ;;  %v6959_v1 = vcombine.high %v336_v59, %v340_v60  ;;  %v6958_v8 = vcombine.low %v336_v59, %v340_v60 }
  0x79   :  { %v6961_v2 = vcombine.high %v337_v61, %v341_v62  ;;  %v6960_v9 = vcombine.low %v337_v61, %v341_v62  ;;  %v392_v62 = vld [vmem:[%s11822_s3 + $0x2d0] sm:$0xff] }
  0x7a   :  { %1980 = vmatpush1.bf16.msra.mxu0 %v7154_v3  ;;  %2102 = vmatpush1.bf16.msra.mxu1 %v7156_v4  ;;  %v344_v3 = vld [vmem:[%s11822_s3 + $0x150] sm:$0xff] }
  0x7b   :  { %1981 = vmatprep.subr.bf16.mxu0 %v7163_v5  ;;  %2103 = vmatprep.subr.bf16.mxu1 %v7165_v6  ;;  %v348_v4 = vld [vmem:[%s11822_s3 + $0x170] sm:$0xff]  ;;  %v8882_v5 = vcombine.low %v45_v51, %v45_v51  ;;  %v345_v6 = vld [vmem:[%s11822_s3 + $0x158] sm:$0xff] }
  0x7c   :  { %v6967_v11 = vcombine.high %v344_v3, %v348_v4  ;;  %v6966_v17 = vcombine.low %v344_v3, %v348_v4  ;;  %v6968_v18 = vcombine.low %v345_v6, %v349_v7  ;;  %v384_v51 = vld [vmem:[%s11822_s3 + $0x290] sm:$0xff] }
  0x7e   :  { %1982 = vmatpush1.bf16.msra.mxu0 %v7162_v12  ;;  %2104 = vmatpush1.bf16.msra.mxu1 %v7164_v13  ;;  %v6969_v12 = vcombine.high %v345_v6, %v349_v7  ;;  %v352_v13 = vld [vmem:[%s11822_s3 + $0x190] sm:$0xff] }
  0x7f   :  { %1983 = vmatprep.subr.bf16.mxu0 %v7171_v14  ;;  %2105 = vmatprep.subr.bf16.mxu1 %v7173_v15  ;;  %v356_v14 = vld [vmem:[%s11822_s3 + $0x1b0] sm:$0xff]  ;;  %v353_v15 = vld [vmem:[%s11822_s3 + $0x198] sm:$0xff] }
  0x80   :  { %v6975_v20 = vcombine.high %v352_v13, %v356_v14  ;;  %v6974_v26 = vcombine.low %v352_v13, %v356_v14  ;;  %v6976_v28 = vcombine.low %v353_v15, %v357_v16  ;;  %v400_v7 = vld [vmem:[%s11822_s3 + $0x310] sm:$0xff] }
  0x82   :  { %1984 = vmatpush1.bf16.msra.mxu0 %v7170_v21  ;;  %2106 = vmatpush1.bf16.msra.mxu1 %v7172_v22  ;;  %v6977_v21 = vcombine.high %v353_v15, %v357_v16  ;;  %v360_v22 = vld [vmem:[%s11822_s3 + $0x1d0] sm:$0xff] }
  0x83   :  { %2136 = vmatprep.subr.bf16.mxu0 %v6927_v23  ;;  %2258 = vmatprep.subr.bf16.mxu1 %v6929_v24  ;;  %v364_v23 = vld [vmem:[%s11822_s3 + $0x1f0] sm:$0xff]  ;;  %v361_v24 = vld [vmem:[%s11822_s3 + $0x1d8] sm:$0xff] }
  0x84   :  { %v6983_v29 = vcombine.high %v360_v22, %v364_v23  ;;  %v6982_v36 = vcombine.low %v360_v22, %v364_v23  ;;  %v6984_v37 = vcombine.low %v361_v24, %v365_v25  ;;  %v408_v16 = vld [vmem:[%s11822_s3 + $0x350] sm:$0xff] }
  0x85   :  { %1986 = vmatmul.mubr.bf16.vlgmr.msra.gmra.mrb[0].mxu0 %v8809_v27  ;;  %2108 = vmatmul.mubr.bf16.vlgmr.msra.gmra.mrb[0].mxu1 %v8809_v27 }
  0x86   :  { %2137 = vmatpush1.bf16.msra.mxu0 %v6926_v31  ;;  %2259 = vmatpush1.bf16.msra.mxu1 %v6928_v32  ;;  %v6985_v31 = vcombine.high %v361_v24, %v365_v25  ;;  %v368_v32 = vld [vmem:[%s11822_s3 + $0x210] sm:$0xff] }
  0x87   :  { %2138 = vmatprep.subr.bf16.mxu0 %v6935_v33  ;;  %2260 = vmatprep.subr.bf16.mxu1 %v6937_v34  ;;  %v372_v33 = vld [vmem:[%s11822_s3 + $0x230] sm:$0xff]  ;;  %v373_v34 = vld [vmem:[%s11822_s3 + $0x238] sm:$0xff] }
  0x88   :  { %1995 = vmatprep.mubr.bf16.mxu0 %v8820_v35  ;;  %2117 = vmatprep.mubr.bf16.mxu1 %v8820_v35  ;;  %v6991_v39 = vcombine.high %v368_v32, %v372_v33  ;;  %v6990_v46 = vcombine.low %v368_v32, %v372_v33  ;;  %v416_v25 = vld [vmem:[%s11822_s3 + $0x390] sm:$0xff] }
  0x8a   :  { %2139 = vmatpush1.bf16.msra.mxu0 %v6934_v41  ;;  %2261 = vmatpush1.bf16.msra.mxu1 %v6936_v42  ;;  %v376_v41 = vld [vmem:[%s11822_s3 + $0x250] sm:$0xff] }
  0x8b   :  { %2140 = vmatprep.subr.bf16.mxu0 %v6943_v43  ;;  %2262 = vmatprep.subr.bf16.mxu1 %v6945_v45  ;;  %v380_v42 = vld [vmem:[%s11822_s3 + $0x270] sm:$0xff]  ;;  %v377_v43 = vld [vmem:[%s11822_s3 + $0x258] sm:$0xff] }
  0x8c   :  { %v381_v45 = vld [vmem:[%s11822_s3 + $0x278] sm:$0xff]  ;;  %v6999_v48 = vcombine.high %v376_v41, %v380_v42 }
  0x8d   :  { %1996 = vmatmul.mubr.bf16.gmra.mrb[4].mxu0 %v8840_v44  ;;  %2118 = vmatmul.mubr.bf16.gmra.mrb[4].mxu1 %v8840_v44  ;;  %v7001_v50 = vcombine.high %v377_v43, %v381_v45  ;;  %v7000_v59 = vcombine.low %v377_v43, %v381_v45  ;;  %v432_v45 = vld [vmem:[%s11822_s3 + $0x410] sm:$0xff] }
  0x8e   :  { %2141 = vmatpush1.bf16.msra.mxu0 %v6942_v52  ;;  %2263 = vmatpush1.bf16.msra.mxu1 %v6944_v53  ;;  %v388_v52 = vld [vmem:[%s11822_s3 + $0x2b0] sm:$0xff]  ;;  %v385_v53 = vld [vmem:[%s11822_s3 + $0x298] sm:$0xff] }
  0x8f   :  { %2142 = vmatprep.subr.bf16.mxu0 %v6951_v54  ;;  %2264 = vmatprep.subr.bf16.mxu1 %v6953_v55  ;;  %v389_v54 = vld [vmem:[%s11822_s3 + $0x2b8] sm:$0xff]  ;;  %v6998_v55 = vcombine.low %v376_v41, %v380_v42  ;;  %v7007_v60 = vcombine.high %v384_v51, %v388_v52 }
  0x90   :  { %2005 = vmatprep.mubr.bf16.mxu0 %v8858_v58  ;;  %2127 = vmatprep.mubr.bf16.mxu1 %v8858_v58  ;;  %v7009_v61 = vcombine.high %v385_v53, %v389_v54  ;;  %v7008_v3 = vcombine.low %v385_v53, %v389_v54  ;;  %v440_v54 = vld [vmem:[%s11822_s3 + $0x450] sm:$0xff] }
  0x92   :  { %2143 = vmatpush1.bf16.msra.mxu0 %v6950_v63  ;;  %2265 = vmatpush1.bf16.msra.mxu1 %v6952_v0  ;;  %v396_v63 = vld [vmem:[%s11822_s3 + $0x2f0] sm:$0xff]  ;;  %v393_v0 = vld [vmem:[%s11822_s3 + $0x2d8] sm:$0xff] }
  0x93   :  { %2144 = vmatprep.subr.bf16.mxu0 %v6959_v1  ;;  %2266 = vmatprep.subr.bf16.mxu1 %v6961_v2  ;;  %v397_v1 = vld [vmem:[%s11822_s3 + $0x2f8] sm:$0xff]  ;;  %v7006_v2 = vcombine.low %v384_v51, %v388_v52  ;;  %v7015_v4 = vcombine.high %v392_v62, %v396_v63 }
  0x94   :  { %v7017_v6 = vcombine.high %v393_v0, %v397_v1  ;;  %v7016_v13 = vcombine.low %v393_v0, %v397_v1  ;;  %v448_v1 = vld [vmem:[%s11822_s3 + $0x490] sm:$0xff] }
  0x95   :  { %2006 = vmatmul.mubr.bf16.gmra.mrb[12].mxu0 %v8882_v5  ;;  %2128 = vmatmul.mubr.bf16.gmra.mrb[12].mxu1 %v8882_v5 }
  0x96   :  { %2145 = vmatpush1.bf16.msra.mxu0 %v6958_v8  ;;  %2267 = vmatpush1.bf16.msra.mxu1 %v6960_v9  ;;  %v404_v8 = vld [vmem:[%s11822_s3 + $0x330] sm:$0xff]  ;;  %v401_v9 = vld [vmem:[%s11822_s3 + $0x318] sm:$0xff] }
  0x97   :  { %2146 = vmatprep.subr.bf16.mxu0 %v6967_v11  ;;  %2268 = vmatprep.subr.bf16.mxu1 %v6969_v12  ;;  %v405_v11 = vld [vmem:[%s11822_s3 + $0x338] sm:$0xff]  ;;  %v7014_v12 = vcombine.low %v392_v62, %v396_v63  ;;  %v7023_v14 = vcombine.high %v400_v7, %v404_v8 }
  0x98   :  { %2168 = vmatprep.mubr.bf16.mxu0 %v8451_v56  ;;  %2290 = vmatprep.mubr.bf16.mxu1 %v8451_v56  ;;  %v369_v56 = vld [vmem:[%s11822_s3 + $0x218] sm:$0xff]  ;;  %v7025_v15 = vcombine.high %v401_v9, %v405_v11  ;;  %v7024_v22 = vcombine.low %v401_v9, %v405_v11  ;;  %v456_v9 = vld [vmem:[%s11822_s3 + $0x4d0] sm:$0xff] }
  0x99   :  { %v6993_v40 = vcombine.high %v369_v56, %v373_v34  ;;  %v6992_v47 = vcombine.low %v369_v56, %v373_v34  ;;  %v424_v34 = vld [vmem:[%s11822_s3 + $0x3d0] sm:$0xff] }
  0x9a   :  { %2147 = vmatpush1.bf16.msra.mxu0 %v6966_v17  ;;  %2269 = vmatpush1.bf16.msra.mxu1 %v6968_v18  ;;  %v412_v17 = vld [vmem:[%s11822_s3 + $0x370] sm:$0xff]  ;;  %v409_v18 = vld [vmem:[%s11822_s3 + $0x358] sm:$0xff] }
  0x9b   :  { %2148 = vmatprep.subr.bf16.mxu0 %v6975_v20  ;;  %2270 = vmatprep.subr.bf16.mxu1 %v6977_v21  ;;  %v413_v20 = vld [vmem:[%s11822_s3 + $0x378] sm:$0xff]  ;;  %v7022_v21 = vcombine.low %v400_v7, %v404_v8  ;;  %v7031_v23 = vcombine.high %v408_v16, %v412_v17 }
  0x9c   :  { %v7033_v24 = vcombine.high %v409_v18, %v413_v20  ;;  %v7032_v32 = vcombine.low %v409_v18, %v413_v20  ;;  %v464_v18 = vld [vmem:[%s11822_s3 + $0x510] sm:$0xff] }
  0x9d   :  { %v468_v20 = vld [vmem:[%s11822_s3 + $0x530] sm:$0xff] }
  0x9e   :  { %2149 = vmatpush1.bf16.msra.mxu0 %v6974_v26  ;;  %2271 = vmatpush1.bf16.msra.mxu1 %v6976_v28  ;;  %v420_v26 = vld [vmem:[%s11822_s3 + $0x3b0] sm:$0xff]  ;;  %v417_v28 = vld [vmem:[%s11822_s3 + $0x398] sm:$0xff] }
  0x9f   :  { %2150 = vmatprep.subr.bf16.mxu0 %v6983_v29  ;;  %2272 = vmatprep.subr.bf16.mxu1 %v6985_v31  ;;  %v421_v29 = vld [vmem:[%s11822_s3 + $0x3b8] sm:$0xff]  ;;  %v7030_v31 = vcombine.low %v408_v16, %v412_v17  ;;  %v7039_v33 = vcombine.high %v416_v25, %v420_v26 }
  0xa0   :  { %v7041_v56 = vcombine.high %v417_v28, %v421_v29  ;;  %v7040_v41 = vcombine.low %v417_v28, %v421_v29  ;;  %v476_v28 = vld [vmem:[%s11822_s3 + $0x570] sm:$0xff]  ;;  %v477_v29 = vld [vmem:[%s11822_s3 + $0x578] sm:$0xff] }
  0xa2   :  { %2151 = vmatpush1.bf16.msra.mxu0 %v6982_v36  ;;  %2273 = vmatpush1.bf16.msra.mxu1 %v6984_v37  ;;  %v428_v36 = vld [vmem:[%s11822_s3 + $0x3f0] sm:$0xff]  ;;  %v425_v37 = vld [vmem:[%s11822_s3 + $0x3d8] sm:$0xff] }
  0xa3   :  { %2152 = vmatprep.subr.bf16.mxu0 %v6991_v39  ;;  %2274 = vmatprep.subr.bf16.mxu1 %v6993_v40  ;;  %v429_v39 = vld [vmem:[%s11822_s3 + $0x3f8] sm:$0xff]  ;;  %v7038_v40 = vcombine.low %v416_v25, %v420_v26  ;;  %v7047_v42 = vcombine.high %v424_v34, %v428_v36  ;;  %v472_v26 = vld [vmem:[%s11822_s3 + $0x550] sm:$0xff] }
  0xa4   :  { %v7049_v43 = vcombine.high %v425_v37, %v429_v39  ;;  %v7048_v51 = vcombine.low %v425_v37, %v429_v39  ;;  %v485_v37 = vld [vmem:[%s11822_s3 + $0x5b8] sm:$0xff]  ;;  %v7094_v39 = vcombine.low %v472_v26, %v476_v28 }
  0xa6   :  { %2153 = vmatpush1.bf16.msra.mxu0 %v6990_v46  ;;  %2275 = vmatpush1.bf16.msra.mxu1 %v6992_v47  ;;  %v436_v46 = vld [vmem:[%s11822_s3 + $0x430] sm:$0xff]  ;;  %v433_v47 = vld [vmem:[%s11822_s3 + $0x418] sm:$0xff] }
  0xa7   :  { %2154 = vmatprep.subr.bf16.mxu0 %v6999_v48  ;;  %2276 = vmatprep.subr.bf16.mxu1 %v7001_v50  ;;  %v437_v48 = vld [vmem:[%s11822_s3 + $0x438] sm:$0xff]  ;;  %v7046_v50 = vcombine.low %v424_v34, %v428_v36  ;;  %v7055_v52 = vcombine.high %v432_v45, %v436_v46  ;;  %v480_v34 = vld [vmem:[%s11822_s3 + $0x590] sm:$0xff] }
  0xa8   :  { %v7057_v53 = vcombine.high %v433_v47, %v437_v48  ;;  %v7056_v62 = vcombine.low %v433_v47, %v437_v48  ;;  %v484_v36 = vld [vmem:[%s11822_s3 + $0x5b0] sm:$0xff] }
  0xa9   :  { %v7102_v47 = vcombine.low %v480_v34, %v484_v36 }
  0xaa   :  { %2155 = vmatpush1.bf16.msra.mxu0 %v6998_v55  ;;  %2277 = vmatpush1.bf16.msra.mxu1 %v7000_v59  ;;  %v444_v55 = vld [vmem:[%s11822_s3 + $0x470] sm:$0xff]  ;;  %v441_v59 = vld [vmem:[%s11822_s3 + $0x458] sm:$0xff] }
  0xab   :  { %2156 = vmatprep.subr.bf16.mxu0 %v7007_v60  ;;  %2278 = vmatprep.subr.bf16.mxu1 %v7009_v61  ;;  %v445_v60 = vld [vmem:[%s11822_s3 + $0x478] sm:$0xff]  ;;  %v7054_v61 = vcombine.low %v432_v45, %v436_v46  ;;  %v7063_v63 = vcombine.high %v440_v54, %v444_v55  ;;  %v492_v45 = vld [vmem:[%s11822_s3 + $0x5f0] sm:$0xff] }
  0xac   :  { %v7065_v0 = vcombine.high %v441_v59, %v445_v60  ;;  %v7064_v7 = vcombine.low %v441_v59, %v445_v60  ;;  %v493_v46 = vld [vmem:[%s11822_s3 + $0x5f8] sm:$0xff] }
  0xae   :  { %2157 = vmatpush1.bf16.msra.mxu0 %v7006_v2  ;;  %2279 = vmatpush1.bf16.msra.mxu1 %v7008_v3  ;;  %v452_v2 = vld [vmem:[%s11822_s3 + $0x4b0] sm:$0xff]  ;;  %v449_v3 = vld [vmem:[%s11822_s3 + $0x498] sm:$0xff] }
  0xaf   :  { %2158 = vmatprep.subr.bf16.mxu0 %v7015_v4  ;;  %2280 = vmatprep.subr.bf16.mxu1 %v7017_v6  ;;  %v453_v4 = vld [vmem:[%s11822_s3 + $0x4b8] sm:$0xff]  ;;  %v7062_v6 = vcombine.low %v440_v54, %v444_v55  ;;  %v7071_v8 = vcombine.high %v448_v1, %v452_v2 }
  0xb0   :  { %v7073_v11 = vcombine.high %v449_v3, %v453_v4  ;;  %v501_v54 = vld [vmem:[%s11822_s3 + $0x638] sm:$0xff] }
  0xb2   :  { %2159 = vmatpush1.bf16.msra.mxu0 %v7014_v12  ;;  %2281 = vmatpush1.bf16.msra.mxu1 %v7016_v13  ;;  %v460_v12 = vld [vmem:[%s11822_s3 + $0x4f0] sm:$0xff]  ;;  %v461_v13 = vld [vmem:[%s11822_s3 + $0x4f8] sm:$0xff] }
  0xb3   :  { %2160 = vmatprep.subr.bf16.mxu0 %v7023_v14  ;;  %2282 = vmatprep.subr.bf16.mxu1 %v7025_v15  ;;  %v7070_v14 = vcombine.low %v448_v1, %v452_v2  ;;  %v7072_v15 = vcombine.low %v449_v3, %v453_v4  ;;  %v7079_v16 = vcombine.high %v456_v9, %v460_v12  ;;  %v509_v1 = vld [vmem:[%s11822_s3 + $0x678] sm:$0xff] }
  0xb6   :  { %2161 = vmatpush1.bf16.msra.mxu0 %v7022_v21  ;;  %2283 = vmatpush1.bf16.msra.mxu1 %v7024_v22  ;;  %v469_v21 = vld [vmem:[%s11822_s3 + $0x538] sm:$0xff]  ;;  %v7078_v22 = vcombine.low %v456_v9, %v460_v12 }
  0xb7   :  { %2162 = vmatprep.subr.bf16.mxu0 %v7031_v23  ;;  %2284 = vmatprep.subr.bf16.mxu1 %v7033_v24  ;;  %v7087_v24 = vcombine.high %v464_v18, %v468_v20  ;;  %v513_v9 = vld [vmem:[%s11822_s3 + $0x698] sm:$0xff] }
  0xba   :  { %2163 = vmatpush1.bf16.msra.mxu0 %v7030_v31  ;;  %2285 = vmatpush1.bf16.msra.mxu1 %v7032_v32  ;;  %v7086_v31 = vcombine.low %v464_v18, %v468_v20  ;;  %v525_v18 = vld [vmem:[%s11822_s3 + $0x6f8] sm:$0xff] }
  0xbb   :  { %2164 = vmatprep.subr.bf16.mxu0 %v7039_v33  ;;  %2286 = vmatprep.subr.bf16.mxu1 %v7041_v56  ;;  %v7095_v33 = vcombine.high %v472_v26, %v476_v28  ;;  %v533_v26 = vld [vmem:[%s11822_s3 + $0x738] sm:$0xff] }
  0xbe   :  { %2165 = vmatpush1.bf16.msra.mxu0 %v7038_v40  ;;  %2287 = vmatpush1.bf16.msra.mxu1 %v7040_v41  ;;  %v7103_v41 = vcombine.high %v480_v34, %v484_v36  ;;  %v541_v34 = vld [vmem:[%s11822_s3 + $0x778] sm:$0xff] }
  0xbf   :  { %2166 = vmatprep.subr.bf16.mxu0 %v7047_v42  ;;  %2288 = vmatprep.subr.bf16.mxu1 %v7049_v43  ;;  %v488_v43 = vld [vmem:[%s11822_s3 + $0x5d0] sm:$0xff] }
  0xc0   :  { %v7110_v55 = vcombine.low %v488_v43, %v492_v45 }
  0xc2   :  { %2167 = vmatpush1.bf16.msra.mxu0 %v7046_v50  ;;  %2289 = vmatpush1.bf16.msra.mxu1 %v7048_v51  ;;  %v7111_v50 = vcombine.high %v488_v43, %v492_v45  ;;  %v549_v43 = vld [vmem:[%s11822_s3 + $0x7b8] sm:$0xff] }
  0xc3   :  { %2197 = vmatprep.subr.bf16.mxu0 %v7055_v52  ;;  %2319 = vmatprep.subr.bf16.mxu1 %v7057_v53  ;;  %v496_v52 = vld [vmem:[%s11822_s3 + $0x610] sm:$0xff] }
  0xc4   :  { %v500_v53 = vld [vmem:[%s11822_s3 + $0x630] sm:$0xff] }
  0xc5   :  { %2169 = vmatmul.mubr.bf16.vlgmr.msra.gmra.mrb[16].mxu0 %v8578_v10  ;;  %2291 = vmatmul.mubr.bf16.vlgmr.msra.gmra.mrb[16].mxu1 %v8578_v10  ;;  %v457_v10 = vld [vmem:[%s11822_s3 + $0x4d8] sm:$0xff]  ;;  %v7119_v60 = vcombine.high %v496_v52, %v500_v53  ;;  %v7118_v2 = vcombine.low %v496_v52, %v500_v53 }
  0xc6   :  { %2198 = vmatpush1.bf16.msra.mxu0 %v7054_v61  ;;  %2320 = vmatpush1.bf16.msra.mxu1 %v7056_v62  ;;  %v7081_v17 = vcombine.high %v457_v10, %v461_v13  ;;  %v7080_v23 = vcombine.low %v457_v10, %v461_v13  ;;  %v504_v62 = vld [vmem:[%s11822_s3 + $0x650] sm:$0xff]  ;;  %v557_v52 = vld [vmem:[%s11822_s3 + $0x7f8] sm:$0xff] }
  0xc7   :  { %2199 = vmatprep.subr.bf16.mxu0 %v7063_v63  ;;  %2321 = vmatprep.subr.bf16.mxu1 %v7065_v0  ;;  %v508_v63 = vld [vmem:[%s11822_s3 + $0x670] sm:$0xff]  ;;  %v505_v0 = vld [vmem:[%s11822_s3 + $0x658] sm:$0xff] }
  0xc8   :  { %2178 = vmatprep.mubr.bf16.mxu0 %v8595_v19  ;;  %2300 = vmatprep.mubr.bf16.mxu1 %v8595_v19  ;;  %v465_v19 = vld [vmem:[%s11822_s3 + $0x518] sm:$0xff]  ;;  %v7127_v4 = vcombine.high %v504_v62, %v508_v63  ;;  %v7126_v12 = vcombine.low %v504_v62, %v508_v63  ;;  %v7128_v10 = vcombine.low %v505_v0, %v509_v1  ;;  %v51_v62 = vld [vmem:[%s11825_s2 + $0x28] sm:$0xff] }
  0xc9   :  { %v7089_v25 = vcombine.high %v465_v19, %v469_v21  ;;  %v7088_v32 = vcombine.low %v465_v19, %v469_v21 }
  0xca   :  { %2200 = vmatpush1.bf16.msra.mxu0 %v7062_v6  ;;  %2322 = vmatpush1.bf16.msra.mxu1 %v7064_v7  ;;  %v7129_v6 = vcombine.high %v505_v0, %v509_v1  ;;  %v512_v7 = vld [vmem:[%s11822_s3 + $0x690] sm:$0xff] }
  0xcb   :  { %2201 = vmatprep.subr.bf16.mxu0 %v7071_v8  ;;  %2323 = vmatprep.subr.bf16.mxu1 %v7073_v11  ;;  %v516_v8 = vld [vmem:[%s11822_s3 + $0x6b0] sm:$0xff]  ;;  %v517_v11 = vld [vmem:[%s11822_s3 + $0x6b8] sm:$0xff] }
  0xcc   :  { %v7135_v13 = vcombine.high %v512_v7, %v516_v8  ;;  %v7134_v20 = vcombine.low %v512_v7, %v516_v8  ;;  %v7136_v19 = vcombine.low %v513_v9, %v517_v11  ;;  %v59_v7 = vld [vmem:[%s11825_s2 + $0x68] sm:$0xff] }
  0xcd   :  { %2179 = vmatmul.mubr.bf16.gmra.mrb[20].mxu0 %v8621_v30  ;;  %2301 = vmatmul.mubr.bf16.gmra.mrb[20].mxu1 %v8621_v30  ;;  %v473_v30 = vld [vmem:[%s11822_s3 + $0x558] sm:$0xff] }
  0xce   :  { %2202 = vmatpush1.bf16.msra.mxu0 %v7070_v14  ;;  %2324 = vmatpush1.bf16.msra.mxu1 %v7072_v15  ;;  %v7097_v56 = vcombine.high %v473_v30, %v477_v29  ;;  %v7096_v40 = vcombine.low %v473_v30, %v477_v29  ;;  %v7137_v14 = vcombine.high %v513_v9, %v517_v11  ;;  %v520_v15 = vld [vmem:[%s11822_s3 + $0x6d0] sm:$0xff] }
  0xcf   :  { %2203 = vmatprep.subr.bf16.mxu0 %v7079_v16  ;;  %2325 = vmatprep.subr.bf16.mxu1 %v7081_v17  ;;  %v524_v16 = vld [vmem:[%s11822_s3 + $0x6f0] sm:$0xff]  ;;  %v521_v17 = vld [vmem:[%s11822_s3 + $0x6d8] sm:$0xff] }
  0xd0   :  { %2188 = vmatprep.mubr.bf16.mxu0 %v8633_v38  ;;  %2310 = vmatprep.mubr.bf16.mxu1 %v8633_v38  ;;  %v481_v38 = vld [vmem:[%s11822_s3 + $0x598] sm:$0xff]  ;;  %v7143_v21 = vcombine.high %v520_v15, %v524_v16  ;;  %v7142_v28 = vcombine.low %v520_v15, %v524_v16  ;;  %v7144_v30 = vcombine.low %v521_v17, %v525_v18  ;;  %v67_v15 = vld [vmem:[%s11825_s2 + $0xa8] sm:$0xff] }
  0xd1   :  { %v7105_v42 = vcombine.high %v481_v38, %v485_v37  ;;  %v7104_v48 = vcombine.low %v481_v38, %v485_v37 }
  0xd2   :  { %2204 = vmatpush1.bf16.msra.mxu0 %v7078_v22  ;;  %2326 = vmatpush1.bf16.msra.mxu1 %v7080_v23  ;;  %v7145_v22 = vcombine.high %v521_v17, %v525_v18  ;;  %v528_v23 = vld [vmem:[%s11822_s3 + $0x710] sm:$0xff] }
  0xd3   :  { %2205 = vmatprep.subr.bf16.mxu0 %v7087_v24  ;;  %2327 = vmatprep.subr.bf16.mxu1 %v7089_v25  ;;  %v532_v24 = vld [vmem:[%s11822_s3 + $0x730] sm:$0xff]  ;;  %v529_v25 = vld [vmem:[%s11822_s3 + $0x718] sm:$0xff] }
  0xd4   :  { %v7151_v29 = vcombine.high %v528_v23, %v532_v24  ;;  %v7150_v36 = vcombine.low %v528_v23, %v532_v24  ;;  %v7152_v38 = vcombine.low %v529_v25, %v533_v26 }
  0xd5   :  { %2189 = vmatmul.mubr.bf16.gmra.mrb[24].mxu0 %v8656_v49  ;;  %2311 = vmatmul.mubr.bf16.gmra.mrb[24].mxu1 %v8656_v49  ;;  %v489_v49 = vld [vmem:[%s11822_s3 + $0x5d8] sm:$0xff] }
  0xd6   :  { %2206 = vmatpush1.bf16.msra.mxu0 %v7086_v31  ;;  %2328 = vmatpush1.bf16.msra.mxu1 %v7088_v32  ;;  %v7113_v51 = vcombine.high %v489_v49, %v493_v46  ;;  %v7112_v59 = vcombine.low %v489_v49, %v493_v46  ;;  %v7153_v31 = vcombine.high %v529_v25, %v533_v26  ;;  %v536_v32 = vld [vmem:[%s11822_s3 + $0x750] sm:$0xff] }
  0xd7   :  { %2207 = vmatprep.subr.bf16.mxu0 %v7095_v33  ;;  %2329 = vmatprep.subr.bf16.mxu1 %v7097_v56  ;;  %v540_v33 = vld [vmem:[%s11822_s3 + $0x770] sm:$0xff]  ;;  %v537_v56 = vld [vmem:[%s11822_s3 + $0x758] sm:$0xff] }
  0xd8   :  { %2229 = vmatprep.mubr.bf16.mxu0 %v8668_v57  ;;  %2351 = vmatprep.mubr.bf16.mxu1 %v8668_v57  ;;  %v497_v57 = vld [vmem:[%s11822_s3 + $0x618] sm:$0xff]  ;;  %v7159_v37 = vcombine.high %v536_v32, %v540_v33  ;;  %v7158_v45 = vcombine.low %v536_v32, %v540_v33  ;;  %v7160_v49 = vcombine.low %v537_v56, %v541_v34 }
  0xd9   :  { %v7121_v61 = vcombine.high %v497_v57, %v501_v54  ;;  %v7120_v3 = vcombine.low %v497_v57, %v501_v54 }
  0xda   :  { %2208 = vmatpush1.bf16.msra.mxu0 %v7094_v39  ;;  %2330 = vmatpush1.bf16.msra.mxu1 %v7096_v40  ;;  %v7161_v39 = vcombine.high %v537_v56, %v541_v34  ;;  %v544_v40 = vld [vmem:[%s11822_s3 + $0x790] sm:$0xff]  ;;  %v86_v34 = vld [vmem:[%s11825_s2 + $0x140] sm:$0xff] }
  0xdb   :  { %2209 = vmatprep.subr.bf16.mxu0 %v7103_v41  ;;  %2331 = vmatprep.subr.bf16.mxu1 %v7105_v42  ;;  %v548_v41 = vld [vmem:[%s11822_s3 + $0x7b0] sm:$0xff]  ;;  %v545_v42 = vld [vmem:[%s11822_s3 + $0x798] sm:$0xff] }
  0xdc   :  { %v7167_v46 = vcombine.high %v544_v40, %v548_v41  ;;  %v7166_v53 = vcombine.low %v544_v40, %v548_v41  ;;  %v7168_v57 = vcombine.low %v545_v42, %v549_v43 }
  0xde   :  { %2210 = vmatpush1.bf16.msra.mxu0 %v7102_v47  ;;  %2332 = vmatpush1.bf16.msra.mxu1 %v7104_v48  ;;  %v7169_v47 = vcombine.high %v545_v42, %v549_v43  ;;  %v552_v48 = vld [vmem:[%s11822_s3 + $0x7d0] sm:$0xff]  ;;  %v98_v42 = vld [vmem:[%s11825_s2 + $0x1a0] sm:$0xff] }
  0xdf   :  { %2211 = vmatprep.subr.bf16.mxu0 %v7111_v50  ;;  %2333 = vmatprep.subr.bf16.mxu1 %v7113_v51  ;;  %v556_v50 = vld [vmem:[%s11822_s3 + $0x7f0] sm:$0xff]  ;;  %v553_v51 = vld [vmem:[%s11822_s3 + $0x7d8] sm:$0xff] }
  0xe0   :  { %v7175_v54 = vcombine.high %v552_v48, %v556_v50  ;;  %v7174_v63 = vcombine.low %v552_v48, %v556_v50  ;;  %v7176_v0 = vcombine.low %v553_v51, %v557_v52  ;;  %v9307_v43 = vld [vmem:[%s11824_s0 + $0x4] ss:$16 sps:$4 sm:$0xff]  }
  0xe2   :  { %2212 = vmatpush1.bf16.msra.mxu0 %v7110_v55  ;;  %2334 = vmatpush1.bf16.msra.mxu1 %v7112_v59  ;;  %v7177_v55 = vcombine.high %v553_v51, %v557_v52  ;;  %v46_v59 = vld [vmem:[%s11825_s2] sm:$0xff] }
  0xe3   :  { %2213 = vmatprep.subr.bf16.mxu0 %v7119_v60  ;;  %2335 = vmatprep.subr.bf16.mxu1 %v7121_v61  ;;  %v50_v60 = vld [vmem:[%s11825_s2 + $0x20] sm:$0xff]  ;;  %v47_v61 = vld [vmem:[%s11825_s2 + $0x8] sm:$0xff] }
  0xe4   :  { %v7191_v1 = vcombine.high %v46_v59, %v50_v60  ;;  %v7190_v8 = vcombine.low %v46_v59, %v50_v60  ;;  %v7192_v9 = vcombine.low %v47_v61, %v51_v62  ;;  %v102_v51 = vld [vmem:[%s11825_s2 + $0x1c0] sm:$0xff] }
  0xe5   :  { %v106_v52 = vld [vmem:[%s11825_s2 + $0x1e0] sm:$0xff] }
  0xe6   :  { %2214 = vmatpush1.bf16.msra.mxu0 %v7118_v2  ;;  %2336 = vmatpush1.bf16.msra.mxu1 %v7120_v3  ;;  %v7193_v2 = vcombine.high %v47_v61, %v51_v62  ;;  %v54_v3 = vld [vmem:[%s11825_s2 + $0x40] sm:$0xff]  ;;  %v111_v62 = vld [vmem:[%s11825_s2 + $0x208] sm:$0xff] }
  0xe7   :  { %2215 = vmatprep.subr.bf16.mxu0 %v7127_v4  ;;  %2337 = vmatprep.subr.bf16.mxu1 %v7129_v6  ;;  %v58_v4 = vld [vmem:[%s11825_s2 + $0x60] sm:$0xff]  ;;  %v55_v6 = vld [vmem:[%s11825_s2 + $0x48] sm:$0xff] }
  0xe8   :  { %v7199_v11 = vcombine.high %v54_v3, %v58_v4  ;;  %v7198_v16 = vcombine.low %v54_v3, %v58_v4  ;;  %v7200_v17 = vcombine.low %v55_v6, %v59_v7  ;;  %v110_v60 = vld [vmem:[%s11825_s2 + $0x200] sm:$0xff] }
  0xe9   :  { %v114_v61 = vld [vmem:[%s11825_s2 + $0x220] sm:$0xff] }
  0xea   :  { %2216 = vmatpush1.bf16.msra.mxu0 %v7126_v12  ;;  %2338 = vmatpush1.bf16.msra.mxu1 %v7128_v10  ;;  %v7201_v12 = vcombine.high %v55_v6, %v59_v7  ;;  %v62_v10 = vld [vmem:[%s11825_s2 + $0x80] sm:$0xff]  ;;  %v119_v7 = vld [vmem:[%s11825_s2 + $0x248] sm:$0xff] }
  0xeb   :  { %2217 = vmatprep.subr.bf16.mxu0 %v7135_v13  ;;  %2339 = vmatprep.subr.bf16.mxu1 %v7137_v14  ;;  %v66_v13 = vld [vmem:[%s11825_s2 + $0xa0] sm:$0xff]  ;;  %v63_v14 = vld [vmem:[%s11825_s2 + $0x88] sm:$0xff] }
  0xec   :  { %v7207_v18 = vcombine.high %v62_v10, %v66_v13  ;;  %v7206_v23 = vcombine.low %v62_v10, %v66_v13  ;;  %v7208_v24 = vcombine.low %v63_v14, %v67_v15  ;;  %v118_v4 = vld [vmem:[%s11825_s2 + $0x240] sm:$0xff] }
  0xed   :  { %v122_v6 = vld [vmem:[%s11825_s2 + $0x260] sm:$0xff] }
  0xee   :  { %2218 = vmatpush1.bf16.msra.mxu0 %v7134_v20  ;;  %2340 = vmatpush1.bf16.msra.mxu1 %v7136_v19  ;;  %v7209_v20 = vcombine.high %v63_v14, %v67_v15  ;;  %v70_v19 = vld [vmem:[%s11825_s2 + $0xc0] sm:$0xff]  ;;  %v127_v15 = vld [vmem:[%s11825_s2 + $0x288] sm:$0xff] }
  0xef   :  { %2219 = vmatprep.subr.bf16.mxu0 %v7143_v21  ;;  %2341 = vmatprep.subr.bf16.mxu1 %v7145_v22  ;;  %v74_v21 = vld [vmem:[%s11825_s2 + $0xe0] sm:$0xff]  ;;  %v75_v22 = vld [vmem:[%s11825_s2 + $0xe8] sm:$0xff] }
  0xf0   :  { %v7215_v25 = vcombine.high %v70_v19, %v74_v21  ;;  %v126_v13 = vld [vmem:[%s11825_s2 + $0x280] sm:$0xff] }
  0xf1   :  { %v130_v14 = vld [vmem:[%s11825_s2 + $0x2a0] sm:$0xff] }
  0xf2   :  { %2220 = vmatpush1.bf16.msra.mxu0 %v7142_v28  ;;  %2342 = vmatpush1.bf16.msra.mxu1 %v7144_v30  ;;  %v82_v28 = vld [vmem:[%s11825_s2 + $0x120] sm:$0xff]  ;;  %v79_v30 = vld [vmem:[%s11825_s2 + $0x108] sm:$0xff] }
  0xf3   :  { %2221 = vmatprep.subr.bf16.mxu0 %v7151_v29  ;;  %2343 = vmatprep.subr.bf16.mxu1 %v7153_v31  ;;  %v83_v29 = vld [vmem:[%s11825_s2 + $0x128] sm:$0xff]  ;;  %v7214_v31 = vcombine.low %v70_v19, %v74_v21  ;;  %v134_v21 = vld [vmem:[%s11825_s2 + $0x2c0] sm:$0xff] }
  0xf4   :  { %v7225_v56 = vcombine.high %v79_v30, %v83_v29 }
  0xf6   :  { %2222 = vmatpush1.bf16.msra.mxu0 %v7150_v36  ;;  %2344 = vmatpush1.bf16.msra.mxu1 %v7152_v38  ;;  %v90_v36 = vld [vmem:[%s11825_s2 + $0x160] sm:$0xff]  ;;  %v91_v38 = vld [vmem:[%s11825_s2 + $0x168] sm:$0xff] }
  0xf7   :  { %2223 = vmatprep.subr.bf16.mxu0 %v7159_v37  ;;  %2345 = vmatprep.subr.bf16.mxu1 %v7161_v39  ;;  %v7224_v39 = vcombine.low %v79_v30, %v83_v29  ;;  %v7231_v40 = vcombine.high %v86_v34, %v90_v36 }
  0xfa   :  { %2224 = vmatpush1.bf16.msra.mxu0 %v7158_v45  ;;  %2346 = vmatpush1.bf16.msra.mxu1 %v7160_v49  ;;  %v95_v45 = vld [vmem:[%s11825_s2 + $0x188] sm:$0xff] }
  0xfb   :  { %2225 = vmatprep.subr.bf16.mxu0 %v7167_v46  ;;  %2347 = vmatprep.subr.bf16.mxu1 %v7169_v47  ;;  %v99_v49 = vld [vmem:[%s11825_s2 + $0x1a8] sm:$0xff]  ;;  %v7230_v46 = vcombine.low %v86_v34, %v90_v36  ;;  %v142_v34 = vld [vmem:[%s11825_s2 + $0x300] sm:$0xff] }
  0xfc   :  { %v7241_v50 = vcombine.high %v95_v45, %v99_v49  ;;  %v146_v36 = vld [vmem:[%s11825_s2 + $0x320] sm:$0xff] }
  0xfe   :  { %2226 = vmatpush1.bf16.msra.mxu0 %v7166_v53  ;;  %2348 = vmatpush1.bf16.msra.mxu1 %v7168_v57  ;;  %v107_v53 = vld [vmem:[%s11825_s2 + $0x1e8] sm:$0xff] }
  0xff   :  { %2227 = vmatprep.subr.bf16.mxu0 %v7175_v54  ;;  %2349 = vmatprep.subr.bf16.mxu1 %v7177_v55  ;;  %v7240_v54 = vcombine.low %v95_v45, %v99_v49  ;;  %v7247_v55 = vcombine.high %v102_v51, %v106_v52  ;;  %v154_v45 = vld [vmem:[%s11825_s2 + $0x360] sm:$0xff]  ;;  %v151_v49 = vld [vmem:[%s11825_s2 + $0x348] sm:$0xff] }
 0x102   :  { %2228 = vmatpush1.bf16.msra.mxu0 %v7174_v63  ;;  %2350 = vmatpush1.bf16.msra.mxu1 %v7176_v0  ;;  %v115_v63 = vld [vmem:[%s11825_s2 + $0x228] sm:$0xff]  ;;  %v7246_v0 = vcombine.low %v102_v51, %v106_v52  ;;  %v158_v52 = vld [vmem:[%s11825_s2 + $0x380] sm:$0xff] }
 0x103   :  { %3714 = vmatprep.subr.bf16.mxu0 %v7191_v1  ;;  %3836 = vmatprep.subr.bf16.mxu1 %v7193_v2  ;;  %v7255_v2 = vcombine.high %v110_v60, %v114_v61  ;;  %v7257_v3 = vcombine.high %v111_v62, %v115_v63 }
 0x105   :  { %2230 = vmatmul.mubr.bf16.vlgmr.msra.gmra.mrb[16].mxu0 %v8809_v27  ;;  %2352 = vmatmul.mubr.bf16.vlgmr.msra.gmra.mrb[16].mxu1 %v8809_v27  ;;  %v71_v27 = vld [vmem:[%s11825_s2 + $0xc8] sm:$0xff] }
 0x106   :  { %3715 = vmatpush1.bf16.msra.mxu0 %v7190_v8  ;;  %3837 = vmatpush1.bf16.msra.mxu1 %v7192_v9  ;;  %v7217_v26 = vcombine.high %v71_v27, %v75_v22  ;;  %v7216_v32 = vcombine.low %v71_v27, %v75_v22  ;;  %v123_v8 = vld [vmem:[%s11825_s2 + $0x268] sm:$0xff]  ;;  %v7254_v9 = vcombine.low %v110_v60, %v114_v61  ;;  %v138_v27 = vld [vmem:[%s11825_s2 + $0x2e0] sm:$0xff] }
 0x107   :  { %3716 = vmatprep.subr.bf16.mxu0 %v7199_v11  ;;  %3838 = vmatprep.subr.bf16.mxu1 %v7201_v12  ;;  %v7256_v11 = vcombine.low %v111_v62, %v115_v63  ;;  %v7263_v12 = vcombine.high %v118_v4, %v122_v6  ;;  %v7265_v10 = vcombine.high %v119_v7, %v123_v8  ;;  %v166_v61 = vld [vmem:[%s11825_s2 + $0x3c0] sm:$0xff]  ;;  %v167_v63 = vld [vmem:[%s11825_s2 + $0x3c8] sm:$0xff] }
 0x108   :  { %2239 = vmatprep.mubr.bf16.mxu0 %v8820_v35  ;;  %2361 = vmatprep.mubr.bf16.mxu1 %v8820_v35  ;;  %v78_v35 = vld [vmem:[%s11825_s2 + $0x100] sm:$0xff] }
 0x109   :  { %v7223_v33 = vcombine.high %v78_v35, %v82_v28  ;;  %v7222_v37 = vcombine.low %v78_v35, %v82_v28  ;;  %v7270_v35 = vcombine.low %v126_v13, %v130_v14  ;;  %v170_v62 = vld [vmem:[%s11825_s2 + $0x3e0] sm:$0xff] }
 0x10a   :  { %3717 = vmatpush1.bf16.msra.mxu0 %v7198_v16  ;;  %3839 = vmatpush1.bf16.msra.mxu1 %v7200_v17  ;;  %v131_v16 = vld [vmem:[%s11825_s2 + $0x2a8] sm:$0xff]  ;;  %v7262_v17 = vcombine.low %v118_v4, %v122_v6  ;;  %v174_v6 = vld [vmem:[%s11825_s2 + $0x400] sm:$0xff] }
 0x10b   :  { %3718 = vmatprep.subr.bf16.mxu0 %v7207_v18  ;;  %3840 = vmatprep.subr.bf16.mxu1 %v7209_v20  ;;  %v7264_v18 = vcombine.low %v119_v7, %v123_v8  ;;  %v7271_v20 = vcombine.high %v126_v13, %v130_v14  ;;  %v7273_v19 = vcombine.high %v127_v15, %v131_v16  ;;  %v178_v7 = vld [vmem:[%s11825_s2 + $0x420] sm:$0xff]  ;;  %v175_v8 = vld [vmem:[%s11825_s2 + $0x408] sm:$0xff] }
 0x10c   :  { %v7272_v29 = vcombine.low %v127_v15, %v131_v16  ;;  %v182_v14 = vld [vmem:[%s11825_s2 + $0x440] sm:$0xff] }
 0x10d   :  { %2240 = vmatmul.mubr.bf16.gmra.mrb[20].mxu0 %v8840_v44  ;;  %2362 = vmatmul.mubr.bf16.gmra.mrb[20].mxu1 %v8840_v44  ;;  %v87_v44 = vld [vmem:[%s11825_s2 + $0x148] sm:$0xff]  ;;  %v186_v15 = vld [vmem:[%s11825_s2 + $0x460] sm:$0xff] }
 0x10e   :  { %3719 = vmatpush1.bf16.msra.mxu0 %v7206_v23  ;;  %3841 = vmatpush1.bf16.msra.mxu1 %v7208_v24  ;;  %v7233_v41 = vcombine.high %v87_v44, %v91_v38  ;;  %v7232_v47 = vcombine.low %v87_v44, %v91_v38  ;;  %v135_v23 = vld [vmem:[%s11825_s2 + $0x2c8] sm:$0xff]  ;;  %v9456_v16 = vld [vmem:[%s11824_s0] ss:$16 sps:$4 sm:$0xff]  }
 0x10f   :  { %3720 = vmatprep.subr.bf16.mxu0 %v7215_v25  ;;  %3842 = vmatprep.subr.bf16.mxu1 %v7217_v26  ;;  %v139_v24 = vld [vmem:[%s11825_s2 + $0x2e8] sm:$0xff] }
 0x110   :  { %2249 = vmatprep.mubr.bf16.mxu0 %v8858_v58  ;;  %2371 = vmatprep.mubr.bf16.mxu1 %v8858_v58  ;;  %v94_v58 = vld [vmem:[%s11825_s2 + $0x180] sm:$0xff]  ;;  %v143_v38 = vld [vmem:[%s11825_s2 + $0x308] sm:$0xff] }
 0x111   :  { %v7239_v48 = vcombine.high %v94_v58, %v98_v42  ;;  %v7238_v57 = vcombine.low %v94_v58, %v98_v42  ;;  %v150_v42 = vld [vmem:[%s11825_s2 + $0x340] sm:$0xff] }
 0x112   :  { %3721 = vmatpush1.bf16.msra.mxu0 %v7214_v31  ;;  %3843 = vmatpush1.bf16.msra.mxu1 %v7216_v32  ;;  %v7279_v31 = vcombine.high %v134_v21, %v138_v27 }
 0x113   :  { %3722 = vmatprep.subr.bf16.mxu0 %v7223_v33  ;;  %3844 = vmatprep.subr.bf16.mxu1 %v7225_v56  ;;  %v7281_v56 = vcombine.high %v135_v23, %v139_v24 }
 0x115   :  { %2250 = vmatmul.mubr.bf16.gmra.mrb[28].mxu0 %v8882_v5  ;;  %2372 = vmatmul.mubr.bf16.gmra.mrb[28].mxu1 %v8882_v5  ;;  %v103_v5 = vld [vmem:[%s11825_s2 + $0x1c8] sm:$0xff] }
 0x116   :  { %3723 = vmatpush1.bf16.msra.mxu0 %v7222_v37  ;;  %3845 = vmatpush1.bf16.msra.mxu1 %v7224_v39  ;;  %v7249_v59 = vcombine.high %v103_v5, %v107_v53  ;;  %v7248_v1 = vcombine.low %v103_v5, %v107_v53  ;;  %v147_v37 = vld [vmem:[%s11825_s2 + $0x328] sm:$0xff]  ;;  %v7278_v39 = vcombine.low %v134_v21, %v138_v27  ;;  %v162_v5 = vld [vmem:[%s11825_s2 + $0x3a0] sm:$0xff] }
 0x117   :  { %3724 = vmatprep.subr.bf16.mxu0 %v7231_v40  ;;  %3846 = vmatprep.subr.bf16.mxu1 %v7233_v41  ;;  %v7280_v40 = vcombine.low %v135_v23, %v139_v24  ;;  %v7287_v41 = vcombine.high %v142_v34, %v146_v36  ;;  %v7289_v58 = vcombine.high %v143_v38, %v147_v37  ;;  %v159_v53 = vld [vmem:[%s11825_s2 + $0x388] sm:$0xff]  ;;  %v9467_v23 = vld [vmem:[%s11824_s0 + $0x24] ss:$16 sps:$4 sm:$0xff]  }
 0x118   :  { %3746 = vmatprep.mubr.bf16.mxu0 %v9307_v43  ;;  %3868 = vmatprep.mubr.bf16.mxu1 %v9307_v43  ;;  %v7327_v21 = vcombine.high %v182_v14, %v186_v15  ;;  %v190_v24 = vld [vmem:[%s11825_s2 + $0x480] sm:$0xff] }
 0x11a   :  { %3725 = vmatpush1.bf16.msra.mxu0 %v7230_v46  ;;  %3847 = vmatpush1.bf16.msra.mxu1 %v7232_v47  ;;  %v155_v46 = vld [vmem:[%s11825_s2 + $0x368] sm:$0xff]  ;;  %v7286_v47 = vcombine.low %v142_v34, %v146_v36  ;;  %v198_v36 = vld [vmem:[%s11825_s2 + $0x4c0] sm:$0xff] }
 0x11b   :  { %3726 = vmatprep.subr.bf16.mxu0 %v7239_v48  ;;  %3848 = vmatprep.subr.bf16.mxu1 %v7241_v50  ;;  %v7288_v48 = vcombine.low %v143_v38, %v147_v37  ;;  %v7295_v50 = vcombine.high %v150_v42, %v154_v45  ;;  %v7297_v51 = vcombine.high %v151_v49, %v155_v46  ;;  %v199_v38 = vld [vmem:[%s11825_s2 + $0x4c8] sm:$0xff] }
 0x11c   :  { %v203_v37 = vld [vmem:[%s11825_s2 + $0x4e8] sm:$0xff] }
 0x11e   :  { %3727 = vmatpush1.bf16.msra.mxu0 %v7238_v57  ;;  %3849 = vmatpush1.bf16.msra.mxu1 %v7240_v54  ;;  %v163_v57 = vld [vmem:[%s11825_s2 + $0x3a8] sm:$0xff]  ;;  %v7294_v54 = vcombine.low %v150_v42, %v154_v45  ;;  %v7345_v42 = vcombine.high %v199_v38, %v203_v37 }
 0x11f   :  { %3728 = vmatprep.subr.bf16.mxu0 %v7247_v55  ;;  %3850 = vmatprep.subr.bf16.mxu1 %v7249_v59  ;;  %v7296_v55 = vcombine.low %v151_v49, %v155_v46  ;;  %v7303_v59 = vcombine.high %v158_v52, %v162_v5  ;;  %v7305_v60 = vcombine.high %v159_v53, %v163_v57  ;;  %v206_v49 = vld [vmem:[%s11825_s2 + $0x500] sm:$0xff] }
 0x120   :  { %v210_v46 = vld [vmem:[%s11825_s2 + $0x520] sm:$0xff] }
 0x122   :  { %3729 = vmatpush1.bf16.msra.mxu0 %v7246_v0  ;;  %3851 = vmatpush1.bf16.msra.mxu1 %v7248_v1  ;;  %v171_v0 = vld [vmem:[%s11825_s2 + $0x3e8] sm:$0xff]  ;;  %v7302_v1 = vcombine.low %v158_v52, %v162_v5  ;;  %v7351_v52 = vcombine.high %v206_v49, %v210_v46 }
 0x123   :  { %3730 = vmatprep.subr.bf16.mxu0 %v7255_v2  ;;  %3852 = vmatprep.subr.bf16.mxu1 %v7257_v3  ;;  %v7304_v2 = vcombine.low %v159_v53, %v163_v57  ;;  %v7311_v3 = vcombine.high %v166_v61, %v170_v62  ;;  %v7313_v4 = vcombine.high %v167_v63, %v171_v0  ;;  %v214_v53 = vld [vmem:[%s11825_s2 + $0x540] sm:$0xff] }
 0x124   :  { %v218_v57 = vld [vmem:[%s11825_s2 + $0x560] sm:$0xff] }
 0x126   :  { %3731 = vmatpush1.bf16.msra.mxu0 %v7254_v9  ;;  %3853 = vmatpush1.bf16.msra.mxu1 %v7256_v11  ;;  %v179_v9 = vld [vmem:[%s11825_s2 + $0x428] sm:$0xff]  ;;  %v7310_v11 = vcombine.low %v166_v61, %v170_v62  ;;  %v7359_v62 = vcombine.high %v214_v53, %v218_v57 }
 0x127   :  { %3732 = vmatprep.subr.bf16.mxu0 %v7263_v12  ;;  %3854 = vmatprep.subr.bf16.mxu1 %v7265_v10  ;;  %v7312_v12 = vcombine.low %v167_v63, %v171_v0  ;;  %v7319_v10 = vcombine.high %v174_v6, %v178_v7  ;;  %v7321_v13 = vcombine.high %v175_v8, %v179_v9  ;;  %v222_v0 = vld [vmem:[%s11825_s2 + $0x580] sm:$0xff] }
 0x128   :  { %v9373_v22 = vpop.f32.mrb[8].mxu0  ;;  %v9383_v26 = vpop.f32.mrb[8].mxu1 }
 0x129   :  { %v9381_v25 = vpop.f32.mrb[9].mxu0  ;;  %v9385_v30 = vpop.f32.mrb[9].mxu1 }
 0x12a   :  { %3733 = vmatpush1.bf16.msra.mxu0 %v7262_v17  ;;  %v1950_v28 = vpop.f32.mrb[10].mxu0  ;;  %3855 = vmatpush1.bf16.msra.mxu1 %v7264_v18  ;;  %v2072_v33 = vpop.f32.mrb[10].mxu1  ;;  %v183_v17 = vld [vmem:[%s11825_s2 + $0x448] sm:$0xff] }
 0x12b   :  { %3734 = vmatprep.subr.bf16.mxu0 %v7271_v20  ;;  %v1951_v32 = vpop.f32.mrb[11].mxu0  ;;  %3856 = vmatprep.subr.bf16.mxu1 %v7273_v19  ;;  %v2073_v44 = vpop.f32.mrb[11].mxu1  ;;  %v187_v18 = vld [vmem:[%s11825_s2 + $0x468] sm:$0xff]  ;;  %v7318_v20 = vcombine.low %v174_v6, %v178_v7  ;;  %v7320_v19 = vcombine.low %v175_v8, %v179_v9  ;;  %v7358_v6 = vcombine.low %v214_v53, %v218_v57 }
 0x12c   :  { %v7329_v27 = vcombine.high %v183_v17, %v187_v18  ;;  %v191_v28 = vld [vmem:[%s11825_s2 + $0x488] sm:$0xff]  ;;  %v7328_v32 = vcombine.low %v183_v17, %v187_v18  ;;  %v202_v44 = vld [vmem:[%s11825_s2 + $0x4e0] sm:$0xff] }
 0x12d   :  { %v263_v57 = vld [vmem:[%s11825_s2 + $0x6c8] sm:$0xff] }
 0x12e   :  { %3735 = vmatpush1.bf16.msra.mxu0 %v7270_v35  ;;  %3857 = vmatpush1.bf16.msra.mxu1 %v7272_v29  ;;  %v194_v35 = vld [vmem:[%s11825_s2 + $0x4a0] sm:$0xff]  ;;  %v195_v29 = vld [vmem:[%s11825_s2 + $0x4a8] sm:$0xff] }
 0x12f   :  { %3736 = vmatprep.subr.bf16.mxu0 %v7279_v31  ;;  %3858 = vmatprep.subr.bf16.mxu1 %v7281_v56  ;;  %v7326_v31 = vcombine.low %v182_v14, %v186_v15  ;;  %v7335_v33 = vcombine.high %v190_v24, %v194_v35  ;;  %v9487_v56 = vld [vmem:[%s11824_s0 + $0x20] ss:$16 sps:$4 sm:$0xff]   ;;  %v7337_v34 = vcombine.high %v191_v28, %v195_v29 }
 0x132   :  { %3737 = vmatpush1.bf16.msra.mxu0 %v7278_v39  ;;  %3859 = vmatpush1.bf16.msra.mxu1 %v7280_v40  ;;  %v34_v39 = vld [vmem:[%s11824_s0 + $0x40] sm:$0x33]  ;;  %v7334_v40 = vcombine.low %v190_v24, %v194_v35 }
 0x133   :  { %3738 = vmatprep.subr.bf16.mxu0 %v7287_v41  ;;  %3860 = vmatprep.subr.bf16.mxu1 %v7289_v58  ;;  %v7336_v41 = vcombine.low %v191_v28, %v195_v29  ;;  %v7343_v58 = vcombine.high %v198_v36, %v202_v44  ;;  %v9505_v45 = vcombine.high %v34_v39, %v34_v39 }
 0x136   :  { %3739 = vmatpush1.bf16.msra.mxu0 %v7286_v47  ;;  %3861 = vmatpush1.bf16.msra.mxu1 %v7288_v48  ;;  %v207_v47 = vld [vmem:[%s11825_s2 + $0x508] sm:$0xff] }
 0x137   :  { %3740 = vmatprep.subr.bf16.mxu0 %v7295_v50  ;;  %3862 = vmatprep.subr.bf16.mxu1 %v7297_v51  ;;  %v211_v48 = vld [vmem:[%s11825_s2 + $0x528] sm:$0xff]  ;;  %v7342_v50 = vcombine.low %v198_v36, %v202_v44  ;;  %v7344_v51 = vcombine.low %v199_v38, %v203_v37 }
 0x138   :  { %v7353_v5 = vcombine.high %v207_v47, %v211_v48  ;;  %v7352_v61 = vcombine.low %v207_v47, %v211_v48 }
 0x13a   :  { %3741 = vmatpush1.bf16.msra.mxu0 %v7294_v54  ;;  %3863 = vmatpush1.bf16.msra.mxu1 %v7296_v55  ;;  %v9529_v54 = vcombine.low %v34_v39, %v34_v39  ;;  %v215_v55 = vld [vmem:[%s11825_s2 + $0x548] sm:$0xff]  ;;  %v254_v39 = vld [vmem:[%s11825_s2 + $0x680] sm:$0xff] }
 0x13b   :  { %3742 = vmatprep.subr.bf16.mxu0 %v7303_v59  ;;  %3864 = vmatprep.subr.bf16.mxu1 %v7305_v60  ;;  %v219_v59 = vld [vmem:[%s11825_s2 + $0x568] sm:$0xff]  ;;  %v7350_v60 = vcombine.low %v206_v49, %v210_v46 }
 0x13c   :  { %v7361_v63 = vcombine.high %v215_v55, %v219_v59  ;;  %v7360_v7 = vcombine.low %v215_v55, %v219_v59  ;;  %v267_v55 = vld [vmem:[%s11825_s2 + $0x6e8] sm:$0xff] }
 0x13e   :  { %3743 = vmatpush1.bf16.msra.mxu0 %v7302_v1  ;;  %3865 = vmatpush1.bf16.msra.mxu1 %v7304_v2  ;;  %v226_v1 = vld [vmem:[%s11825_s2 + $0x5a0] sm:$0xff]  ;;  %v9546_v2 = vld [vmem:[%s11824_s0 + $0xc] ss:$16 sps:$4 sm:$0xff]  }
 0x13f   :  { %3744 = vmatprep.subr.bf16.mxu0 %v7311_v3  ;;  %3866 = vmatprep.subr.bf16.mxu1 %v7313_v4  ;;  %v223_v3 = vld [vmem:[%s11825_s2 + $0x588] sm:$0xff]  ;;  %v7367_v8 = vcombine.high %v222_v0, %v226_v1  ;;  %v7366_v14 = vcombine.low %v222_v0, %v226_v1 }
 0x140   :  { %v227_v4 = vld [vmem:[%s11825_s2 + $0x5a8] sm:$0xff] }
 0x141   :  { %v7369_v9 = vcombine.high %v223_v3, %v227_v4  ;;  %v7368_v15 = vcombine.low %v223_v3, %v227_v4 }
 0x142   :  { %3745 = vmatpush1.bf16.msra.mxu0 %v7310_v11  ;;  %3867 = vmatpush1.bf16.msra.mxu1 %v7312_v12  ;;  %v230_v11 = vld [vmem:[%s11825_s2 + $0x5c0] sm:$0xff] }
 0x143   :  { %3775 = vmatprep.subr.bf16.mxu0 %v7319_v10  ;;  %3897 = vmatprep.subr.bf16.mxu1 %v7321_v13  ;;  %v234_v12 = vld [vmem:[%s11825_s2 + $0x5e0] sm:$0xff]  ;;  %v231_v10 = vld [vmem:[%s11825_s2 + $0x5c8] sm:$0xff] }
 0x144   :  { %v235_v13 = vld [vmem:[%s11825_s2 + $0x5e8] sm:$0xff]  ;;  %v7375_v17 = vcombine.high %v230_v11, %v234_v12  ;;  %v7374_v24 = vcombine.low %v230_v11, %v234_v12  ;;  %v7408_v11 = vcombine.low %v263_v57, %v267_v55 }
 0x145   :  { %3747 = vmatmul.mubr.bf16.vlgmr.msra.gmra.mrb[0].mxu0 %v9456_v16  ;;  %3869 = vmatmul.mubr.bf16.vlgmr.msra.gmra.mrb[0].mxu1 %v9456_v16  ;;  %v7377_v18 = vcombine.high %v231_v10, %v235_v13  ;;  %v7376_v35 = vcombine.low %v231_v10, %v235_v13  ;;  %v278_v13 = vld [vmem:[%s11825_s2 + $0x740] sm:$0xff] }
 0x146   :  { %3776 = vmatpush1.bf16.msra.mxu0 %v7318_v20  ;;  %3898 = vmatpush1.bf16.msra.mxu1 %v7320_v19  ;;  %v238_v20 = vld [vmem:[%s11825_s2 + $0x600] sm:$0xff] }
 0x147   :  { %3777 = vmatprep.subr.bf16.mxu0 %v7327_v21  ;;  %3899 = vmatprep.subr.bf16.mxu1 %v7329_v27  ;;  %v242_v19 = vld [vmem:[%s11825_s2 + $0x620] sm:$0xff]  ;;  %v239_v21 = vld [vmem:[%s11825_s2 + $0x608] sm:$0xff] }
 0x148   :  { %3756 = vmatprep.mubr.bf16.mxu0 %v9467_v23  ;;  %3878 = vmatprep.mubr.bf16.mxu1 %v9467_v23  ;;  %v243_v27 = vld [vmem:[%s11825_s2 + $0x628] sm:$0xff]  ;;  %v7383_v28 = vcombine.high %v238_v20, %v242_v19  ;;  %v7382_v36 = vcombine.low %v238_v20, %v242_v19 }
 0x149   :  { %v7385_v29 = vcombine.high %v239_v21, %v243_v27  ;;  %v7384_v44 = vcombine.low %v239_v21, %v243_v27  ;;  %v286_v27 = vld [vmem:[%s11825_s2 + $0x780] sm:$0xff] }
 0x14a   :  { %3778 = vmatpush1.bf16.msra.mxu0 %v7326_v31  ;;  %3900 = vmatpush1.bf16.msra.mxu1 %v7328_v32  ;;  %v246_v31 = vld [vmem:[%s11825_s2 + $0x640] sm:$0xff] }
 0x14b   :  { %3779 = vmatprep.subr.bf16.mxu0 %v7335_v33  ;;  %3901 = vmatprep.subr.bf16.mxu1 %v7337_v34  ;;  %v250_v32 = vld [vmem:[%s11825_s2 + $0x660] sm:$0xff]  ;;  %v247_v33 = vld [vmem:[%s11825_s2 + $0x648] sm:$0xff] }
 0x14c   :  { %v251_v34 = vld [vmem:[%s11825_s2 + $0x668] sm:$0xff]  ;;  %v7391_v38 = vcombine.high %v246_v31, %v250_v32 }
 0x14d   :  { %3757 = vmatmul.mubr.bf16.gmra.mrb[4].mxu0 %v9487_v56  ;;  %3879 = vmatmul.mubr.bf16.gmra.mrb[4].mxu1 %v9487_v56  ;;  %v7393_v37 = vcombine.high %v247_v33, %v251_v34  ;;  %v7392_v49 = vcombine.low %v247_v33, %v251_v34  ;;  %v294_v34 = vld [vmem:[%s11825_s2 + $0x7c0] sm:$0xff] }
 0x14e   :  { %3780 = vmatpush1.bf16.msra.mxu0 %v7334_v40  ;;  %3902 = vmatpush1.bf16.msra.mxu1 %v7336_v41  ;;  %v258_v40 = vld [vmem:[%s11825_s2 + $0x6a0] sm:$0xff]  ;;  %v255_v41 = vld [vmem:[%s11825_s2 + $0x688] sm:$0xff] }
 0x14f   :  { %3781 = vmatprep.subr.bf16.mxu0 %v7343_v58  ;;  %3903 = vmatprep.subr.bf16.mxu1 %v7345_v42  ;;  %v259_v58 = vld [vmem:[%s11825_s2 + $0x6a8] sm:$0xff]  ;;  %v7390_v42 = vcombine.low %v246_v31, %v250_v32  ;;  %v7399_v46 = vcombine.high %v254_v39, %v258_v40 }
 0x150   :  { %3766 = vmatprep.mubr.bf16.mxu0 %v9505_v45  ;;  %3888 = vmatprep.mubr.bf16.mxu1 %v9505_v45  ;;  %v7401_v48 = vcombine.high %v255_v41, %v259_v58  ;;  %v7400_v0 = vcombine.low %v255_v41, %v259_v58  ;;  %v48_v58 = vld [vmem:[%s11825_s2 + $0x10] sm:$0xff] }
 0x152   :  { %3782 = vmatpush1.bf16.msra.mxu0 %v7342_v50  ;;  %3904 = vmatpush1.bf16.msra.mxu1 %v7344_v51  ;;  %v262_v50 = vld [vmem:[%s11825_s2 + $0x6c0] sm:$0xff] }
 0x153   :  { %3783 = vmatprep.subr.bf16.mxu0 %v7351_v52  ;;  %3905 = vmatprep.subr.bf16.mxu1 %v7353_v5  ;;  %v266_v51 = vld [vmem:[%s11825_s2 + $0x6e0] sm:$0xff] }
 0x154   :  { %v7407_v1 = vcombine.high %v262_v50, %v266_v51 }
 0x155   :  { %3767 = vmatmul.mubr.bf16.gmra.mrb[32].mxu0 %v9529_v54  ;;  %3889 = vmatmul.mubr.bf16.gmra.mrb[32].mxu1 %v9529_v54 }
 0x156   :  { %3784 = vmatpush1.bf16.msra.mxu0 %v7350_v60  ;;  %3906 = vmatpush1.bf16.msra.mxu1 %v7352_v61 }
 0x157   :  { %3785 = vmatprep.subr.bf16.mxu0 %v7359_v62  ;;  %3907 = vmatprep.subr.bf16.mxu1 %v7361_v63 }
 0x158   :  { %3807 = vmatprep.mubr.bf16.mxu0 %v9546_v2  ;;  %3929 = vmatprep.mubr.bf16.mxu1 %v9546_v2 }
 0x15a   :  { %3786 = vmatpush1.bf16.msra.mxu0 %v7358_v6  ;;  %3908 = vmatpush1.bf16.msra.mxu1 %v7360_v7  ;;  %v7409_v6 = vcombine.high %v263_v57, %v267_v55  ;;  %v9699_v57 = vld [vmem:[%s11824_s0 + $0x8] ss:$16 sps:$4 sm:$0xff]  }
 0x15b   :  { %3787 = vmatprep.subr.bf16.mxu0 %v7367_v8  ;;  %3909 = vmatprep.subr.bf16.mxu1 %v7369_v9  ;;  %v275_v8 = vld [vmem:[%s11825_s2 + $0x728] sm:$0xff]  ;;  %v7406_v9 = vcombine.low %v262_v50, %v266_v51  ;;  %v57_v55 = vld [vmem:[%s11825_s2 + $0x58] sm:$0xff] }
 0x15e   :  { %3788 = vmatpush1.bf16.msra.mxu0 %v7366_v14  ;;  %3910 = vmatpush1.bf16.msra.mxu1 %v7368_v15  ;;  %v282_v14 = vld [vmem:[%s11825_s2 + $0x760] sm:$0xff]  ;;  %v279_v15 = vld [vmem:[%s11825_s2 + $0x748] sm:$0xff] }
 0x15f   :  { %3789 = vmatprep.subr.bf16.mxu0 %v7375_v17  ;;  %3911 = vmatprep.subr.bf16.mxu1 %v7377_v18  ;;  %v283_v17 = vld [vmem:[%s11825_s2 + $0x768] sm:$0xff]  ;;  %v7423_v19 = vcombine.high %v278_v13, %v282_v14 }
 0x160   :  { %v7425_v21 = vcombine.high %v279_v15, %v283_v17  ;;  %v7424_v31 = vcombine.low %v279_v15, %v283_v17  ;;  %v35_v15 = vld [vmem:[%s11824_s0 + $0x48] sm:$0x33] }
 0x162   :  { %3790 = vmatpush1.bf16.msra.mxu0 %v7374_v24  ;;  %3912 = vmatpush1.bf16.msra.mxu1 %v7376_v35  ;;  %v290_v24 = vld [vmem:[%s11825_s2 + $0x7a0] sm:$0xff]  ;;  %v287_v35 = vld [vmem:[%s11825_s2 + $0x788] sm:$0xff] }
 0x163   :  { %3791 = vmatprep.subr.bf16.mxu0 %v7383_v28  ;;  %3913 = vmatprep.subr.bf16.mxu1 %v7385_v29  ;;  %v291_v28 = vld [vmem:[%s11825_s2 + $0x7a8] sm:$0xff]  ;;  %v7422_v29 = vcombine.low %v278_v13, %v282_v14  ;;  %v7431_v32 = vcombine.high %v286_v27, %v290_v24  ;;  %v73_v13 = vld [vmem:[%s11825_s2 + $0xd8] sm:$0xff] }
 0x164   :  { %v7433_v33 = vcombine.high %v287_v35, %v291_v28  ;;  %v77_v14 = vld [vmem:[%s11825_s2 + $0xf8] sm:$0xff] }
 0x166   :  { %3792 = vmatpush1.bf16.msra.mxu0 %v7382_v36  ;;  %3914 = vmatpush1.bf16.msra.mxu1 %v7384_v44  ;;  %v298_v36 = vld [vmem:[%s11825_s2 + $0x7e0] sm:$0xff]  ;;  %v295_v44 = vld [vmem:[%s11825_s2 + $0x7c8] sm:$0xff] }
 0x167   :  { %3793 = vmatprep.subr.bf16.mxu0 %v7391_v38  ;;  %3915 = vmatprep.subr.bf16.mxu1 %v7393_v37  ;;  %v299_v38 = vld [vmem:[%s11825_s2 + $0x7e8] sm:$0xff]  ;;  %v7430_v37 = vcombine.low %v286_v27, %v290_v24  ;;  %v80_v27 = vld [vmem:[%s11825_s2 + $0x110] sm:$0xff] }
 0x168   :  { %v2007_v47 = vpop.f32.mrb[12].mxu0  ;;  %v2129_v5 = vpop.f32.mrb[12].mxu1  ;;  %v7441_v41 = vcombine.high %v295_v44, %v299_v38  ;;  %v84_v24 = vld [vmem:[%s11825_s2 + $0x130] sm:$0xff] }
 0x169   :  { %v9613_v52 = vadd.f32 %v2007_v47, %v9373_v22  ;;  %v2009_v53 = vpop.f32.mrb[13].mxu0  ;;  %v9622_v59 = vadd.f32 %v2129_v5, %v9383_v26  ;;  %v2131_v61 = vpop.f32.mrb[13].mxu1  ;;  %v7398_v22 = vcombine.low %v254_v39, %v258_v40  ;;  %v274_v26 = vld [vmem:[%s11825_s2 + $0x720] sm:$0xff]  ;;  %v7432_v39 = vcombine.low %v287_v35, %v291_v28  ;;  %v56_v5 = vld [vmem:[%s11825_s2 + $0x50] sm:$0xff]  ;;  %v81_v35 = vld [vmem:[%s11825_s2 + $0x118] sm:$0xff] }
 0x16a   :  { %v9625_v60 = vadd.f32 %v2009_v53, %v9381_v25  ;;  %3794 = vmatpush1.bf16.msra.mxu0 %v7390_v42  ;;  %v2011_v62 = vpop.f32.mrb[14].mxu0  ;;  %v9628_v63 = vadd.f32 %v2131_v61, %v9385_v30  ;;  %3916 = vmatpush1.bf16.msra.mxu1 %v7392_v49  ;;  %v2133_v4 = vpop.f32.mrb[14].mxu1  ;;  %v270_v25 = vld [vmem:[%s11825_s2 + $0x700] sm:$0xff]  ;;  %v271_v30 = vld [vmem:[%s11825_s2 + $0x708] sm:$0xff]  ;;  %v7439_v40 = vcombine.high %v294_v34, %v298_v36  ;;  %v52_v42 = vld [vmem:[%s11825_s2 + $0x30] sm:$0xff] }
 0x16b   :  { %3795 = vmatprep.subr.bf16.mxu0 %v7399_v46  ;;  %v2012_v3 = vpop.f32.mrb[15].mxu0  ;;  %3917 = vmatprep.subr.bf16.mxu1 %v7401_v48  ;;  %v2134_v7 = vpop.f32.mrb[15].mxu1  ;;  %v7415_v12 = vcombine.high %v270_v25, %v274_v26  ;;  %v7417_v10 = vcombine.high %v271_v30, %v275_v8  ;;  %v7414_v18 = vcombine.low %v270_v25, %v274_v26  ;;  %v49_v49 = vld [vmem:[%s11825_s2 + $0x18] sm:$0xff]  ;;  %v60_v53 = vld [vmem:[%s11825_s2 + $0x70] sm:$0xff] }
 0x16c   :  { %v7416_v20 = vcombine.low %v271_v30, %v275_v8  ;;  %v53_v46 = vld [vmem:[%s11825_s2 + $0x38] sm:$0xff]  ;;  %v7438_v47 = vcombine.low %v294_v34, %v298_v36  ;;  %v7440_v48 = vcombine.low %v295_v44, %v299_v38  ;;  %v7195_v50 = vcombine.high %v48_v58, %v52_v42  ;;  %v64_v4 = vld [vmem:[%s11825_s2 + $0x90] sm:$0xff] }
 0x16d   :  { %v7197_v51 = vcombine.high %v49_v49, %v53_v46  ;;  %v61_v61 = vld [vmem:[%s11825_s2 + $0x78] sm:$0xff]  ;;  %v7196_v62 = vcombine.low %v49_v49, %v53_v46  ;;  %v7202_v7 = vcombine.low %v56_v5, %v60_v53  ;;  %v88_v34 = vld [vmem:[%s11825_s2 + $0x150] sm:$0xff]  ;;  %v9772_v44 = vcombine.low %v35_v15, %v35_v15 }
 0x16e   :  { %3796 = vmatpush1.bf16.msra.mxu0 %v7398_v22  ;;  %3918 = vmatpush1.bf16.msra.mxu1 %v7400_v0  ;;  %v7194_v22 = vcombine.low %v48_v58, %v52_v42  ;;  %v7203_v0 = vcombine.high %v56_v5, %v60_v53  ;;  %v9710_v3 = vld [vmem:[%s11824_s0 + $0x2c] ss:$16 sps:$4 sm:$0xff]   ;;  %v7204_v30 = vcombine.low %v57_v55, %v61_v61  ;;  %v92_v36 = vld [vmem:[%s11825_s2 + $0x170] sm:$0xff] }
 0x16f   :  { %3797 = vmatprep.subr.bf16.mxu0 %v7407_v1  ;;  %3919 = vmatprep.subr.bf16.mxu1 %v7409_v6  ;;  %v7205_v1 = vcombine.high %v57_v55, %v61_v61  ;;  %v68_v6 = vld [vmem:[%s11825_s2 + $0xb0] sm:$0xff]  ;;  %v65_v25 = vld [vmem:[%s11825_s2 + $0x98] sm:$0xff] }
 0x170   :  { %v69_v26 = vld [vmem:[%s11825_s2 + $0xb8] sm:$0xff]  ;;  %v7211_v8 = vcombine.high %v64_v4, %v68_v6  ;;  %v7210_v17 = vcombine.low %v64_v4, %v68_v6  ;;  %v96_v42 = vld [vmem:[%s11825_s2 + $0x190] sm:$0xff] }
 0x171   :  { %v85_v28 = vld [vmem:[%s11825_s2 + $0x138] sm:$0xff]  ;;  %v100_v49 = vld [vmem:[%s11825_s2 + $0x1b0] sm:$0xff] }
 0x172   :  { %3798 = vmatpush1.bf16.msra.mxu0 %v7406_v9  ;;  %3920 = vmatpush1.bf16.msra.mxu1 %v7408_v11  ;;  %v9730_v9 = vld [vmem:[%s11824_s0 + $0x28] ss:$16 sps:$4 sm:$0xff]   ;;  %v7213_v11 = vcombine.high %v65_v25, %v69_v26  ;;  %v104_v53 = vld [vmem:[%s11825_s2 + $0x1d0] sm:$0xff] }
 0x173   :  { %3799 = vmatprep.subr.bf16.mxu0 %v7415_v12  ;;  %3921 = vmatprep.subr.bf16.mxu1 %v7417_v10  ;;  %v72_v12 = vld [vmem:[%s11825_s2 + $0xd0] sm:$0xff]  ;;  %v89_v38 = vld [vmem:[%s11825_s2 + $0x158] sm:$0xff] }
 0x174   :  { %v76_v10 = vld [vmem:[%s11825_s2 + $0xf0] sm:$0xff]  ;;  %v97_v46 = vld [vmem:[%s11825_s2 + $0x198] sm:$0xff] }
 0x175   :  { %v108_v55 = vld [vmem:[%s11825_s2 + $0x1f0] sm:$0xff]  ;;  %v105_v61 = vld [vmem:[%s11825_s2 + $0x1d8] sm:$0xff] }
 0x176   :  { %3800 = vmatpush1.bf16.msra.mxu0 %v7414_v18  ;;  %3922 = vmatpush1.bf16.msra.mxu1 %v7416_v20  ;;  %v7212_v18 = vcombine.low %v65_v25, %v69_v26  ;;  %v7219_v20 = vcombine.high %v72_v12, %v76_v10  ;;  %v112_v6 = vld [vmem:[%s11825_s2 + $0x210] sm:$0xff]  ;;  %v117_v26 = vld [vmem:[%s11825_s2 + $0x238] sm:$0xff] }
 0x177   :  { %3801 = vmatprep.subr.bf16.mxu0 %v7423_v19  ;;  %3923 = vmatprep.subr.bf16.mxu1 %v7425_v21  ;;  %v7221_v19 = vcombine.high %v73_v13, %v77_v14  ;;  %v9748_v21 = vcombine.high %v35_v15, %v35_v15  ;;  %v116_v25 = vld [vmem:[%s11825_s2 + $0x230] sm:$0xff] }
 0x178   :  { %v7258_v15 = vcombine.low %v112_v6, %v116_v25 }
 0x17a   :  { %3802 = vmatpush1.bf16.msra.mxu0 %v7422_v29  ;;  %3924 = vmatpush1.bf16.msra.mxu1 %v7424_v31  ;;  %v7218_v29 = vcombine.low %v72_v12, %v76_v10  ;;  %v7220_v31 = vcombine.low %v73_v13, %v77_v14  ;;  %v120_v12 = vld [vmem:[%s11825_s2 + $0x250] sm:$0xff]  ;;  %v121_v13 = vld [vmem:[%s11825_s2 + $0x258] sm:$0xff] }
 0x17b   :  { %3803 = vmatprep.subr.bf16.mxu0 %v7431_v32  ;;  %3925 = vmatprep.subr.bf16.mxu1 %v7433_v33  ;;  %v7227_v32 = vcombine.high %v80_v27, %v84_v24  ;;  %v7229_v33 = vcombine.high %v81_v35, %v85_v28  ;;  %v124_v10 = vld [vmem:[%s11825_s2 + $0x270] sm:$0xff]  ;;  %v125_v14 = vld [vmem:[%s11825_s2 + $0x278] sm:$0xff] }
 0x17e   :  { %3804 = vmatpush1.bf16.msra.mxu0 %v7430_v37  ;;  %3926 = vmatpush1.bf16.msra.mxu1 %v7432_v39  ;;  %v93_v37 = vld [vmem:[%s11825_s2 + $0x178] sm:$0xff]  ;;  %v7226_v39 = vcombine.low %v80_v27, %v84_v24  ;;  %v132_v27 = vld [vmem:[%s11825_s2 + $0x2b0] sm:$0xff] }
 0x17f   :  { %3805 = vmatprep.subr.bf16.mxu0 %v7439_v40  ;;  %3927 = vmatprep.subr.bf16.mxu1 %v7441_v41  ;;  %v7228_v40 = vcombine.low %v81_v35, %v85_v28  ;;  %v7235_v41 = vcombine.high %v88_v34, %v92_v36  ;;  %v7237_v58 = vcombine.high %v89_v38, %v93_v37  ;;  %v129_v24 = vld [vmem:[%s11825_s2 + $0x298] sm:$0xff] }
 0x180   :  { %v133_v35 = vld [vmem:[%s11825_s2 + $0x2b8] sm:$0xff]  ;;  %v7266_v28 = vcombine.low %v120_v12, %v124_v10 }
 0x182   :  { %3806 = vmatpush1.bf16.msra.mxu0 %v7438_v47  ;;  %3928 = vmatpush1.bf16.msra.mxu1 %v7440_v48  ;;  %v101_v47 = vld [vmem:[%s11825_s2 + $0x1b8] sm:$0xff]  ;;  %v7234_v48 = vcombine.low %v88_v34, %v92_v36  ;;  %v140_v34 = vld [vmem:[%s11825_s2 + $0x2f0] sm:$0xff] }
 0x183   :  { %3958 = vmatprep.subr.bf16.mxu0 %v7195_v50  ;;  %4080 = vmatprep.subr.bf16.mxu1 %v7197_v51  ;;  %v7236_v50 = vcombine.low %v89_v38, %v93_v37  ;;  %v7243_v51 = vcombine.high %v96_v42, %v100_v49  ;;  %v7245_v5 = vcombine.high %v97_v46, %v101_v47  ;;  %v137_v38 = vld [vmem:[%s11825_s2 + $0x2d8] sm:$0xff] }
 0x184   :  { %v141_v37 = vld [vmem:[%s11825_s2 + $0x2f8] sm:$0xff] }
 0x185   :  { %3808 = vmatmul.mubr.bf16.vlgmr.msra.gmra.mrb[0].mxu0 %v9699_v57  ;;  %3930 = vmatmul.mubr.bf16.vlgmr.msra.gmra.mrb[0].mxu1 %v9699_v57 }
 0x186   :  { %3959 = vmatpush1.bf16.msra.mxu0 %v7194_v22  ;;  %4081 = vmatpush1.bf16.msra.mxu1 %v7196_v62  ;;  %v109_v22 = vld [vmem:[%s11825_s2 + $0x1f8] sm:$0xff]  ;;  %v7242_v62 = vcombine.low %v96_v42, %v100_v49  ;;  %v7276_v49 = vcombine.low %v129_v24, %v133_v35 }
 0x187   :  { %3960 = vmatprep.subr.bf16.mxu0 %v7203_v0  ;;  %4082 = vmatprep.subr.bf16.mxu1 %v7205_v1  ;;  %v7244_v0 = vcombine.low %v97_v46, %v101_v47  ;;  %v7251_v1 = vcombine.high %v104_v53, %v108_v55  ;;  %v7253_v4 = vcombine.high %v105_v61, %v109_v22 }
 0x188   :  { %3817 = vmatprep.mubr.bf16.mxu0 %v9710_v3  ;;  %3939 = vmatprep.mubr.bf16.mxu1 %v9710_v3 }
 0x18a   :  { %3961 = vmatpush1.bf16.msra.mxu0 %v7202_v7  ;;  %4083 = vmatpush1.bf16.msra.mxu1 %v7204_v30  ;;  %v7250_v7 = vcombine.low %v104_v53, %v108_v55  ;;  %v7252_v30 = vcombine.low %v105_v61, %v109_v22  ;;  %v145_v55 = vld [vmem:[%s11825_s2 + $0x318] sm:$0xff] }
 0x18b   :  { %3962 = vmatprep.subr.bf16.mxu0 %v7211_v8  ;;  %4084 = vmatprep.subr.bf16.mxu1 %v7213_v11  ;;  %v7259_v8 = vcombine.high %v112_v6, %v116_v25  ;;  %v149_v61 = vld [vmem:[%s11825_s2 + $0x338] sm:$0xff]  ;;  %v156_v6 = vld [vmem:[%s11825_s2 + $0x370] sm:$0xff] }
 0x18c   :  { %v153_v25 = vld [vmem:[%s11825_s2 + $0x358] sm:$0xff] }
 0x18d   :  { %3818 = vmatmul.mubr.bf16.gmra.mrb[4].mxu0 %v9730_v9  ;;  %3940 = vmatmul.mubr.bf16.gmra.mrb[4].mxu1 %v9730_v9 }
 0x18e   :  { %3963 = vmatpush1.bf16.msra.mxu0 %v7210_v17  ;;  %4085 = vmatpush1.bf16.msra.mxu1 %v7212_v18  ;;  %v7267_v18 = vcombine.high %v120_v12, %v124_v10  ;;  %v164_v12 = vld [vmem:[%s11825_s2 + $0x3b0] sm:$0xff]  ;;  %v161_v10 = vld [vmem:[%s11825_s2 + $0x398] sm:$0xff] }
 0x18f   :  { %3964 = vmatprep.subr.bf16.mxu0 %v7219_v20  ;;  %4086 = vmatprep.subr.bf16.mxu1 %v7221_v19  ;;  %v7269_v20 = vcombine.high %v121_v13, %v125_v14  ;;  %v128_v19 = vld [vmem:[%s11825_s2 + $0x290] sm:$0xff] }
 0x190   :  { %3827 = vmatprep.mubr.bf16.mxu0 %v9748_v21  ;;  %3949 = vmatprep.mubr.bf16.mxu1 %v9748_v21 }
 0x192   :  { %3965 = vmatpush1.bf16.msra.mxu0 %v7218_v29  ;;  %4087 = vmatpush1.bf16.msra.mxu1 %v7220_v31  ;;  %v7268_v29 = vcombine.low %v121_v13, %v125_v14  ;;  %v7275_v31 = vcombine.high %v128_v19, %v132_v27  ;;  %v165_v13 = vld [vmem:[%s11825_s2 + $0x3b8] sm:$0xff] }
 0x193   :  { %3966 = vmatprep.subr.bf16.mxu0 %v7227_v32  ;;  %4088 = vmatprep.subr.bf16.mxu1 %v7229_v33  ;;  %v7277_v32 = vcombine.high %v129_v24, %v133_v35  ;;  %v136_v33 = vld [vmem:[%s11825_s2 + $0x2d0] sm:$0xff]  ;;  %v173_v24 = vld [vmem:[%s11825_s2 + $0x3f8] sm:$0xff] }
 0x194   :  { %v7283_v46 = vcombine.high %v136_v33, %v140_v34  ;;  %v7282_v22 = vcombine.low %v136_v33, %v140_v34  ;;  %v180_v33 = vld [vmem:[%s11825_s2 + $0x430] sm:$0xff]  ;;  %v177_v34 = vld [vmem:[%s11825_s2 + $0x418] sm:$0xff] }
 0x195   :  { %3828 = vmatmul.mubr.bf16.gmra.mrb[36].mxu0 %v9772_v44  ;;  %3950 = vmatmul.mubr.bf16.gmra.mrb[36].mxu1 %v9772_v44 }
 0x196   :  { %3967 = vmatpush1.bf16.msra.mxu0 %v7226_v39  ;;  %4089 = vmatpush1.bf16.msra.mxu1 %v7228_v40 }
 0x197   :  { %3968 = vmatprep.subr.bf16.mxu0 %v7235_v41  ;;  %4090 = vmatprep.subr.bf16.mxu1 %v7237_v58  ;;  %v7274_v41 = vcombine.low %v128_v19, %v132_v27  ;;  %v172_v19 = vld [vmem:[%s11825_s2 + $0x3f0] sm:$0xff]  ;;  %v169_v27 = vld [vmem:[%s11825_s2 + $0x3d8] sm:$0xff] }
 0x198   :  { %3990 = vmatprep.mubr.bf16.mxu0 %v9307_v43  ;;  %4112 = vmatprep.mubr.bf16.mxu1 %v9307_v43  ;;  %v113_v43 = vld [vmem:[%s11825_s2 + $0x218] sm:$0xff] }
 0x199   :  { %v7261_v11 = vcombine.high %v113_v43, %v117_v26  ;;  %v7260_v17 = vcombine.low %v113_v43, %v117_v26  ;;  %v157_v43 = vld [vmem:[%s11825_s2 + $0x378] sm:$0xff] }
 0x19a   :  { %3969 = vmatpush1.bf16.msra.mxu0 %v7234_v48  ;;  %4091 = vmatpush1.bf16.msra.mxu1 %v7236_v50  ;;  %v7285_v50 = vcombine.high %v137_v38, %v141_v37 }
 0x19b   :  { %3970 = vmatprep.subr.bf16.mxu0 %v7243_v51  ;;  %4092 = vmatprep.subr.bf16.mxu1 %v7245_v5  ;;  %v144_v51 = vld [vmem:[%s11825_s2 + $0x310] sm:$0xff] }
 0x19c   :  { %v148_v5 = vld [vmem:[%s11825_s2 + $0x330] sm:$0xff] }
 0x19d   :  { %v7290_v26 = vcombine.low %v144_v51, %v148_v5 }
 0x19e   :  { %3971 = vmatpush1.bf16.msra.mxu0 %v7242_v62  ;;  %4093 = vmatpush1.bf16.msra.mxu1 %v7244_v0  ;;  %v7284_v62 = vcombine.low %v137_v38, %v141_v37  ;;  %v7291_v0 = vcombine.high %v144_v51, %v148_v5  ;;  %v181_v38 = vld [vmem:[%s11825_s2 + $0x438] sm:$0xff] }
 0x19f   :  { %3972 = vmatprep.subr.bf16.mxu0 %v7251_v1  ;;  %4094 = vmatprep.subr.bf16.mxu1 %v7253_v4  ;;  %v7293_v1 = vcombine.high %v145_v55, %v149_v61  ;;  %v152_v4 = vld [vmem:[%s11825_s2 + $0x350] sm:$0xff]  ;;  %v7324_v5 = vcombine.low %v177_v34, %v181_v38 }
 0x1a0   :  { %v7298_v14 = vcombine.low %v152_v4, %v156_v6 }
 0x1a2   :  { %3973 = vmatpush1.bf16.msra.mxu0 %v7250_v7  ;;  %4095 = vmatpush1.bf16.msra.mxu1 %v7252_v30  ;;  %v7292_v7 = vcombine.low %v145_v55, %v149_v61  ;;  %v7299_v30 = vcombine.high %v152_v4, %v156_v6  ;;  %v192_v61 = vld [vmem:[%s11825_s2 + $0x490] sm:$0xff] }
 0x1a3   :  { %3974 = vmatprep.subr.bf16.mxu0 %v7259_v8  ;;  %4096 = vmatprep.subr.bf16.mxu1 %v7261_v11  ;;  %v7301_v8 = vcombine.high %v153_v25, %v157_v43  ;;  %v160_v11 = vld [vmem:[%s11825_s2 + $0x390] sm:$0xff] }
 0x1a4   :  { %v7306_v35 = vcombine.low %v160_v11, %v164_v12 }
 0x1a6   :  { %3975 = vmatpush1.bf16.msra.mxu0 %v7258_v15  ;;  %4097 = vmatpush1.bf16.msra.mxu1 %v7260_v17  ;;  %v7300_v15 = vcombine.low %v153_v25, %v157_v43  ;;  %v7307_v17 = vcombine.high %v160_v11, %v164_v12  ;;  %v200_v43 = vld [vmem:[%s11825_s2 + $0x4d0] sm:$0xff] }
 0x1a7   :  { %3976 = vmatprep.subr.bf16.mxu0 %v7267_v18  ;;  %4098 = vmatprep.subr.bf16.mxu1 %v7269_v20  ;;  %v7309_v18 = vcombine.high %v161_v10, %v165_v13  ;;  %v168_v20 = vld [vmem:[%s11825_s2 + $0x3d0] sm:$0xff] }
 0x1a8   :  { %v9850_v36 = vpop.f32.mrb[24].mxu0  ;;  %v9860_v40 = vpop.f32.mrb[24].mxu1  ;;  %v7314_v37 = vcombine.low %v168_v20, %v172_v19 }
 0x1a9   :  { %v9858_v39 = vpop.f32.mrb[25].mxu0  ;;  %v9862_v42 = vpop.f32.mrb[25].mxu1 }
 0x1aa   :  { %3977 = vmatpush1.bf16.msra.mxu0 %v7266_v28  ;;  %v2194_v58 = vpop.f32.mrb[26].mxu0  ;;  %4099 = vmatpush1.bf16.msra.mxu1 %v7268_v29  ;;  %v2316_v48 = vpop.f32.mrb[26].mxu1  ;;  %v7308_v28 = vcombine.low %v161_v10, %v165_v13  ;;  %v7315_v29 = vcombine.high %v168_v20, %v172_v19  ;;  %v212_v10 = vld [vmem:[%s11825_s2 + $0x530] sm:$0xff]  ;;  %v209_v13 = vld [vmem:[%s11825_s2 + $0x518] sm:$0xff] }
 0x1ab   :  { %3978 = vmatprep.subr.bf16.mxu0 %v7275_v31  ;;  %v2195_v47 = vpop.f32.mrb[27].mxu0  ;;  %4100 = vmatprep.subr.bf16.mxu1 %v7277_v32  ;;  %v2317_v53 = vpop.f32.mrb[27].mxu1  ;;  %v7317_v31 = vcombine.high %v169_v27, %v173_v24  ;;  %v176_v32 = vld [vmem:[%s11825_s2 + $0x410] sm:$0xff]  ;;  %v185_v48 = vld [vmem:[%s11825_s2 + $0x458] sm:$0xff] }
 0x1ac   :  { %v7323_v58 = vcombine.high %v176_v32, %v180_v33  ;;  %v188_v47 = vld [vmem:[%s11825_s2 + $0x470] sm:$0xff]  ;;  %v7322_v51 = vcombine.low %v176_v32, %v180_v33  ;;  %v225_v33 = vld [vmem:[%s11825_s2 + $0x598] sm:$0xff] }
 0x1ad   :  { %v216_v19 = vld [vmem:[%s11825_s2 + $0x550] sm:$0xff] }
 0x1ae   :  { %3979 = vmatpush1.bf16.msra.mxu0 %v7274_v41  ;;  %4101 = vmatpush1.bf16.msra.mxu1 %v7276_v49  ;;  %v7316_v41 = vcombine.low %v169_v27, %v173_v24  ;;  %v7325_v49 = vcombine.high %v177_v34, %v181_v38  ;;  %v220_v27 = vld [vmem:[%s11825_s2 + $0x570] sm:$0xff]  ;;  %v221_v24 = vld [vmem:[%s11825_s2 + $0x578] sm:$0xff] }
 0x1af   :  { %3980 = vmatprep.subr.bf16.mxu0 %v7283_v46  ;;  %4102 = vmatprep.subr.bf16.mxu1 %v7285_v50  ;;  %v184_v46 = vld [vmem:[%s11825_s2 + $0x450] sm:$0xff]  ;;  %v189_v50 = vld [vmem:[%s11825_s2 + $0x478] sm:$0xff]  ;;  %v7362_v38 = vcombine.low %v216_v19, %v220_v27 }
 0x1b0   :  { %v7331_v53 = vcombine.high %v184_v46, %v188_v47  ;;  %v7333_v55 = vcombine.high %v185_v48, %v189_v50  ;;  %v7332_v4 = vcombine.low %v185_v48, %v189_v50  ;;  %v228_v32 = vld [vmem:[%s11825_s2 + $0x5b0] sm:$0xff]  ;;  %v229_v34 = vld [vmem:[%s11825_s2 + $0x5b8] sm:$0xff] }
 0x1b1   :  { %v7372_v50 = vcombine.low %v225_v33, %v229_v34 }
 0x1b2   :  { %3981 = vmatpush1.bf16.msra.mxu0 %v7282_v22  ;;  %4103 = vmatpush1.bf16.msra.mxu1 %v7284_v62  ;;  %v196_v22 = vld [vmem:[%s11825_s2 + $0x4b0] sm:$0xff]  ;;  %v193_v62 = vld [vmem:[%s11825_s2 + $0x498] sm:$0xff] }
 0x1b3   :  { %3982 = vmatprep.subr.bf16.mxu0 %v7291_v0  ;;  %4104 = vmatprep.subr.bf16.mxu1 %v7293_v1  ;;  %v197_v0 = vld [vmem:[%s11825_s2 + $0x4b8] sm:$0xff]  ;;  %v7330_v1 = vcombine.low %v184_v46, %v188_v47  ;;  %v7339_v6 = vcombine.high %v192_v61, %v196_v22  ;;  %v236_v46 = vld [vmem:[%s11825_s2 + $0x5f0] sm:$0xff] }
 0x1b4   :  { %v7341_v25 = vcombine.high %v193_v62, %v197_v0  ;;  %v237_v47 = vld [vmem:[%s11825_s2 + $0x5f8] sm:$0xff] }
 0x1b6   :  { %3983 = vmatpush1.bf16.msra.mxu0 %v7290_v26  ;;  %4105 = vmatpush1.bf16.msra.mxu1 %v7292_v7  ;;  %v204_v26 = vld [vmem:[%s11825_s2 + $0x4f0] sm:$0xff]  ;;  %v205_v7 = vld [vmem:[%s11825_s2 + $0x4f8] sm:$0xff] }
 0x1b7   :  { %3984 = vmatprep.subr.bf16.mxu0 %v7299_v30  ;;  %4106 = vmatprep.subr.bf16.mxu1 %v7301_v8  ;;  %v7338_v30 = vcombine.low %v192_v61, %v196_v22  ;;  %v7340_v8 = vcombine.low %v193_v62, %v197_v0  ;;  %v7347_v11 = vcombine.high %v200_v43, %v204_v26  ;;  %v245_v61 = vld [vmem:[%s11825_s2 + $0x638] sm:$0xff] }
 0x1ba   :  { %3985 = vmatpush1.bf16.msra.mxu0 %v7298_v14  ;;  %4107 = vmatpush1.bf16.msra.mxu1 %v7300_v15  ;;  %v213_v14 = vld [vmem:[%s11825_s2 + $0x538] sm:$0xff]  ;;  %v7346_v15 = vcombine.low %v200_v43, %v204_v26 }
 0x1bb   :  { %3986 = vmatprep.subr.bf16.mxu0 %v7307_v17  ;;  %4108 = vmatprep.subr.bf16.mxu1 %v7309_v18  ;;  %v7357_v20 = vcombine.high %v209_v13, %v213_v14  ;;  %v253_v43 = vld [vmem:[%s11825_s2 + $0x678] sm:$0xff] }
 0x1be   :  { %3987 = vmatpush1.bf16.msra.mxu0 %v7306_v35  ;;  %4109 = vmatpush1.bf16.msra.mxu1 %v7308_v28  ;;  %v7356_v28 = vcombine.low %v209_v13, %v213_v14 }
 0x1bf   :  { %3988 = vmatprep.subr.bf16.mxu0 %v7315_v29  ;;  %4110 = vmatprep.subr.bf16.mxu1 %v7317_v31  ;;  %v7363_v29 = vcombine.high %v216_v19, %v220_v27 }
 0x1c2   :  { %3989 = vmatpush1.bf16.msra.mxu0 %v7314_v37  ;;  %4111 = vmatpush1.bf16.msra.mxu1 %v7316_v41 }
 0x1c3   :  { %4019 = vmatprep.subr.bf16.mxu0 %v7323_v58  ;;  %4141 = vmatprep.subr.bf16.mxu1 %v7325_v49  ;;  %v7373_v58 = vcombine.high %v225_v33, %v229_v34  ;;  %v232_v49 = vld [vmem:[%s11825_s2 + $0x5d0] sm:$0xff] }
 0x1c4   :  { %v7378_v22 = vcombine.low %v232_v49, %v236_v46 }
 0x1c5   :  { %3991 = vmatmul.mubr.bf16.vlgmr.msra.gmra.mrb[16].mxu0 %v9456_v16  ;;  %4113 = vmatmul.mubr.bf16.vlgmr.msra.gmra.mrb[16].mxu1 %v9456_v16  ;;  %v201_v16 = vld [vmem:[%s11825_s2 + $0x4d8] sm:$0xff] }
 0x1c6   :  { %4020 = vmatpush1.bf16.msra.mxu0 %v7322_v51  ;;  %4142 = vmatpush1.bf16.msra.mxu1 %v7324_v5  ;;  %v7349_v12 = vcombine.high %v201_v16, %v205_v7  ;;  %v7348_v17 = vcombine.low %v201_v16, %v205_v7  ;;  %v7379_v51 = vcombine.high %v232_v49, %v236_v46  ;;  %v277_v49 = vld [vmem:[%s11825_s2 + $0x738] sm:$0xff] }
 0x1c7   :  { %4021 = vmatprep.subr.bf16.mxu0 %v7331_v53  ;;  %4143 = vmatprep.subr.bf16.mxu1 %v7333_v55  ;;  %v240_v53 = vld [vmem:[%s11825_s2 + $0x610] sm:$0xff] }
 0x1c8   :  { %4000 = vmatprep.mubr.bf16.mxu0 %v9467_v23  ;;  %4122 = vmatprep.mubr.bf16.mxu1 %v9467_v23  ;;  %v208_v23 = vld [vmem:[%s11825_s2 + $0x510] sm:$0xff] }
 0x1c9   :  { %v7355_v18 = vcombine.high %v208_v23, %v212_v10  ;;  %v7354_v35 = vcombine.low %v208_v23, %v212_v10  ;;  %v244_v55 = vld [vmem:[%s11825_s2 + $0x630] sm:$0xff]  ;;  %v261_v23 = vld [vmem:[%s11825_s2 + $0x6b8] sm:$0xff] }
 0x1ca   :  { %4022 = vmatpush1.bf16.msra.mxu0 %v7330_v1  ;;  %4144 = vmatpush1.bf16.msra.mxu1 %v7332_v4  ;;  %v7387_v0 = vcombine.high %v240_v53, %v244_v55  ;;  %v248_v4 = vld [vmem:[%s11825_s2 + $0x650] sm:$0xff]  ;;  %v7386_v26 = vcombine.low %v240_v53, %v244_v55  ;;  %v285_v53 = vld [vmem:[%s11825_s2 + $0x778] sm:$0xff] }
 0x1cb   :  { %4023 = vmatprep.subr.bf16.mxu0 %v7339_v6  ;;  %4145 = vmatprep.subr.bf16.mxu1 %v7341_v25  ;;  %v252_v6 = vld [vmem:[%s11825_s2 + $0x670] sm:$0xff]  ;;  %v249_v25 = vld [vmem:[%s11825_s2 + $0x658] sm:$0xff] }
 0x1cc   :  { %v7395_v7 = vcombine.high %v248_v4, %v252_v6  ;;  %v7394_v10 = vcombine.low %v248_v4, %v252_v6  ;;  %v7396_v13 = vcombine.low %v249_v25, %v253_v43  ;;  %v293_v4 = vld [vmem:[%s11825_s2 + $0x7b8] sm:$0xff] }
 0x1cd   :  { %4001 = vmatmul.mubr.bf16.gmra.mrb[20].mxu0 %v9487_v56  ;;  %4123 = vmatmul.mubr.bf16.gmra.mrb[20].mxu1 %v9487_v56  ;;  %v217_v56 = vld [vmem:[%s11825_s2 + $0x558] sm:$0xff] }
 0x1ce   :  { %4024 = vmatpush1.bf16.msra.mxu0 %v7338_v30  ;;  %4146 = vmatpush1.bf16.msra.mxu1 %v7340_v8  ;;  %v7365_v31 = vcombine.high %v217_v56, %v221_v24  ;;  %v7364_v37 = vcombine.low %v217_v56, %v221_v24  ;;  %v7397_v30 = vcombine.high %v249_v25, %v253_v43  ;;  %v256_v8 = vld [vmem:[%s11825_s2 + $0x690] sm:$0xff]  ;;  %v265_v24 = vld [vmem:[%s11825_s2 + $0x6d8] sm:$0xff] }
 0x1cf   :  { %4025 = vmatprep.subr.bf16.mxu0 %v7347_v11  ;;  %4147 = vmatprep.subr.bf16.mxu1 %v7349_v12  ;;  %v260_v11 = vld [vmem:[%s11825_s2 + $0x6b0] sm:$0xff]  ;;  %v257_v12 = vld [vmem:[%s11825_s2 + $0x698] sm:$0xff] }
 0x1d0   :  { %4010 = vmatprep.mubr.bf16.mxu0 %v9505_v45  ;;  %4132 = vmatprep.mubr.bf16.mxu1 %v9505_v45  ;;  %v224_v45 = vld [vmem:[%s11825_s2 + $0x590] sm:$0xff]  ;;  %v7403_v14 = vcombine.high %v256_v8, %v260_v11  ;;  %v7404_v33 = vcombine.low %v257_v12, %v261_v23 }
 0x1d1   :  { %v7371_v41 = vcombine.high %v224_v45, %v228_v32  ;;  %v7370_v48 = vcombine.low %v224_v45, %v228_v32 }
 0x1d2   :  { %4026 = vmatpush1.bf16.msra.mxu0 %v7346_v15  ;;  %4148 = vmatpush1.bf16.msra.mxu1 %v7348_v17  ;;  %v7405_v17 = vcombine.high %v257_v12, %v261_v23 }
 0x1d3   :  { %4027 = vmatprep.subr.bf16.mxu0 %v7355_v18  ;;  %4149 = vmatprep.subr.bf16.mxu1 %v7357_v20  ;;  %v264_v18 = vld [vmem:[%s11825_s2 + $0x6d0] sm:$0xff] }
 0x1d4   :  { %v268_v20 = vld [vmem:[%s11825_s2 + $0x6f0] sm:$0xff] }
 0x1d5   :  { %4011 = vmatmul.mubr.bf16.gmra.mrb[40].mxu0 %v9529_v54  ;;  %4133 = vmatmul.mubr.bf16.gmra.mrb[40].mxu1 %v9529_v54  ;;  %v233_v54 = vld [vmem:[%s11825_s2 + $0x5d8] sm:$0xff]  ;;  %v7411_v34 = vcombine.high %v264_v18, %v268_v20  ;;  %v7410_v46 = vcombine.low %v264_v18, %v268_v20 }
 0x1d6   :  { %4028 = vmatpush1.bf16.msra.mxu0 %v7354_v35  ;;  %4150 = vmatpush1.bf16.msra.mxu1 %v7356_v28  ;;  %v7381_v5 = vcombine.high %v233_v54, %v237_v47  ;;  %v7380_v62 = vcombine.low %v233_v54, %v237_v47  ;;  %v269_v35 = vld [vmem:[%s11825_s2 + $0x6f8] sm:$0xff] }
 0x1d7   :  { %4029 = vmatprep.subr.bf16.mxu0 %v7363_v29  ;;  %4151 = vmatprep.subr.bf16.mxu1 %v7365_v31  ;;  %v7412_v54 = vcombine.low %v265_v24, %v269_v35 }
 0x1d8   :  { %4051 = vmatprep.mubr.bf16.mxu0 %v9546_v2  ;;  %4173 = vmatprep.mubr.bf16.mxu1 %v9546_v2  ;;  %v241_v2 = vld [vmem:[%s11825_s2 + $0x618] sm:$0xff] }
 0x1d9   :  { %v7389_v1 = vcombine.high %v241_v2, %v245_v61  ;;  %v7388_v16 = vcombine.low %v241_v2, %v245_v61 }
 0x1da   :  { %4030 = vmatpush1.bf16.msra.mxu0 %v7362_v38  ;;  %4152 = vmatpush1.bf16.msra.mxu1 %v7364_v37 }
 0x1db   :  { %4031 = vmatprep.subr.bf16.mxu0 %v7371_v41  ;;  %4153 = vmatprep.subr.bf16.mxu1 %v7373_v58  ;;  %v7413_v41 = vcombine.high %v265_v24, %v269_v35 }
 0x1de   :  { %4032 = vmatpush1.bf16.msra.mxu0 %v7370_v48  ;;  %4154 = vmatpush1.bf16.msra.mxu1 %v7372_v50  ;;  %v280_v50 = vld [vmem:[%s11825_s2 + $0x750] sm:$0xff] }
 0x1df   :  { %4033 = vmatprep.subr.bf16.mxu0 %v7379_v51  ;;  %4155 = vmatprep.subr.bf16.mxu1 %v7381_v5  ;;  %v284_v51 = vld [vmem:[%s11825_s2 + $0x770] sm:$0xff]  ;;  %v281_v5 = vld [vmem:[%s11825_s2 + $0x758] sm:$0xff] }
 0x1e0   :  { %v7427_v61 = vcombine.high %v280_v50, %v284_v51  ;;  %v7426_v6 = vcombine.low %v280_v50, %v284_v51  ;;  %v7428_v25 = vcombine.low %v281_v5, %v285_v53 }
 0x1e2   :  { %4034 = vmatpush1.bf16.msra.mxu0 %v7378_v22  ;;  %4156 = vmatpush1.bf16.msra.mxu1 %v7380_v62  ;;  %v7429_v22 = vcombine.high %v281_v5, %v285_v53  ;;  %v288_v62 = vld [vmem:[%s11825_s2 + $0x790] sm:$0xff] }
 0x1e3   :  { %4035 = vmatprep.subr.bf16.mxu0 %v7387_v0  ;;  %4157 = vmatprep.subr.bf16.mxu1 %v7389_v1  ;;  %v292_v0 = vld [vmem:[%s11825_s2 + $0x7b0] sm:$0xff]  ;;  %v289_v1 = vld [vmem:[%s11825_s2 + $0x798] sm:$0xff] }
 0x1e4   :  { %v7435_v43 = vcombine.high %v288_v62, %v292_v0  ;;  %v7436_v12 = vcombine.low %v289_v1, %v293_v4 }
 0x1e6   :  { %4036 = vmatpush1.bf16.msra.mxu0 %v7386_v26  ;;  %4158 = vmatpush1.bf16.msra.mxu1 %v7388_v16  ;;  %v7437_v26 = vcombine.high %v289_v1, %v293_v4  ;;  %v296_v16 = vld [vmem:[%s11825_s2 + $0x7d0] sm:$0xff] }
 0x1e7   :  { %4037 = vmatprep.subr.bf16.mxu0 %v7395_v7  ;;  %4159 = vmatprep.subr.bf16.mxu1 %v7397_v30  ;;  %v300_v7 = vld [vmem:[%s11825_s2 + $0x7f0] sm:$0xff]  ;;  %v297_v30 = vld [vmem:[%s11825_s2 + $0x7d8] sm:$0xff] }
 0x1e8   :  { %v2251_v15 = vpop.f32.mrb[28].mxu0  ;;  %v2373_v27 = vpop.f32.mrb[28].mxu1  ;;  %v7443_v23 = vcombine.high %v296_v16, %v300_v7 }
 0x1e9   :  { %v10063_v19 = vadd.f32 %v2251_v15, %v9850_v36  ;;  %v2253_v56 = vpop.f32.mrb[29].mxu0  ;;  %v10072_v28 = vadd.f32 %v2373_v27, %v9860_v40  ;;  %v2375_v31 = vpop.f32.mrb[29].mxu1  ;;  %v7402_v36 = vcombine.low %v256_v8, %v260_v11  ;;  %v276_v40 = vld [vmem:[%s11825_s2 + $0x730] sm:$0xff]  ;;  %v301_v8 = vld [vmem:[%s11825_s2 + $0x7f8] sm:$0xff]  ;;  %v7434_v11 = vcombine.low %v288_v62, %v292_v0 }
 0x1ea   :  { %v10075_v29 = vadd.f32 %v2253_v56, %v9858_v39  ;;  %4038 = vmatpush1.bf16.msra.mxu0 %v7394_v10  ;;  %v2255_v45 = vpop.f32.mrb[30].mxu0  ;;  %v10078_v32 = vadd.f32 %v2375_v31, %v9862_v42  ;;  %4160 = vmatpush1.bf16.msra.mxu1 %v7396_v13  ;;  %v2377_v37 = vpop.f32.mrb[30].mxu1  ;;  %v272_v39 = vld [vmem:[%s11825_s2 + $0x710] sm:$0xff]  ;;  %v273_v42 = vld [vmem:[%s11825_s2 + $0x718] sm:$0xff]  ;;  %v7445_v10 = vcombine.high %v297_v30, %v301_v8 }
 0x1eb   :  { %4039 = vmatprep.subr.bf16.mxu0 %v7403_v14  ;;  %v2256_v38 = vpop.f32.mrb[31].mxu0  ;;  %4161 = vmatprep.subr.bf16.mxu1 %v7405_v17  ;;  %v2378_v58 = vpop.f32.mrb[31].mxu1  ;;  %v7419_v47 = vcombine.high %v272_v39, %v276_v40  ;;  %v7421_v48 = vcombine.high %v273_v42, %v277_v49  ;;  %v7418_v55 = vcombine.low %v272_v39, %v276_v40 }
 0x1ec   :  { %v7420_v2 = vcombine.low %v273_v42, %v277_v49  ;;  %v7442_v13 = vcombine.low %v296_v16, %v300_v7  ;;  %v7444_v14 = vcombine.low %v297_v30, %v301_v8  ;;  %v4204_v30 = vlaneseq }
 0x1ee   :  { %4040 = vmatpush1.bf16.msra.mxu0 %v7402_v36  ;;  %4162 = vmatpush1.bf16.msra.mxu1 %v7404_v33  ;;  %v4205_v8 = vshrl.u32 %v4204_v30, 7 }
 0x1ef   :  { %4041 = vmatprep.subr.bf16.mxu0 %v7411_v34  ;;  %4163 = vmatprep.subr.bf16.mxu1 %v7413_v41 }
 0x1f2   :  { %4042 = vmatpush1.bf16.msra.mxu0 %v7410_v46  ;;  %4164 = vmatpush1.bf16.msra.mxu1 %v7412_v54 }
 0x1f3   :  { %4043 = vmatprep.subr.bf16.mxu0 %v7419_v47  ;;  %4165 = vmatprep.subr.bf16.mxu1 %v7421_v48 }
 0x1f6   :  { %4044 = vmatpush1.bf16.msra.mxu0 %v7418_v55  ;;  %4166 = vmatpush1.bf16.msra.mxu1 %v7420_v2 }
 0x1f7   :  { %4045 = vmatprep.subr.bf16.mxu0 %v7427_v61  ;;  %4167 = vmatprep.subr.bf16.mxu1 %v7429_v22 }
 0x1fa   :  { %4046 = vmatpush1.bf16.msra.mxu0 %v7426_v6  ;;  %4168 = vmatpush1.bf16.msra.mxu1 %v7428_v25 }
 0x1fb   :  { %4047 = vmatprep.subr.bf16.mxu0 %v7435_v43  ;;  %4169 = vmatprep.subr.bf16.mxu1 %v7437_v26 }
 0x1fe   :  { %4048 = vmatpush1.bf16.msra.mxu0 %v7434_v11  ;;  %4170 = vmatpush1.bf16.msra.mxu1 %v7436_v12  ;;  %v10176_v11 = vsub.s32 1, %v4205_v8 }
 0x1ff   :  { %4049 = vmatprep.subr.bf16.mxu0 %v7443_v23  ;;  %4171 = vmatprep.subr.bf16.mxu1 %v7445_v10  ;;  %v10183_v23 = vsub.s32 2, %v4205_v8 }
 0x201   :  { %11850 = vst [vmem:[#allocation2_spill] sm:$0xff] %v10183_v23 }
 0x202   :  { %4050 = vmatpush1.bf16.msra.mxu0 %v7442_v13  ;;  %4172 = vmatpush1.bf16.msra.mxu1 %v7444_v14  ;;  %v10192_v14 = vsub.s32 3, %v4205_v8 }
 0x204   :  { %11851 = vst [vmem:[#allocation3_spill] sm:$0xff] %v10192_v14 }
 0x205   :  { %4052 = vmatmul.mubr.bf16.vlgmr.msra.gmra.mrb[16].mxu0 %v9699_v57  ;;  %4174 = vmatmul.mubr.bf16.vlgmr.msra.gmra.mrb[16].mxu1 %v9699_v57 }
 0x206   :  { %4061 = vmatprep.mubr.bf16.mxu0 %v9710_v3  ;;  %4183 = vmatprep.mubr.bf16.mxu1 %v9710_v3 }
 0x20d   :  { %4062 = vmatmul.mubr.bf16.gmra.mrb[20].mxu0 %v9730_v9  ;;  %4184 = vmatmul.mubr.bf16.gmra.mrb[20].mxu1 %v9730_v9 }
 0x20e   :  { %4071 = vmatprep.mubr.bf16.mxu0 %v9748_v21  ;;  %4193 = vmatprep.mubr.bf16.mxu1 %v9748_v21 }
 0x215   :  { %4072 = vmatmul.mubr.bf16.gmra.mrb[44].mxu0 %v9772_v44  ;;  %4194 = vmatmul.mubr.bf16.gmra.mrb[44].mxu1 %v9772_v44 }
 0x228   :  { %v3768_v15 = vpop.f32.mrb[32].mxu0  ;;  %v3890_v57 = vpop.f32.mrb[32].mxu1 }
 0x229   :  { %v3769_v17 = vadd.f32 %v3768_v15, %v9613_v52  ;;  %v3770_v18 = vpop.f32.mrb[33].mxu0  ;;  %v3891_v20 = vadd.f32 %v3890_v57, %v9622_v59  ;;  %v3892_v27 = vpop.f32.mrb[33].mxu1 }
 0x22a   :  { %v3771_v3 = vadd.f32 %v3770_v18, %v9625_v60  ;;  %v3772_v56 = vpop.f32.mrb[34].mxu0  ;;  %v3893_v9 = vadd.f32 %v3892_v27, %v9628_v63  ;;  %v3894_v35 = vpop.f32.mrb[34].mxu1  ;;  %v10200_v18 = vsub.s32 4, %v4205_v8 }
 0x22b   :  { %v3773_v24 = vpop.f32.mrb[35].mxu0  ;;  %v3895_v21 = vpop.f32.mrb[35].mxu1 }
 0x22c   :  { %11852 = vst [vmem:[#allocation4_spill] sm:$0xff] %v10200_v18 }
 0x258   :  { %v3809_v31 = vpop.f32.mrb[0].mxu0  ;;  %v3931_v36 = vpop.f32.mrb[0].mxu1 }
 0x259   :  { %v3811_v45 = vpop.f32.mrb[1].mxu0  ;;  %v10142_v44 = vpop.f32.mrb[1].mxu1 }
 0x25a   :  { %v3813_v33 = vpop.f32.mrb[2].mxu0  ;;  %v3935_v52 = vpop.f32.mrb[2].mxu1 }
 0x25b   :  { %v3815_v34 = vpop.f32.mrb[3].mxu0  ;;  %v10144_v38 = vpop.f32.mrb[3].mxu1 }
 0x260   :  { %v3819_v59 = vpop.f32.mrb[4].mxu0  ;;  %v10146_v37 = vpop.f32.mrb[4].mxu1 }
 0x261   :  { %v3821_v60 = vpop.f32.mrb[5].mxu0  ;;  %v10148_v41 = vpop.f32.mrb[5].mxu1 }
 0x262   :  { %v3823_v63 = vpop.f32.mrb[6].mxu0  ;;  %v10150_v39 = vpop.f32.mrb[6].mxu1 }
 0x263   :  { %v3825_v40 = vpop.f32.mrb[7].mxu0  ;;  %v10152_v58 = vpop.f32.mrb[7].mxu1 }
 0x268   :  { %v3829_v42 = vpop.f32.mrb[36].mxu0  ;;  %v3951_v46 = vpop.f32.mrb[36].mxu1 }
 0x269   :  { %v10154_v49 = vadd.f32 %v3829_v42, %v3769_v17  ;;  %v3831_v54 = vpop.f32.mrb[37].mxu0  ;;  %v10156_v47 = vadd.f32 %v3951_v46, %v3891_v20  ;;  %v3953_v50 = vpop.f32.mrb[37].mxu1  ;;  %v10202_v20 = vsub.s32 5, %v4205_v8 }
 0x26a   :  { %v10158_v48 = vadd.f32 %v3831_v54, %v3771_v3  ;;  %v3833_v51 = vpop.f32.mrb[38].mxu0  ;;  %v10160_v5 = vadd.f32 %v3953_v50, %v3893_v9  ;;  %v3955_v55 = vpop.f32.mrb[38].mxu1 }
 0x26b   :  { %v3834_v53 = vpop.f32.mrb[39].mxu0  ;;  %v3956_v2 = vpop.f32.mrb[39].mxu1  ;;  %11853 = vst [vmem:[#allocation5_spill] sm:$0xff] %v10202_v20 }
 0x2a8   :  { %v4012_v61 = vpop.f32.mrb[40].mxu0  ;;  %v4134_v62 = vpop.f32.mrb[40].mxu1 }
 0x2a9   :  { %v10163_v22 = vadd.f32 %v4012_v61, %v10063_v19  ;;  %v4014_v0 = vpop.f32.mrb[41].mxu0  ;;  %v10166_v1 = vadd.f32 %v4134_v62, %v10072_v28  ;;  %v4136_v6 = vpop.f32.mrb[41].mxu1  ;;  %v10174_v19 = vsub.s32 0, %v4205_v8  ;;  %v4202_v28 = vld [vmem:[%s11826_s4] ss:$4 sm:$0xff] }
 0x2aa   :  { %v10169_v4 = vadd.f32 %v4014_v0, %v10075_v29  ;;  %v4016_v25 = vpop.f32.mrb[42].mxu0  ;;  %v10172_v43 = vadd.f32 %v4136_v6, %v10078_v32  ;;  %v4138_v16 = vpop.f32.mrb[42].mxu1  ;;  %v4211_v12 = vrot.slane %v4202_v28, %v10176_v11  ;;  %v10190_v13 = vrot.slane %v4202_v28, %v10183_v23 }
 0x2ab   :  { %v4017_v26 = vpop.f32.mrb[43].mxu0  ;;  %v4139_v7 = vpop.f32.mrb[43].mxu1  ;;  %v4207_v29 = vrot.slane %v4202_v28, %v10174_v19  ;;  %v10208_v27 = vrot.slane %v4202_v28, %v10192_v14 }
 0x2ac   :  { %v10187_v10 = vadd.f32 %v4211_v12, %v3811_v45  ;;  %v10196_v17 = vadd.f32 %v4211_v12, %v3815_v34  ;;  %v10205_v3 = vadd.f32 %v10190_v13, %v3931_v36  ;;  %v10214_v24 = vadd.f32 %v4211_v12, %v3821_v60 }
 0x2ad   :  { %v10185_v32 = vadd.f32 %v4207_v29, %v3809_v31  ;;  %v10194_v15 = vadd.f32 %v4207_v29, %v3813_v33  ;;  %v10212_v9 = vadd.f32 %v4207_v29, %v3819_v59  ;;  %v10218_v21 = vadd.f32 %v10190_v13, %v3935_v52 }
 0x2ae   :  { %v10221_v31 = vrot.slane %v4202_v28, %v10200_v18  ;;  %v10223_v36 = vsub.s32 6, %v4205_v8  ;;  %v10225_v45 = vadd.f32 %v4207_v29, %v3823_v63  ;;  %v10227_v33 = vadd.f32 %v4211_v12, %v3825_v40 }
 0x2af   :  { %v4284_v57 = vadd.f32 %v10187_v10, %v10185_v32  ;;  %v4293_v56 = vadd.f32 %v10196_v17, %v10194_v15  ;;  %v10230_v34 = vrot.slane %v4202_v28, %v10202_v20  ;;  %v10234_v59 = vadd.f32 %v10208_v27, %v10142_v44 }
 0x2b0   :  { %11854 = vst [vmem:[#allocation6_spill] sm:$0xff] %v10223_v36  ;;  %v10237_v52 = vsub.s32 7, %v4205_v8  ;;  %v4302_v42 = vadd.f32 %v10214_v24, %v10212_v9  ;;  %v10244_v40 = vadd.f32 %v10208_v27, %v10144_v38  ;;  %v10250_v44 = vrot.slane %v4202_v28, %v10223_v36 }
 0x2b1   :  { %v4285_v35 = vadd.f32 %v4284_v57, %v10205_v3  ;;  %v4294_v60 = vadd.f32 %v4293_v56, %v10218_v21  ;;  %v10254_v53 = vadd.f32 %v10190_v13, %v10146_v37  ;;  %v4311_v55 = vadd.f32 %v10227_v33, %v10225_v45 }
 0x2b2   :  { %11855 = vst [vmem:[#allocation7_spill] sm:$0xff] %v10237_v52  ;;  %v10264_v6 = vrot.slane %v4202_v28, %v10237_v52  ;;  %v10272_v7 = vadd.f32 %v10190_v13, %v10150_v39  ;;  %v10275_v30 = vadd.f32 %v4207_v29, %v10154_v49  ;;  %v10281_v28 = vadd.f32 %v4211_v12, %v10158_v48 }
 0x2b3   :  { %v4286_v63 = vadd.f32 %v4285_v35, %v10234_v59  ;;  %v4295_v62 = vadd.f32 %v4294_v60, %v10244_v40  ;;  %v4303_v16 = vadd.f32 %v4302_v42, %v10254_v53  ;;  %v10290_v39 = vadd.f32 %v10208_v27, %v10148_v41 }
 0x2b4   :  { %v4312_v49 = vadd.f32 %v4311_v55, %v10272_v7  ;;  %v4321_v41 = vsel %vm4320_vm0, %v10275_v30, 0.0 }
 0x2d8   :  { %v4053_v46 = vpop.f32.mrb[16].mxu0  ;;  %v4175_v50 = vpop.f32.mrb[16].mxu1 }
 0x2d9   :  { %v10247_v54 = vadd.f32 %v10221_v31, %v4053_v46  ;;  %v4055_v51 = vpop.f32.mrb[17].mxu0  ;;  %v4177_v38 = vpop.f32.mrb[17].mxu1  ;;  %v10284_v56 = vadd.f32 %v10250_v44, %v4175_v50  ;;  %v4304_v46 = vadd.f32 %v4303_v16, %v10290_v39 }
 0x2da   :  { %v10259_v2 = vadd.f32 %v10230_v34, %v4055_v51  ;;  %v4057_v61 = vpop.f32.mrb[18].mxu0  ;;  %v4179_v37 = vpop.f32.mrb[18].mxu1  ;;  %v10294_v29 = vadd.f32 %v10264_v6, %v4177_v38  ;;  %v4322_v51 = vsel %vm4320_vm0, %v10281_v28, 0.0 }
 0x2db   :  { %v4287_v0 = vadd.f32 %v4286_v63, %v10247_v54  ;;  %v10267_v25 = vadd.f32 %v10221_v31, %v4057_v61  ;;  %v4059_v26 = vpop.f32.mrb[19].mxu0  ;;  %v4181_v57 = vpop.f32.mrb[19].mxu1  ;;  %v10297_v42 = vadd.f32 %v10250_v44, %v4179_v37  ;;  %v10304_v63 = vadd.f32 %v10208_v27, %v10152_v58 }
 0x2dc   :  { %v10278_v8 = vadd.f32 %v10230_v34, %v4059_v26  ;;  %v10317_v58 = vadd.f32 %v10190_v13, %v10156_v47  ;;  %v4323_v47 = vadd.f32 %v4322_v51, %v4321_v41 }
 0x2dd   :  { %v4288_v35 = vadd.f32 %v4287_v0, %v10259_v2  ;;  %v4296_v60 = vadd.f32 %v4295_v62, %v10267_v25 }
 0x2df   :  { %v4297_v48 = vadd.f32 %v4296_v60, %v10278_v8  ;;  %v4289_v12 = vadd.f32 %v4288_v35, %v10284_v56  ;;  %v4313_v35 = vadd.f32 %v4312_v49, %v10304_v63  ;;  %v10324_v60 = vadd.f32 %v10264_v6, %v4181_v57 }
 0x2e0   :  { %v4063_v50 = vpop.f32.mrb[20].mxu0  ;;  %v4185_v38 = vpop.f32.mrb[20].mxu1 }
 0x2e1   :  { %v10311_v55 = vadd.f32 %v10221_v31, %v4063_v50  ;;  %v4065_v61 = vpop.f32.mrb[21].mxu0  ;;  %v4290_v62 = vadd.f32 %v4289_v12, %v10294_v29  ;;  %v4298_v0 = vadd.f32 %v4297_v48, %v10297_v42  ;;  %v4187_v26 = vpop.f32.mrb[21].mxu1  ;;  %v10334_v52 = vadd.f32 %v10250_v44, %v4185_v38 }
 0x2e2   :  { %v10320_v37 = vadd.f32 %v10230_v34, %v4065_v61  ;;  %v4067_v16 = vpop.f32.mrb[22].mxu0  ;;  %v4189_v48 = vpop.f32.mrb[22].mxu1  ;;  %v10346_v41 = vadd.f32 %v10264_v6, %v4187_v26 }
 0x2e3   :  { %v4305_v50 = vadd.f32 %v4304_v46, %v10311_v55  ;;  %v10328_v12 = vadd.f32 %v10221_v31, %v4067_v16  ;;  %4291 = vadd.xlane.f32.xlu0 %v4290_v62  ;;  %v4069_v36 = vpop.f32.mrb[23].mxu0  ;;  %v4191_v13 = vpop.f32.mrb[23].mxu1  ;;  %v4299_v46 = vadd.f32 %v4298_v0, %v10324_v60  ;;  %v4324_v16 = vsel %vm4320_vm0, %v10317_v58, 0.0 }
 0x2e4   :  { %v10331_v61 = vadd.f32 %v10230_v34, %v4069_v36  ;;  %v10343_v62 = vadd.f32 %v10208_v27, %v10160_v5  ;;  %v10349_v36 = vadd.f32 %v10250_v44, %v4189_v48 }
 0x2e5   :  { %v4306_v49 = vadd.f32 %v4305_v50, %v10320_v37  ;;  %v4314_v57 = vadd.f32 %v4313_v35, %v10328_v12  ;;  %v4325_v35 = vadd.f32 %v4324_v16, %v4323_v47  ;;  %v10361_v47 = vadd.f32 %v10264_v6, %v4191_v13 }
 0x2e7   :  { %v4315_v51 = vadd.f32 %v4314_v57, %v10331_v61  ;;  %4300 = vadd.xlane.f32.xlu0 %v4299_v46  ;;  %v4307_v38 = vadd.f32 %v4306_v49, %v10334_v52  ;;  %v4326_v57 = vsel %vm4320_vm0, %v10343_v62, 0.0 }
 0x2e8   :  { %v4073_v0 = vpop.f32.mrb[44].mxu0  ;;  %v4195_v20 = vpop.f32.mrb[44].mxu1 }
 0x2e9   :  { %v4074_v50 = vadd.f32 %v4073_v0, %v10163_v22  ;;  %v4075_v14 = vpop.f32.mrb[45].mxu0  ;;  %v4308_v5 = vadd.f32 %v4307_v38, %v10346_v41  ;;  %v4316_v27 = vadd.f32 %v4315_v51, %v10349_v36  ;;  %v4196_v26 = vadd.f32 %v4195_v20, %v10166_v1  ;;  %v4197_v18 = vpop.f32.mrb[45].mxu1  ;;  %v7924_v0 = vld [vmem:[%s11827_s5] ss:$16 sps:$4 sm:$0xff]  }
 0x2ea   :  { %v4076_v48 = vadd.f32 %v4075_v14, %v10169_v4  ;;  %v4077_v23 = vpop.f32.mrb[46].mxu0  ;;  %v4198_v49 = vadd.f32 %v4197_v18, %v10172_v43  ;;  %v4199_v16 = vpop.f32.mrb[46].mxu1  ;;  %v4327_v51 = vadd.f32 %v4326_v57, %v4325_v35  ;;  %v7935_v57 = vld [vmem:[%s11827_s5 + $0x2c] ss:$16 sps:$4 sm:$0xff]  }
 0x2eb   :  { %v10364_v22 = vadd.f32 %v10221_v31, %v4074_v50  ;;  %4309 = vadd.xlane.f32.xlu1 %v4308_v5  ;;  %v4078_v46 = vpop.f32.mrb[47].mxu0  ;;  %v4200_v4 = vpop.f32.mrb[47].mxu1  ;;  %v10373_v14 = vadd.f32 %v10250_v44, %v4196_v26  ;;  %v4317_v20 = vadd.f32 %v4316_v27, %v10361_v47  ;;  %v7927_v50 = vld [vmem:[%s11827_s5 + $0x8] ss:$16 sps:$4 sm:$0xff]   ;;  %v7929_v5 = vld [vmem:[%s11827_s5 + $0xc] ss:$16 sps:$4 sm:$0xff]  }
 0x2ec   :  { %v10368_v1 = vadd.f32 %v10230_v34, %v4076_v48  ;;  %v10379_v18 = vadd.f32 %v10264_v6, %v4198_v49  ;;  %v7926_v6 = vld [vmem:[%s11827_s5 + $0x4] ss:$16 sps:$4 sm:$0xff]   ;;  %v7930_v27 = vld [vmem:[%s11827_s5 + $0x20] ss:$16 sps:$4 sm:$0xff]   ;;  %6642 = vmatprep.subr.bf16.mxu1 %v7929_v5  ;;  %v7933_v48 = vld [vmem:[%s11827_s5 + $0x28] ss:$16 sps:$4 sm:$0xff]  }
 0x2ed   :  { %v4328_v23 = vsel %vm4320_vm0, %v10364_v22, 0.0  ;;  %v4332_v34 = vsel %vm4320_vm0, %v10373_v14, 0.0  ;;  %6398 = vmatprep.subr.bf16.mxu0 %v7926_v6  ;;  %v7932_v26 = vld [vmem:[%s11827_s5 + $0x24] ss:$16 sps:$4 sm:$0xff]   ;;  %6643 = vmatpush1.bf16.msra.mxu1 %v7927_v50  ;;  %v7936_v46 = vld [vmem:[%s11827_s5 + $0x40] ss:$16 sps:$4 sm:$0xff]  }
 0x2ee   :  { %v4329_v31 = vadd.f32 %v4328_v23, %v4327_v51  ;;  %v4330_v43 = vsel %vm4320_vm0, %v10368_v1, 0.0  ;;  %v4334_v35 = vsel %vm4320_vm0, %v10379_v18, 0.0  ;;  %6399 = vmatpush1.bf16.msra.mxu0 %v7924_v0  ;;  %v7938_v49 = vld [vmem:[%s11827_s5 + $0x44] ss:$16 sps:$4 sm:$0xff]   ;;  %6644 = vmatprep.subr.bf16.mxu1 %v7935_v57  ;;  %v7941_v16 = vld [vmem:[%s11827_s5 + $0x4c] ss:$16 sps:$4 sm:$0xff]  }
 0x2ef   :  { %4318 = vadd.xlane.f32.xlu1 %v4317_v20  ;;  %6400 = vmatprep.subr.bf16.mxu0 %v7932_v26  ;;  %v7939_v51 = vld [vmem:[%s11827_s5 + $0x48] ss:$16 sps:$4 sm:$0xff]   ;;  %v7944_v4 = vld [vmem:[%s11827_s5 + $0x64] ss:$16 sps:$4 sm:$0xff]   ;;  %v7947_v23 = vld [vmem:[%s11827_s5 + $0x6c] ss:$16 sps:$4 sm:$0xff]  }
 0x2f0   :  { %v4331_v13 = vadd.f32 %v4330_v43, %v4329_v31  ;;  %v7942_v20 = vld [vmem:[%s11827_s5 + $0x60] ss:$16 sps:$4 sm:$0xff]   ;;  %v7945_v31 = vld [vmem:[%s11827_s5 + $0x68] ss:$16 sps:$4 sm:$0xff]   ;;  %v7950_v43 = vld [vmem:[%s11827_s5 + $0x84] ss:$16 sps:$4 sm:$0xff]  }
 0x2f1   :  { %6645 = vmatpush1.bf16.msra.mxu1 %v7933_v48  ;;  %v7954_v0 = vld [vmem:[%s11827_s5 + $0xa0] ss:$16 sps:$4 sm:$0xff]   ;;  %v7957_v6 = vld [vmem:[%s11827_s5 + $0xa8] ss:$16 sps:$4 sm:$0xff]   ;;  %v7962_v50 = vld [vmem:[%s11827_s5 + $0xc4] ss:$16 sps:$4 sm:$0xff]  }
 0x2f2   :  { %v4333_v38 = vadd.f32 %v4332_v34, %v4331_v13  ;;  %6401 = vmatpush1.bf16.msra.mxu0 %v7930_v27  ;;  %6646 = vmatprep.subr.bf16.mxu1 %v7941_v16  ;;  %v7953_v13 = vld [vmem:[%s11827_s5 + $0x8c] ss:$16 sps:$4 sm:$0xff]   ;;  %v7948_v34 = vld [vmem:[%s11827_s5 + $0x80] ss:$16 sps:$4 sm:$0xff]   ;;  %v7963_v26 = vld [vmem:[%s11827_s5 + $0xc8] ss:$16 sps:$4 sm:$0xff]  }
 0x2f3   :  { %6402 = vmatprep.subr.bf16.mxu0 %v7938_v49  ;;  %v7960_v5 = vld [vmem:[%s11827_s5 + $0xc0] ss:$16 sps:$4 sm:$0xff]   ;;  %v7965_v27 = vld [vmem:[%s11827_s5 + $0xcc] ss:$16 sps:$4 sm:$0xff]   ;;  %v7968_v48 = vld [vmem:[%s11827_s5 + $0xe4] ss:$16 sps:$4 sm:$0xff]  }
 0x2f4   :  { %v4335_v44 = vadd.f32 %v4334_v35, %v4333_v38  ;;  %v7951_v38 = vld [vmem:[%s11827_s5 + $0x88] ss:$16 sps:$4 sm:$0xff]   ;;  %v7956_v35 = vld [vmem:[%s11827_s5 + $0xa4] ss:$16 sps:$4 sm:$0xff]   ;;  %v7971_v57 = vld [vmem:[%s11827_s5 + $0xec] ss:$16 sps:$4 sm:$0xff]  }
 0x2f5   :  { %6647 = vmatpush1.bf16.msra.mxu1 %v7939_v51  ;;  %v7966_v49 = vld [vmem:[%s11827_s5 + $0xe0] ss:$16 sps:$4 sm:$0xff]   ;;  %v7974_v16 = vld [vmem:[%s11827_s5 + $0x104] ss:$16 sps:$4 sm:$0xff]   ;;  %v7977_v51 = vld [vmem:[%s11827_s5 + $0x10c] ss:$16 sps:$4 sm:$0xff]  }
 0x2f6   :  { %4336 = vadd.xlane.f32.xlu0 %v4335_v44  ;;  %6403 = vmatpush1.bf16.msra.mxu0 %v7936_v46  ;;  %v7959_v44 = vld [vmem:[%s11827_s5 + $0xac] ss:$16 sps:$4 sm:$0xff]   ;;  %v7969_v46 = vld [vmem:[%s11827_s5 + $0xe8] ss:$16 sps:$4 sm:$0xff]  }
 0x2f7   :  { %6404 = vmatprep.subr.bf16.mxu0 %v7944_v4  ;;  %6648 = vmatprep.subr.bf16.mxu1 %v7947_v23  ;;  %v7972_v4 = vld [vmem:[%s11827_s5 + $0x100] ss:$16 sps:$4 sm:$0xff]   ;;  %v7975_v23 = vld [vmem:[%s11827_s5 + $0x108] ss:$16 sps:$4 sm:$0xff]  }
 0x2f9   :  { %6649 = vmatpush1.bf16.msra.mxu1 %v7945_v31 }
 0x2fa   :  { %6405 = vmatpush1.bf16.msra.mxu0 %v7942_v20  ;;  %6650 = vmatprep.subr.bf16.mxu1 %v7953_v13 }
 0x2fb   :  { %6406 = vmatprep.subr.bf16.mxu0 %v7950_v43 }
 0x2fd   :  { %6651 = vmatpush1.bf16.msra.mxu1 %v7951_v38 }
 0x2fe   :  { %6407 = vmatpush1.bf16.msra.mxu0 %v7948_v34  ;;  %6652 = vmatprep.subr.bf16.mxu1 %v7959_v44 }
 0x2ff   :  { %6408 = vmatprep.subr.bf16.mxu0 %v7956_v35 }
 0x301   :  { %6653 = vmatpush1.bf16.msra.mxu1 %v7957_v6 }
 0x302   :  { %6409 = vmatpush1.bf16.msra.mxu0 %v7954_v0  ;;  %6654 = vmatprep.subr.bf16.mxu1 %v7965_v27 }
 0x303   :  { %6410 = vmatprep.subr.bf16.mxu0 %v7962_v50 }
 0x305   :  { %6655 = vmatpush1.bf16.msra.mxu1 %v7963_v26 }
 0x306   :  { %6411 = vmatpush1.bf16.msra.mxu0 %v7960_v5  ;;  %6656 = vmatprep.subr.bf16.mxu1 %v7971_v57 }
 0x307   :  { %6412 = vmatprep.subr.bf16.mxu0 %v7968_v48 }
 0x309   :  { %6657 = vmatpush1.bf16.msra.mxu1 %v7969_v46 }
 0x30a   :  { %6413 = vmatpush1.bf16.msra.mxu0 %v7966_v49  ;;  %6658 = vmatprep.subr.bf16.mxu1 %v7977_v51 }
 0x30b   :  { %6414 = vmatprep.subr.bf16.mxu0 %v7974_v16 }
 0x30d   :  { %6659 = vmatpush1.bf16.msra.mxu1 %v7975_v23 }
 0x30e   :  { %6415 = vmatpush1.bf16.msra.mxu0 %v7972_v4 }
 0x370   :  { %v4292_v20 = vpop.xlane.xlu0 %4291 }
 0x371   :  { %v4339_v31 = vmul.f32 0.0009765625, %v4292_v20 }
 0x373   :  { %v10494_v43 = vsub.f32 %v10185_v32, %v4339_v31  ;;  %v10497_v13 = vsub.f32 %v10187_v10, %v4339_v31  ;;  %v10500_v34 = vsub.f32 %v10205_v3, %v4339_v31  ;;  %v10503_v44 = vsub.f32 %v10234_v59, %v4339_v31 }
 0x374   :  { %v4301_v38 = vpop.xlane.xlu0 %4300  ;;  %v10510_v32 = vsub.f32 %v10247_v54, %v4339_v31  ;;  %v10513_v10 = vsub.f32 %v10259_v2, %v4339_v31  ;;  %v10524_v26 = vsub.f32 %v10284_v56, %v4339_v31  ;;  %v10530_v2 = vsub.f32 %v10294_v29, %v4339_v31 }
 0x375   :  { %v4340_v35 = vmul.f32 0.0009765625, %v4301_v38  ;;  %v4384_v0 = vmul.f32 %v10494_v43, %v10494_v43  ;;  %v4385_v6 = vmul.f32 %v10497_v13, %v10497_v13  ;;  %v4386_v3 = vmul.f32 %v10500_v34, %v10500_v34 }
 0x376   :  { %v4387_v57 = vmul.f32 %v10503_v44, %v10503_v44  ;;  %v4389_v29 = vmul.f32 %v10513_v10, %v10513_v10  ;;  %v4390_v38 = vmul.f32 %v10524_v26, %v10524_v26 }
 0x377   :  { %v4424_v50 = vadd.f32 %v4385_v6, %v4384_v0  ;;  %v10518_v5 = vsub.f32 %v10194_v15, %v4340_v35  ;;  %v10521_v59 = vsub.f32 %v10196_v17, %v4340_v35  ;;  %v10527_v54 = vsub.f32 %v10218_v21, %v4340_v35 }
 0x378   :  { %v4310_v27 = vpop.xlane.xlu1 %4309  ;;  %v4388_v15 = vmul.f32 %v10510_v32, %v10510_v32  ;;  %v10537_v17 = vsub.f32 %v10244_v40, %v4340_v35  ;;  %v10546_v16 = vsub.f32 %v10267_v25, %v4340_v35  ;;  %v10549_v51 = vsub.f32 %v10278_v8, %v4340_v35 }
 0x379   :  { %v4341_v48 = vmul.f32 0.0009765625, %v4310_v27  ;;  %v4425_v49 = vadd.f32 %v4424_v50, %v4386_v3  ;;  %v4392_v56 = vmul.f32 %v10518_v5, %v10518_v5  ;;  %v4393_v21 = vmul.f32 %v10521_v59, %v10521_v59 }
 0x37a   :  { %v4394_v40 = vmul.f32 %v10527_v54, %v10527_v54  ;;  %v10562_v25 = vsub.f32 %v10297_v42, %v4340_v35  ;;  %v4391_v3 = vmul.f32 %v10530_v2, %v10530_v2  ;;  %v10574_v27 = vsub.f32 %v10324_v60, %v4340_v35 }
 0x37b   :  { %v4426_v46 = vadd.f32 %v4425_v49, %v4387_v57  ;;  %v4433_v23 = vadd.f32 %v4393_v21, %v4392_v56  ;;  %v10554_v20 = vsub.f32 %v10212_v9, %v4341_v48  ;;  %v10557_v31 = vsub.f32 %v10214_v24, %v4341_v48 }
 0x37c   :  { %v4319_v4 = vpop.xlane.xlu1 %4318  ;;  %v10565_v8 = vsub.f32 %v10254_v53, %v4341_v48  ;;  %v4395_v9 = vmul.f32 %v10537_v17, %v10537_v17  ;;  %v4396_v57 = vmul.f32 %v10546_v16, %v10546_v16  ;;  %v4397_v49 = vmul.f32 %v10549_v51, %v10549_v51 }
 0x37d   :  { %v4427_v0 = vadd.f32 %v4426_v46, %v4388_v15  ;;  %v10567_v6 = vmul.f32 0.0009765625, %v4319_v4  ;;  %v4434_v24 = vadd.f32 %v4433_v23, %v4394_v40  ;;  %v4400_v42 = vmul.f32 %v10554_v20, %v10554_v20 }
 0x37e   :  { %v4401_v53 = vmul.f32 %v10557_v31, %v10557_v31  ;;  %v10585_v56 = vsub.f32 %v10290_v39, %v4341_v48  ;;  %v4398_v60 = vmul.f32 %v10562_v25, %v10562_v25  ;;  %v10590_v35 = vsub.f32 %v10311_v55, %v4341_v48 }
 0x37f   :  { %v4428_v50 = vadd.f32 %v4427_v0, %v4389_v29  ;;  %v4435_v15 = vadd.f32 %v4434_v24, %v4395_v9  ;;  %v4402_v29 = vmul.f32 %v10565_v8, %v10565_v8  ;;  %v10596_v40 = vsub.f32 %v10225_v45, %v10567_v6 }
 0x380   :  { %v4442_v4 = vadd.f32 %v4401_v53, %v4400_v42  ;;  %v10600_v39 = vsub.f32 %v10227_v33, %v10567_v6  ;;  %v10603_v0 = vsub.f32 %v10320_v37, %v4341_v48  ;;  %v10606_v55 = vsub.f32 %v10334_v52, %v4341_v48 }
 0x381   :  { %v4429_v21 = vadd.f32 %v4428_v50, %v4390_v38  ;;  %v4436_v46 = vadd.f32 %v4435_v15, %v4396_v57  ;;  %v10610_v9 = vsub.f32 %v10272_v7, %v10567_v6  ;;  %v4403_v45 = vmul.f32 %v10585_v56, %v10585_v56 }
 0x382   :  { %11856 = vst [vmem:[#allocation8_spill] sm:$0xff] %v10606_v55  ;;  %v4443_v42 = vadd.f32 %v4442_v4, %v4402_v29  ;;  %v4399_v33 = vmul.f32 %v10574_v27, %v10574_v27  ;;  %v10617_v37 = vsub.f32 %v10346_v41, %v4341_v48  ;;  %v4408_v52 = vmul.f32 %v10596_v40, %v10596_v40 }
 0x383   :  { %v4337_v23 = vpop.xlane.xlu0 %4336  ;;  %v4430_v38 = vadd.f32 %v4429_v21, %v4391_v3  ;;  %v4437_v50 = vadd.f32 %v4436_v46, %v4397_v49  ;;  %v4409_v7 = vmul.f32 %v10600_v39, %v10600_v39  ;;  %v4404_v53 = vmul.f32 %v10590_v35, %v10590_v35 }
 0x384   :  { %v4343_v24 = vmul.f32 0.0009765625, %v4337_v23  ;;  %11857 = vst [vmem:[#allocation9_spill] sm:$0xff] %v10617_v37  ;;  %v4444_v57 = vadd.f32 %v4443_v42, %v4403_v45  ;;  %v10627_v49 = vsub.f32 %v10304_v63, %v10567_v6  ;;  %v4405_v15 = vmul.f32 %v10603_v0, %v10603_v0 }
 0x385   :  { %4431 = vadd.xlane.f32.xlu1 %v4430_v38  ;;  %v4438_v3 = vadd.f32 %v4437_v50, %v4398_v60  ;;  %v4406_v41 = vmul.f32 %v10606_v55, %v10606_v55  ;;  %v10635_v48 = vsub.f32 %v10328_v12, %v10567_v6  ;;  %v4410_v21 = vmul.f32 %v10610_v9, %v10610_v9 }
 0x386   :  { %v4445_v29 = vadd.f32 %v4444_v57, %v4404_v53  ;;  %v4451_v46 = vadd.f32 %v4409_v7, %v4408_v52  ;;  %v10640_v4 = vsub.f32 %v10275_v30, %v4343_v24  ;;  %v4407_v63 = vmul.f32 %v10617_v37, %v10617_v37 }
 0x387   :  { %v4439_v60 = vadd.f32 %v4438_v3, %v4399_v33  ;;  %v10646_v23 = vsub.f32 %v10331_v61, %v10567_v6  ;;  %v10649_v38 = vsub.f32 %v10281_v28, %v4343_v24  ;;  %v10652_v12 = vsub.f32 %v10317_v58, %v4343_v24 }
 0x388   :  { %v4446_v50 = vadd.f32 %v4445_v29, %v4405_v15  ;;  %v4411_v45 = vmul.f32 %v10627_v49, %v10627_v49  ;;  %v4452_v30 = vadd.f32 %v4451_v46, %v4410_v21  ;;  %v10657_v42 = vsub.f32 %v10343_v62, %v4343_v24 }
 0x389   :  { %4440 = vadd.xlane.f32.xlu0 %v4439_v60  ;;  %v10661_v33 = vsub.f32 %v10349_v36, %v10567_v6  ;;  %v4412_v28 = vmul.f32 %v10635_v48, %v10635_v48  ;;  %v4416_v58 = vmul.f32 %v10640_v4, %v10640_v4  ;;  %v4417_v61 = vmul.f32 %v10649_v38, %v10649_v38 }
 0x38a   :  { %11858 = vst [vmem:[#allocation10_spill] sm:$0xff] %v10657_v42  ;;  %v4447_v52 = vadd.f32 %v4446_v50, %v4406_v41  ;;  %v4453_v7 = vadd.f32 %v4452_v30, %v4411_v45  ;;  %v10670_v3 = vsub.f32 %v10364_v22, %v4343_v24  ;;  %v4418_v62 = vmul.f32 %v10652_v12, %v10652_v12 }
 0x38b   :  { %11859 = vst [vmem:[#allocation11_spill] sm:$0xff] %v10661_v33  ;;  %v10676_v36 = vsub.f32 %v10361_v47, %v10567_v6  ;;  %v4413_v53 = vmul.f32 %v10646_v23, %v10646_v23  ;;  %v10681_v57 = vsub.f32 %v10368_v1, %v4343_v24  ;;  %v4460_v15 = vsel %vm4320_vm0, %v4416_v58, 0.0 }
 0x38c   :  { %v4448_v41 = vadd.f32 %v4447_v52, %v4407_v63  ;;  %v4454_v21 = vadd.f32 %v4453_v7, %v4412_v28  ;;  %v4419_v22 = vmul.f32 %v10657_v42, %v10657_v42  ;;  %v4461_v60 = vsel %vm4320_vm0, %v4417_v61, 0.0 }
 0x38d   :  { %11860 = vst [vmem:[#allocation12_spill] sm:$0xff] %v10676_v36  ;;  %11861 = vst [vmem:[#allocation13_spill] sm:$0xff] %v10681_v57  ;;  %v4414_v29 = vmul.f32 %v10661_v33, %v10661_v33  ;;  %v4462_v47 = vadd.f32 %v4461_v60, %v4460_v15  ;;  %v10690_v46 = vsub.f32 %v10373_v14, %v4343_v24  ;;  %v4463_v63 = vsel %vm4320_vm0, %v4418_v62, 0.0 }
 0x38e   :  { %4449 = vadd.xlane.f32.xlu1 %v4448_v41  ;;  %v4455_v6 = vadd.f32 %v4454_v21, %v4413_v53  ;;  %v4420_v1 = vmul.f32 %v10670_v3, %v10670_v3  ;;  %v4415_v50 = vmul.f32 %v10676_v36, %v10676_v36  ;;  %v10698_v28 = vsub.f32 %v10379_v18, %v4343_v24  ;;  %v7978_v41 = vld [vmem:[%s11827_s5 + $0x120] ss:$16 sps:$4 sm:$0xff]   ;;  %v7980_v21 = vld [vmem:[%s11827_s5 + $0x124] ss:$16 sps:$4 sm:$0xff]  }
 0x38f   :  { %11862 = vst [vmem:[#allocation14_spill] sm:$0xff] %v10690_v46  ;;  %v4464_v45 = vadd.f32 %v4463_v63, %v4462_v47  ;;  %v4421_v58 = vmul.f32 %v10681_v57, %v10681_v57  ;;  %v4465_v61 = vsel %vm4320_vm0, %v4419_v22, 0.0  ;;  %v4422_v7 = vmul.f32 %v10690_v46, %v10690_v46  ;;  %v7981_v22 = vld [vmem:[%s11827_s5 + $0x128] ss:$16 sps:$4 sm:$0xff]   ;;  %6416 = vmatprep.subr.bf16.mxu0 %v7980_v21  ;;  %v7984_v63 = vld [vmem:[%s11827_s5 + $0x140] ss:$16 sps:$4 sm:$0xff]  }
 0x390   :  { %v4456_v30 = vadd.f32 %v4455_v6, %v4414_v29  ;;  %11863 = vst [vmem:[#allocation15_spill] sm:$0xff] %v10698_v28  ;;  %v4467_v62 = vsel %vm4320_vm0, %v4420_v1, 0.0  ;;  %v4423_v15 = vmul.f32 %v10698_v28, %v10698_v28  ;;  %v7983_v29 = vld [vmem:[%s11827_s5 + $0x12c] ss:$16 sps:$4 sm:$0xff]   ;;  %6417 = vmatpush1.bf16.msra.mxu0 %v7978_v41  ;;  %v8005_v41 = vld [vmem:[%s11827_s5 + $0x1a8] ss:$16 sps:$4 sm:$0xff]  }
 0x391   :  { %v4466_v14 = vadd.f32 %v4465_v61, %v4464_v45  ;;  %v4469_v18 = vsel %vm4320_vm0, %v4421_v58, 0.0  ;;  %v4471_v60 = vsel %vm4320_vm0, %v4422_v7, 0.0  ;;  %6660 = vmatprep.subr.bf16.mxu1 %v7983_v29  ;;  %v7987_v45 = vld [vmem:[%s11827_s5 + $0x148] ss:$16 sps:$4 sm:$0xff]   ;;  %v7992_v58 = vld [vmem:[%s11827_s5 + $0x164] ss:$16 sps:$4 sm:$0xff]  }
 0x392   :  { %v4457_v52 = vadd.f32 %v4456_v30, %v4415_v50  ;;  %v4473_v6 = vsel %vm4320_vm0, %v4423_v15, 0.0  ;;  %6661 = vmatpush1.bf16.msra.mxu1 %v7981_v22  ;;  %v7986_v50 = vld [vmem:[%s11827_s5 + $0x144] ss:$16 sps:$4 sm:$0xff]   ;;  %v7989_v30 = vld [vmem:[%s11827_s5 + $0x14c] ss:$16 sps:$4 sm:$0xff]  }
 0x393   :  { %v4468_v53 = vadd.f32 %v4467_v62, %v4466_v14  ;;  %6418 = vmatprep.subr.bf16.mxu0 %v7986_v50  ;;  %6662 = vmatprep.subr.bf16.mxu1 %v7989_v30  ;;  %v7995_v61 = vld [vmem:[%s11827_s5 + $0x16c] ss:$16 sps:$4 sm:$0xff]   ;;  %v7990_v14 = vld [vmem:[%s11827_s5 + $0x160] ss:$16 sps:$4 sm:$0xff]   ;;  %v7998_v7 = vld [vmem:[%s11827_s5 + $0x184] ss:$16 sps:$4 sm:$0xff]  }
 0x394   :  { %4458 = vadd.xlane.f32.xlu0 %v4457_v52  ;;  %6419 = vmatpush1.bf16.msra.mxu0 %v7984_v63  ;;  %v7993_v52 = vld [vmem:[%s11827_s5 + $0x168] ss:$16 sps:$4 sm:$0xff]   ;;  %v8001_v62 = vld [vmem:[%s11827_s5 + $0x18c] ss:$16 sps:$4 sm:$0xff]   ;;  %v8010_v22 = vld [vmem:[%s11827_s5 + $0x1c4] ss:$16 sps:$4 sm:$0xff]  }
 0x395   :  { %v4470_v24 = vadd.f32 %v4469_v18, %v4468_v53  ;;  %6420 = vmatprep.subr.bf16.mxu0 %v7992_v58  ;;  %v7996_v53 = vld [vmem:[%s11827_s5 + $0x180] ss:$16 sps:$4 sm:$0xff]   ;;  %v7999_v15 = vld [vmem:[%s11827_s5 + $0x188] ss:$16 sps:$4 sm:$0xff]   ;;  %v8007_v21 = vld [vmem:[%s11827_s5 + $0x1ac] ss:$16 sps:$4 sm:$0xff]  }
 0x396   :  { %6663 = vmatpush1.bf16.msra.mxu1 %v7987_v45  ;;  %v8002_v18 = vld [vmem:[%s11827_s5 + $0x1a0] ss:$16 sps:$4 sm:$0xff]   ;;  %v8017_v63 = vld [vmem:[%s11827_s5 + $0x1e8] ss:$16 sps:$4 sm:$0xff]   ;;  %v8019_v50 = vld [vmem:[%s11827_s5 + $0x1ec] ss:$16 sps:$4 sm:$0xff]  }
 0x397   :  { %v4472_v47 = vadd.f32 %v4471_v60, %v4470_v24  ;;  %6664 = vmatprep.subr.bf16.mxu1 %v7995_v61  ;;  %v8004_v24 = vld [vmem:[%s11827_s5 + $0x1a4] ss:$16 sps:$4 sm:$0xff]   ;;  %v8013_v60 = vld [vmem:[%s11827_s5 + $0x1cc] ss:$16 sps:$4 sm:$0xff]   ;;  %v8008_v29 = vld [vmem:[%s11827_s5 + $0x1c0] ss:$16 sps:$4 sm:$0xff]  }
 0x398   :  { %6421 = vmatpush1.bf16.msra.mxu0 %v7990_v14  ;;  %v8022_v45 = vld [vmem:[%s11827_s5 + $0x204] ss:$16 sps:$4 sm:$0xff]   ;;  %v8025_v30 = vld [vmem:[%s11827_s5 + $0x20c] ss:$16 sps:$4 sm:$0xff]  }
 0x399   :  { %v4474_v1 = vadd.f32 %v4473_v6, %v4472_v47  ;;  %6422 = vmatprep.subr.bf16.mxu0 %v7998_v7  ;;  %v8011_v47 = vld [vmem:[%s11827_s5 + $0x1c8] ss:$16 sps:$4 sm:$0xff]   ;;  %v8016_v6 = vld [vmem:[%s11827_s5 + $0x1e4] ss:$16 sps:$4 sm:$0xff]  }
 0x39a   :  { %6665 = vmatpush1.bf16.msra.mxu1 %v7993_v52 }
 0x39b   :  { %4475 = vadd.xlane.f32.xlu1 %v4474_v1  ;;  %6666 = vmatprep.subr.bf16.mxu1 %v8001_v62  ;;  %v8014_v1 = vld [vmem:[%s11827_s5 + $0x1e0] ss:$16 sps:$4 sm:$0xff]  }
 0x39c   :  { %6423 = vmatpush1.bf16.msra.mxu0 %v7996_v53  ;;  %v10804_v53 = vld [vmem:[%s11826_s4 + $0x1] ss:$4 sm:$0xff] }
 0x39d   :  { %6424 = vmatprep.subr.bf16.mxu0 %v8004_v24  ;;  %v10809_v24 = vld [vmem:[%s11826_s4 + $0x2] ss:$4 sm:$0xff] }
 0x39e   :  { %6667 = vmatpush1.bf16.msra.mxu1 %v7999_v15 }
 0x39f   :  { %6668 = vmatprep.subr.bf16.mxu1 %v8007_v21  ;;  %v10817_v21 = vrot.slane %v10804_v53, %v10176_v11 }
 0x3a0   :  { %6425 = vmatpush1.bf16.msra.mxu0 %v8002_v18 }
 0x3a1   :  { %6426 = vmatprep.subr.bf16.mxu0 %v8010_v22 }
 0x3a2   :  { %6669 = vmatpush1.bf16.msra.mxu1 %v8005_v41  ;;  %v10813_v41 = vrot.slane %v10804_v53, %v10174_v19 }
 0x3a3   :  { %6670 = vmatprep.subr.bf16.mxu1 %v8013_v60 }
 0x3a4   :  { %6427 = vmatpush1.bf16.msra.mxu0 %v8008_v29  ;;  %v11864_v29 = vld [vmem:[#allocation2_spill] sm:$0xff] }
 0x3a5   :  { %6428 = vmatprep.subr.bf16.mxu0 %v8016_v6  ;;  %v11865_v6 = vld [vmem:[#allocation4_spill] sm:$0xff]  ;;  %v10875_v28 = vrot.slane %v10809_v24, %v11864_v29 }
 0x3a6   :  { %6671 = vmatpush1.bf16.msra.mxu1 %v8011_v47  ;;  %v10823_v47 = vrot.slane %v10804_v53, %v11864_v29 }
 0x3a7   :  { %6672 = vmatprep.subr.bf16.mxu1 %v8019_v50  ;;  %v10833_v50 = vrot.slane %v10809_v24, %v10176_v11 }
 0x3a8   :  { %6429 = vmatpush1.bf16.msra.mxu0 %v8014_v1  ;;  %v10827_v1 = vrot.slane %v10804_v53, %v11865_v6 }
 0x3a9   :  { %6459 = vmatprep.subr.bf16.mxu0 %v8022_v45 }
 0x3aa   :  { %6673 = vmatpush1.bf16.msra.mxu1 %v8017_v63 }
 0x3ab   :  { %6703 = vmatprep.subr.bf16.mxu1 %v8025_v30  ;;  %v10839_v30 = vrot.slane %v10809_v24, %v10174_v19 }
 0x412   :  { %v4432_v58 = vpop.xlane.xlu1 %4431 }
 0x413   :  { %v4477_v61 = vmul.f32 0.0009765625, %v4432_v58 }
 0x415   :  { %v4482_v14 = vadd.f32 1e-05, %v4477_v61 }
 0x416   :  { %v4441_v52 = vpop.xlane.xlu0 %4440 }
 0x417   :  { %8308 = vrsqrt.f32 %v4482_v14  ;;  %v4478_v7 = vmul.f32 0.0009765625, %v4441_v52 }
 0x419   :  { %v4483_v62 = vadd.f32 1e-05, %v4478_v7  ;;  %v11866_v7 = vld [vmem:[#allocation3_spill] sm:$0xff] }
 0x41b   :  { %8310 = vrsqrt.f32 %v4483_v62  ;;  %v4450_v15 = vpop.xlane.xlu1 %4449  ;;  %v10849_v62 = vrot.slane %v10804_v53, %v11866_v7 }
 0x41c   :  { %v4479_v18 = vmul.f32 0.0009765625, %v4450_v15 }
 0x41e   :  { %v4484_v22 = vadd.f32 1e-05, %v4479_v18 }
 0x420   :  { %8312 = vrsqrt.f32 %v4484_v22 }
 0x421   :  { %v10819_v60 = vpop.eup %8308  ;;  %v4459_v58 = vpop.xlane.xlu0 %4458 }
 0x422   :  { %v4493_v63 = vmul.f32 %v10819_v60, %v10497_v13  ;;  %v4492_v45 = vmul.f32 %v10819_v60, %v10494_v43  ;;  %v4494_v61 = vmul.f32 %v10819_v60, %v10500_v34  ;;  %v4496_v14 = vmul.f32 %v10819_v60, %v10510_v32  ;;  %v11867_v32 = vld [vmem:[#allocation5_spill] sm:$0xff] }
 0x423   :  { %v4480_v52 = vmul.f32 0.0009765625, %v4459_v58  ;;  %v4495_v19 = vmul.f32 %v10819_v60, %v10503_v44  ;;  %v10861_v18 = vrot.slane %v10804_v53, %v11867_v32 }
 0x424   :  { %v4576_v13 = vmul.f32 %v10817_v21, %v4493_v63  ;;  %v4575_v11 = vmul.f32 %v10813_v41, %v4492_v45  ;;  %v4577_v43 = vmul.f32 %v10823_v47, %v4494_v61  ;;  %v10855_v15 = vmul.f32 %v10827_v1, %v4496_v14 }
 0x425   :  { %v10857_v34 = vpop.eup %8310  ;;  %v4485_v22 = vadd.f32 1e-05, %v4480_v52  ;;  %v4497_v45 = vmul.f32 %v10819_v60, %v10513_v10  ;;  %v10879_v52 = vrot.slane %v10809_v24, %v11865_v6  ;;  %v10883_v10 = vrot.slane %v10809_v24, %v11866_v7 }
 0x426   :  { %v4659_v63 = vadd.f32 %v10833_v50, %v4576_v13  ;;  %v4501_v44 = vmul.f32 %v10857_v34, %v10521_v59  ;;  %v4500_v58 = vmul.f32 %v10857_v34, %v10518_v5  ;;  %v4658_v61 = vadd.f32 %v10839_v30, %v4575_v11 }
 0x427   :  { %v4502_v14 = vmul.f32 %v10857_v34, %v10527_v54  ;;  %8314 = vrsqrt.f32 %v4485_v22  ;;  %v4578_v13 = vmul.f32 %v10849_v62, %v4495_v19  ;;  %v10890_v54 = vrot.slane %v10809_v24, %v11867_v32 }
 0x428   :  { %v4584_v5 = vmul.f32 %v10817_v21, %v4501_v44  ;;  %v4583_v59 = vmul.f32 %v10813_v41, %v4500_v58  ;;  %v4476_v29 = vpop.xlane.xlu1 %4475  ;;  %v4739_v11 = vmul.f32 0.01, %v4659_v63  ;;  %v4503_v6 = vmul.f32 %v10857_v34, %v10537_v17 }
 0x429   :  { %v4585_v22 = vmul.f32 %v10823_v47, %v4502_v14  ;;  %v10896_v7 = vmul.f32 %v10861_v18, %v4497_v45  ;;  %v4481_v57 = vmul.f32 0.0009765625, %v4476_v29  ;;  %v4738_v19 = vmul.f32 0.01, %v4658_v61 }
 0x42a   :  { %v4667_v44 = vadd.f32 %v10833_v50, %v4584_v5  ;;  %v4666_v58 = vadd.f32 %v10839_v30, %v4583_v59  ;;  %v10900_v42 = vpop.eup %8312  ;;  %vm4699_vm1 = vcmp.ge.f32.partialorder %v4659_v63, 0.0  ;;  %vm4698_vm2 = vcmp.ge.f32.partialorder %v4658_v61, 0.0 }
 0x42b   :  { %v4660_v32 = vadd.f32 %v10875_v28, %v4577_v43  ;;  %v4668_v46 = vadd.f32 %v10875_v28, %v4585_v22  ;;  %v4486_v17 = vadd.f32 1e-05, %v4481_v57  ;;  %v4509_v29 = vmul.f32 %v10900_v42, %v10557_v31  ;;  %v8020_v57 = vld [vmem:[%s11827_s5 + $0x200] ss:$16 sps:$4 sm:$0xff]   ;;  %v8023_v22 = vld [vmem:[%s11827_s5 + $0x208] ss:$16 sps:$4 sm:$0xff]  }
 0x42c   :  { %vm4707_vm3 = vcmp.ge.f32.partialorder %v4667_v44, 0.0  ;;  %v4747_v14 = vmul.f32 0.01, %v4667_v44  ;;  %vm4706_vm4 = vcmp.ge.f32.partialorder %v4666_v58, 0.0  ;;  %v4746_v45 = vmul.f32 0.01, %v4666_v58 }
 0x42d   :  { %v4508_v5 = vmul.f32 %v10900_v42, %v10554_v20  ;;  %v4586_v59 = vmul.f32 %v10849_v62, %v4503_v6  ;;  %8316 = vrsqrt.f32 %v4486_v17  ;;  %v4779_v33 = vsel %vm4699_vm1, %v4659_v63, %v4739_v11  ;;  %v8028_v20 = vld [vmem:[%s11827_s5 + $0x224] ss:$16 sps:$4 sm:$0xff]  }
 0x42e   :  { %v4787_v55 = vsel %vm4707_vm3, %v4667_v44, %v4747_v14  ;;  %v4778_v36 = vsel %vm4698_vm2, %v4658_v61, %v4738_v19  ;;  %v4786_v37 = vsel %vm4706_vm4, %v4666_v58, %v4746_v45  ;;  %v4592_v31 = vmul.f32 %v10817_v21, %v4509_v29 }
 0x42f   :  { %v4819_v43 = vpack.c.bf16 %v4787_v55, %v4779_v33  ;;  %v4591_v63 = vmul.f32 %v10813_v41, %v4508_v5  ;;  %v4818_v11 = vpack.c.bf16 %v4786_v37, %v4778_v36  ;;  %v8031_v55 = vld [vmem:[%s11827_s5 + $0x22c] ss:$16 sps:$4 sm:$0xff]   ;;  %v10924_v33 = vadd.f32 %v10883_v10, %v4578_v13  ;;  %v8026_v37 = vld [vmem:[%s11827_s5 + $0x220] ss:$16 sps:$4 sm:$0xff]   ;;  %v8029_v36 = vld [vmem:[%s11827_s5 + $0x228] ss:$16 sps:$4 sm:$0xff]  }
 0x430   :  { %vm4700_vm5 = vcmp.ge.f32.partialorder %v4660_v32, 0.0  ;;  %v4740_v61 = vmul.f32 0.01, %v4660_v32  ;;  %v4675_v44 = vadd.f32 %v10833_v50, %v4592_v31  ;;  %vm4708_vm6 = vcmp.ge.f32.partialorder %v4668_v46, 0.0 }
 0x431   :  { %v10926_v6 = vpop.eup %8314  ;;  %6430 = vmatprep.mubr.bf16.mxu0 %v4819_v43  ;;  %6674 = vmatprep.mubr.bf16.mxu1 %v4819_v43  ;;  %v4674_v58 = vadd.f32 %v10839_v30, %v4591_v63  ;;  %v4748_v19 = vmul.f32 0.01, %v4668_v46  ;;  %v10941_v14 = vadd.f32 %v10883_v10, %v4586_v59  ;;  %v4511_v31 = vmul.f32 %v10900_v42, %v10585_v56 }
 0x432   :  { %6431 = vmatmul.mubr.bf16.vlgmr.msra.gmra.mrb[48].mxu0 %v4818_v11  ;;  %6675 = vmatmul.mubr.bf16.vlgmr.msra.gmra.mrb[48].mxu1 %v4818_v11  ;;  %v4517_v13 = vmul.f32 %v10926_v6, %v10600_v39  ;;  %v4516_v17 = vmul.f32 %v10926_v6, %v10596_v40  ;;  %vm4715_vm7 = vcmp.ge.f32.partialorder %v4675_v44, 0.0  ;;  %v4755_v45 = vmul.f32 0.01, %v4675_v44  ;;  %v8034_v39 = vld [vmem:[%s11827_s5 + $0x244] ss:$16 sps:$4 sm:$0xff]  }
 0x433   :  { %6460 = vmatpush1.bf16.msra.mxu0 %v8020_v57  ;;  %6704 = vmatpush1.bf16.msra.mxu1 %v8023_v22  ;;  %v4754_v29 = vmul.f32 0.01, %v4674_v58  ;;  %v4780_v5 = vsel %vm4700_vm5, %v4660_v32, %v4740_v61  ;;  %v8037_v40 = vld [vmem:[%s11827_s5 + $0x24c] ss:$16 sps:$4 sm:$0xff]   ;;  %vm4714_vm8 = vcmp.ge.f32.partialorder %v4674_v58, 0.0  ;;  %v4788_v57 = vsel %vm4708_vm6, %v4668_v46, %v4748_v19 }
 0x434   :  { %6461 = vmatprep.subr.bf16.mxu0 %v8028_v20  ;;  %6705 = vmatprep.subr.bf16.mxu1 %v8031_v55  ;;  %v4600_v43 = vmul.f32 %v10817_v21, %v4517_v13  ;;  %v4599_v59 = vmul.f32 %v10813_v41, %v4516_v17  ;;  %v4795_v22 = vsel %vm4715_vm7, %v4675_v44, %v4755_v45  ;;  %v10954_v32 = vmul.f32 0.01, %v10924_v33  ;;  %v8032_v11 = vld [vmem:[%s11827_s5 + $0x240] ss:$16 sps:$4 sm:$0xff]   ;;  %v8035_v55 = vld [vmem:[%s11827_s5 + $0x248] ss:$16 sps:$4 sm:$0xff]  }
 0x435   :  { %v10956_v20 = vpack.c.bf16 %v4788_v57, %v4780_v5  ;;  %vm4701_vm9 = vcmp.ge.f32.partialorder %v10924_v33, 0.0  ;;  %v4519_v61 = vmul.f32 %v10926_v6, %v10627_v49  ;;  %v4510_v56 = vmul.f32 %v10900_v42, %v10565_v8  ;;  %v8040_v19 = vld [vmem:[%s11827_s5 + $0x264] ss:$16 sps:$4 sm:$0xff]   ;;  %v8043_v13 = vld [vmem:[%s11827_s5 + $0x26c] ss:$16 sps:$4 sm:$0xff]  }
 0x436   :  { %v4683_v63 = vadd.f32 %v10833_v50, %v4600_v43  ;;  %v4682_v46 = vadd.f32 %v10839_v30, %v4599_v59  ;;  %v4794_v44 = vsel %vm4714_vm8, %v4674_v58, %v4754_v29  ;;  %vm4709_vm10 = vcmp.ge.f32.partialorder %v10941_v14, 0.0 }
 0x437   :  { %6462 = vmatpush1.bf16.msra.mxu0 %v8026_v37  ;;  %6706 = vmatpush1.bf16.msra.mxu1 %v8029_v36  ;;  %v4594_v17 = vmul.f32 %v10849_v62, %v4511_v31  ;;  %v4518_v49 = vmul.f32 %v10926_v6, %v10610_v9  ;;  %v10983_v45 = vpop.eup %8316  ;;  %v4602_v29 = vmul.f32 %v10849_v62, %v4519_v61 }
 0x438   :  { %vm4723_vm11 = vcmp.ge.f32.partialorder %v4683_v63, 0.0  ;;  %v4763_v8 = vmul.f32 0.01, %v4683_v63  ;;  %6463 = vmatprep.subr.bf16.mxu0 %v8034_v39  ;;  %6707 = vmatprep.subr.bf16.mxu1 %v8037_v40  ;;  %vm4722_vm12 = vcmp.ge.f32.partialorder %v4682_v46, 0.0  ;;  %v4762_v58 = vmul.f32 0.01, %v4682_v46 }
 0x439   :  { %v4525_v37 = vmul.f32 %v10983_v45, %v10649_v38  ;;  %v4524_v36 = vmul.f32 %v10983_v45, %v10640_v4  ;;  %v4677_v5 = vadd.f32 %v10883_v10, %v4594_v17  ;;  %v4593_v59 = vmul.f32 %v10823_v47, %v4510_v56  ;;  %v8038_v38 = vld [vmem:[%s11827_s5 + $0x260] ss:$16 sps:$4 sm:$0xff]   ;;  %v8041_v4 = vld [vmem:[%s11827_s5 + $0x268] ss:$16 sps:$4 sm:$0xff]  }
 0x43a   :  { %v4803_v43 = vsel %vm4723_vm11, %v4683_v63, %v4763_v8  ;;  %v4802_v9 = vsel %vm4722_vm12, %v4682_v46, %v4762_v58  ;;  %v4601_v57 = vmul.f32 %v10823_v47, %v4518_v49  ;;  %v8049_v63 = vld [vmem:[%s11827_s5 + $0x28c] ss:$16 sps:$4 sm:$0xff]   ;;  %v8044_v56 = vld [vmem:[%s11827_s5 + $0x280] ss:$16 sps:$4 sm:$0xff]  }
 0x43b   :  { %v4827_v39 = vpack.c.bf16 %v4803_v43, %v4795_v22  ;;  %v4826_v40 = vpack.c.bf16 %v4802_v9, %v4794_v44  ;;  %6464 = vmatpush1.bf16.msra.mxu0 %v8032_v11  ;;  %6708 = vmatpush1.bf16.msra.mxu1 %v8035_v55  ;;  %v4608_v31 = vmul.f32 %v10817_v21, %v4525_v37  ;;  %vm4717_vm13 = vcmp.ge.f32.partialorder %v4677_v5, 0.0  ;;  %v8046_v22 = vld [vmem:[%s11827_s5 + $0x284] ss:$16 sps:$4 sm:$0xff]  }
 0x43c   :  { %6465 = vmatprep.subr.bf16.mxu0 %v8040_v19  ;;  %6709 = vmatprep.subr.bf16.mxu1 %v8043_v13  ;;  %v4607_v11 = vmul.f32 %v10813_v41, %v4524_v36  ;;  %v4685_v55 = vadd.f32 %v10883_v10, %v4602_v29  ;;  %v4757_v46 = vmul.f32 0.01, %v4677_v5  ;;  %v4676_v61 = vadd.f32 %v10875_v28, %v4593_v59  ;;  %v8047_v13 = vld [vmem:[%s11827_s5 + $0x288] ss:$16 sps:$4 sm:$0xff]   ;;  %v8052_v29 = vld [vmem:[%s11827_s5 + $0x2a4] ss:$16 sps:$4 sm:$0xff]  }
 0x43d   :  { %6440 = vmatprep.mubr.bf16.mxu0 %v4827_v39  ;;  %6684 = vmatprep.mubr.bf16.mxu1 %v4827_v39  ;;  %v4691_v21 = vadd.f32 %v10833_v50, %v4608_v31  ;;  %v4749_v44 = vmul.f32 0.01, %v10941_v14  ;;  %v4684_v19 = vadd.f32 %v10875_v28, %v4601_v57  ;;  %v4505_v41 = vmul.f32 %v10857_v34, %v10549_v51 }
 0x43e   :  { %6441 = vmatmul.mubr.bf16.gmra.mrb[52].mxu0 %v4826_v40  ;;  %6685 = vmatmul.mubr.bf16.gmra.mrb[52].mxu1 %v4826_v40  ;;  %v4690_v17 = vadd.f32 %v10839_v30, %v4607_v11  ;;  %vm4725_vm14 = vcmp.ge.f32.partialorder %v4685_v55, 0.0  ;;  %v4765_v50 = vmul.f32 0.01, %v4685_v55  ;;  %v4797_v49 = vsel %vm4717_vm13, %v4677_v5, %v4757_v46  ;;  %v8055_v5 = vld [vmem:[%s11827_s5 + $0x2ac] ss:$16 sps:$4 sm:$0xff]  }
 0x43f   :  { %6466 = vmatpush1.bf16.msra.mxu0 %v8038_v38  ;;  %6710 = vmatpush1.bf16.msra.mxu1 %v8041_v4  ;;  %vm4731_vm15 = vcmp.ge.f32.partialorder %v4691_v21, 0.0  ;;  %v4771_v8 = vmul.f32 0.01, %v4691_v21  ;;  %vm4716_vm0 = vcmp.ge.f32.partialorder %v4676_v61, 0.0  ;;  %vm4724_vm1 = vcmp.ge.f32.partialorder %v4684_v19, 0.0 }
 0x440   :  { %6467 = vmatprep.subr.bf16.mxu0 %v8046_v22  ;;  %6711 = vmatprep.subr.bf16.mxu1 %v8049_v63  ;;  %vm4730_vm2 = vcmp.ge.f32.partialorder %v4690_v17, 0.0  ;;  %v4770_v51 = vmul.f32 0.01, %v4690_v17  ;;  %v4805_v58 = vsel %vm4725_vm14, %v4685_v55, %v4765_v50  ;;  %v4756_v37 = vmul.f32 0.01, %v4676_v61 }
 0x441   :  { %v4811_v36 = vsel %vm4731_vm15, %v4691_v21, %v4771_v8  ;;  %v4781_v30 = vsel %vm4701_vm9, %v10924_v33, %v10954_v32  ;;  %v11032_v43 = vpack.c.bf16 %v4805_v58, %v4797_v49  ;;  %v4764_v9 = vmul.f32 0.01, %v4684_v19  ;;  %v8050_v4 = vld [vmem:[%s11827_s5 + $0x2a0] ss:$16 sps:$4 sm:$0xff]   ;;  %v8058_v11 = vld [vmem:[%s11827_s5 + $0x2c4] ss:$16 sps:$4 sm:$0xff]  }
 0x442   :  { %v4835_v59 = vpack.c.bf16 %v4811_v36, %v4811_v36  ;;  %v4810_v57 = vsel %vm4730_vm2, %v4690_v17, %v4770_v51  ;;  %v4789_v39 = vsel %vm4709_vm10, %v10941_v14, %v4749_v44  ;;  %v4526_v33 = vmul.f32 %v10983_v45, %v10652_v12  ;;  %v8053_v14 = vld [vmem:[%s11827_s5 + $0x2a8] ss:$16 sps:$4 sm:$0xff]   ;;  %v8061_v55 = vld [vmem:[%s11827_s5 + $0x2cc] ss:$16 sps:$4 sm:$0xff]   ;;  %v8056_v44 = vld [vmem:[%s11827_s5 + $0x2c0] ss:$16 sps:$4 sm:$0xff]  }
 0x443   :  { %v4834_v32 = vpack.c.bf16 %v4810_v57, %v4810_v57  ;;  %6468 = vmatpush1.bf16.msra.mxu0 %v8044_v56  ;;  %6712 = vmatpush1.bf16.msra.mxu1 %v8047_v13  ;;  %v4796_v40 = vsel %vm4716_vm0, %v4676_v61, %v4756_v37  ;;  %v4804_v38 = vsel %vm4724_vm1, %v4684_v19, %v4764_v9  ;;  %v11868_v17 = vld [vmem:[#allocation7_spill] sm:$0xff] }
 0x444   :  { %6450 = vmatprep.mubr.bf16.mxu0 %v4835_v59  ;;  %6694 = vmatprep.mubr.bf16.mxu1 %v4835_v59  ;;  %v11047_v31 = vpack.c.bf16 %v4804_v38, %v4796_v40  ;;  %v4609_v12 = vmul.f32 %v10823_v47, %v4526_v33  ;;  %v4588_v22 = vmul.f32 %v10861_v18, %v4505_v41  ;;  %v8073_v59 = vld [vmem:[%s11827_s5 + $0x30c] ss:$16 sps:$4 sm:$0xff]  }
 0x445   :  { %v4821_v63 = vpack.c.bf16 %v4789_v39, %v4781_v30  ;;  %6469 = vmatprep.subr.bf16.mxu0 %v8052_v29  ;;  %6713 = vmatprep.subr.bf16.mxu1 %v8055_v5  ;;  %v4663_v46 = vadd.f32 %v10890_v54, %v10896_v7  ;;  %v4504_v61 = vmul.f32 %v10857_v34, %v10546_v16  ;;  %v8059_v16 = vld [vmem:[%s11827_s5 + $0x2c8] ss:$16 sps:$4 sm:$0xff]   ;;  %v8062_v30 = vld [vmem:[%s11827_s5 + $0x2e0] ss:$16 sps:$4 sm:$0xff]  }
 0x446   :  { %6451 = vmatmul.mubr.bf16.gmra.mrb[56].mxu0 %v4834_v32  ;;  %6695 = vmatmul.mubr.bf16.gmra.mrb[56].mxu1 %v4834_v32  ;;  %v11062_v47 = vadd.f32 %v10875_v28, %v4609_v12  ;;  %v4671_v21 = vadd.f32 %v10890_v54, %v4588_v22  ;;  %v4662_v56 = vadd.f32 %v10879_v52, %v10855_v15  ;;  %v8064_v28 = vld [vmem:[%s11827_s5 + $0x2e4] ss:$16 sps:$4 sm:$0xff]   ;;  %v8067_v15 = vld [vmem:[%s11827_s5 + $0x2ec] ss:$16 sps:$4 sm:$0xff]   ;;  %v8065_v29 = vld [vmem:[%s11827_s5 + $0x2e8] ss:$16 sps:$4 sm:$0xff]  }
 0x447   :  { %6491 = vmatprep.mubr.bf16.mxu0 %v4821_v63  ;;  %6735 = vmatprep.mubr.bf16.mxu1 %v4821_v63  ;;  %v4743_v7 = vmul.f32 0.01, %v4663_v46  ;;  %v4587_v19 = vmul.f32 %v10827_v1, %v4504_v61  ;;  %vm4703_vm3 = vcmp.ge.f32.partialorder %v4663_v46, 0.0  ;;  %v11083_v50 = vrot.slane %v10804_v53, %v11868_v17  ;;  %v8071_v12 = vld [vmem:[%s11827_s5 + $0x308] ss:$16 sps:$4 sm:$0xff]  }
 0x448   :  { %6470 = vmatpush1.bf16.msra.mxu0 %v8050_v4  ;;  %6714 = vmatpush1.bf16.msra.mxu1 %v8053_v14  ;;  %vm4711_vm4 = vcmp.ge.f32.partialorder %v4671_v21, 0.0  ;;  %v4751_v41 = vmul.f32 0.01, %v4671_v21  ;;  %vm4702_vm5 = vcmp.ge.f32.partialorder %v4662_v56, 0.0  ;;  %v4742_v49 = vmul.f32 0.01, %v4662_v56 }
 0x449   :  { %6471 = vmatprep.subr.bf16.mxu0 %v8058_v11  ;;  %6715 = vmatprep.subr.bf16.mxu1 %v8061_v55  ;;  %v4670_v13 = vadd.f32 %v10879_v52, %v4587_v19  ;;  %v4513_v8 = vmul.f32 %v10900_v42, %v10603_v0  ;;  %v4521_v51 = vmul.f32 %v10926_v6, %v10646_v23  ;;  %v8070_v23 = vld [vmem:[%s11827_s5 + $0x304] ss:$16 sps:$4 sm:$0xff]   ;;  %v8068_v14 = vld [vmem:[%s11827_s5 + $0x300] ss:$16 sps:$4 sm:$0xff]  }
 0x44a   :  { %v4783_v58 = vsel %vm4703_vm3, %v4663_v46, %v4743_v7  ;;  %v4791_v37 = vsel %vm4711_vm4, %v4671_v21, %v4751_v41  ;;  %v4782_v0 = vsel %vm4702_vm5, %v4662_v56, %v4742_v49  ;;  %v4512_v33 = vmul.f32 %v10900_v42, %v10590_v35  ;;  %v11869_v49 = vld [vmem:[#allocation6_spill] sm:$0xff] }
 0x44b   :  { %vm4710_vm6 = vcmp.ge.f32.partialorder %v4670_v13, 0.0  ;;  %v4750_v36 = vmul.f32 0.01, %v4670_v13  ;;  %v11095_v5 = vpack.c.bf16 %v4791_v37, %v4783_v58  ;;  %v4596_v9 = vmul.f32 %v10861_v18, %v4513_v8 }
 0x44c   :  { %6472 = vmatpush1.bf16.msra.mxu0 %v8056_v44  ;;  %6716 = vmatpush1.bf16.msra.mxu1 %v8059_v16  ;;  %v4604_v39 = vmul.f32 %v10861_v18, %v4521_v51  ;;  %v4520_v38 = vmul.f32 %v10926_v6, %v10635_v48  ;;  %v4499_v4 = vmul.f32 %v10819_v60, %v10530_v2  ;;  %v8076_v2 = vld [vmem:[%s11827_s5 + $0x324] ss:$16 sps:$4 sm:$0xff]   ;;  %v8074_v16 = vld [vmem:[%s11827_s5 + $0x320] ss:$16 sps:$4 sm:$0xff]   ;;  %v8085_v51 = vld [vmem:[%s11827_s5 + $0x34c] ss:$16 sps:$4 sm:$0xff]  }
 0x44d   :  { %6473 = vmatprep.subr.bf16.mxu0 %v8064_v28  ;;  %6717 = vmatprep.subr.bf16.mxu1 %v8067_v15  ;;  %v4790_v57 = vsel %vm4710_vm6, %v4670_v13, %v4750_v36  ;;  %v4679_v40 = vadd.f32 %v10890_v54, %v4596_v9  ;;  %v4595_v22 = vmul.f32 %v10827_v1, %v4512_v33  ;;  %vm4732_vm4 = vcmp.ge.f32.partialorder %v11062_v47, 0.0 }
 0x44e   :  { %v11107_v32 = vpack.c.bf16 %v4790_v57, %v4782_v0  ;;  %v4687_v35 = vadd.f32 %v10890_v54, %v4604_v39  ;;  %v4528_v63 = vmul.f32 %v10983_v45, %v10670_v3  ;;  %v4507_v48 = vmul.f32 %v10857_v34, %v10574_v27  ;;  %v8079_v27 = vld [vmem:[%s11827_s5 + $0x32c] ss:$16 sps:$4 sm:$0xff]   ;;  %v8080_v0 = vld [vmem:[%s11827_s5 + $0x340] ss:$16 sps:$4 sm:$0xff]  }
 0x44f   :  { %vm4719_vm7 = vcmp.ge.f32.partialorder %v4679_v40, 0.0  ;;  %v4759_v11 = vmul.f32 0.01, %v4679_v40  ;;  %v4603_v55 = vmul.f32 %v10827_v1, %v4520_v38  ;;  %v11132_v46 = vrot.slane %v10809_v24, %v11868_v17  ;;  %v11870_v39 = vld [vmem:[#allocation9_spill] sm:$0xff] }
 0x450   :  { %6474 = vmatpush1.bf16.msra.mxu0 %v8062_v30  ;;  %6718 = vmatpush1.bf16.msra.mxu1 %v8065_v29  ;;  %vm4727_vm8 = vcmp.ge.f32.partialorder %v4687_v35, 0.0  ;;  %v4767_v3 = vmul.f32 0.01, %v4687_v35  ;;  %v4678_v61 = vadd.f32 %v10879_v52, %v4595_v22  ;;  %v4611_v21 = vmul.f32 %v10827_v1, %v4528_v63  ;;  %v8077_v1 = vld [vmem:[%s11827_s5 + $0x328] ss:$16 sps:$4 sm:$0xff]  }
 0x451   :  { %6475 = vmatprep.subr.bf16.mxu0 %v8070_v23  ;;  %6719 = vmatprep.subr.bf16.mxu1 %v8073_v59  ;;  %v4799_v56 = vsel %vm4719_vm7, %v4679_v40, %v4759_v11  ;;  %v4686_v44 = vadd.f32 %v10879_v52, %v4603_v55  ;;  %v4582_v7 = vmul.f32 %v11083_v50, %v4499_v4  ;;  %v8083_v59 = vld [vmem:[%s11827_s5 + $0x348] ss:$16 sps:$4 sm:$0xff]   ;;  %v11871_v40 = vld [vmem:[#allocation12_spill] sm:$0xff] }
 0x452   :  { %v4590_v19 = vmul.f32 %v11083_v50, %v4507_v48  ;;  %v4807_v28 = vsel %vm4727_vm8, %v4687_v35, %v4767_v3  ;;  %vm4718_vm9 = vcmp.ge.f32.partialorder %v4678_v61, 0.0  ;;  %v4758_v15 = vmul.f32 0.01, %v4678_v61  ;;  %v11872_v4 = vld [vmem:[#allocation8_spill] sm:$0xff]  ;;  %v8089_v55 = vld [vmem:[%s11827_s5 + $0x368] ss:$16 sps:$4 sm:$0xff]  }
 0x453   :  { %v11146_v41 = vadd.f32 %v10879_v52, %v4611_v21  ;;  %v11151_v13 = vpack.c.bf16 %v4807_v28, %v4799_v56  ;;  %vm4726_vm10 = vcmp.ge.f32.partialorder %v4686_v44, 0.0  ;;  %v4766_v17 = vmul.f32 0.01, %v4686_v44  ;;  %v8082_v52 = vld [vmem:[%s11827_s5 + $0x344] ss:$16 sps:$4 sm:$0xff]  }
 0x454   :  { %6476 = vmatpush1.bf16.msra.mxu0 %v8068_v14  ;;  %6720 = vmatpush1.bf16.msra.mxu1 %v8071_v12  ;;  %v11155_v8 = vrot.slane %v10804_v53, %v11869_v49  ;;  %v4798_v58 = vsel %vm4718_vm9, %v4678_v61, %v4758_v15  ;;  %v4665_v36 = vadd.f32 %v11132_v46, %v4582_v7  ;;  %v11873_v12 = vld [vmem:[#allocation11_spill] sm:$0xff]  ;;  %v8086_v22 = vld [vmem:[%s11827_s5 + $0x360] ss:$16 sps:$4 sm:$0xff]  }
 0x455   :  { %6477 = vmatprep.subr.bf16.mxu0 %v8076_v2  ;;  %6721 = vmatprep.subr.bf16.mxu1 %v8079_v27  ;;  %v4806_v37 = vsel %vm4726_vm10, %v4686_v44, %v4766_v17  ;;  %v4673_v30 = vadd.f32 %v11132_v46, %v4590_v19  ;;  %v4498_v53 = vmul.f32 %v10819_v60, %v10524_v26  ;;  %v8088_v26 = vld [vmem:[%s11827_s5 + $0x364] ss:$16 sps:$4 sm:$0xff]   ;;  %v8092_v28 = vld [vmem:[%s11827_s5 + $0x380] ss:$16 sps:$4 sm:$0xff]   ;;  %vm4734_vm6 = vcmp.ge.f32.partialorder %v11146_v41, 0.0 }
 0x456   :  { %v11169_v29 = vrot.slane %v10809_v24, %v11869_v49  ;;  %v11174_v9 = vpack.c.bf16 %v4806_v37, %v4798_v58  ;;  %v4506_v23 = vmul.f32 %v10857_v34, %v10562_v25  ;;  %vm4705_vm11 = vcmp.ge.f32.partialorder %v4665_v36, 0.0  ;;  %v8091_v24 = vld [vmem:[%s11827_s5 + $0x36c] ss:$16 sps:$4 sm:$0xff]   ;;  %v11874_v17 = vld [vmem:[#allocation14_spill] sm:$0xff] }
 0x457   :  { %vm4713_vm12 = vcmp.ge.f32.partialorder %v4673_v30, 0.0  ;;  %v4745_v60 = vmul.f32 0.01, %v4665_v36  ;;  %v4753_v25 = vmul.f32 0.01, %v4673_v30  ;;  %v4581_v34 = vmul.f32 %v11155_v8, %v4498_v53 }
 0x458   :  { %6478 = vmatpush1.bf16.msra.mxu0 %v8074_v16  ;;  %6722 = vmatpush1.bf16.msra.mxu1 %v8077_v1  ;;  %v4589_v57 = vmul.f32 %v11155_v8, %v4506_v23  ;;  %v4515_v33 = vmul.f32 %v10900_v42, %v11870_v39  ;;  %v4523_v38 = vmul.f32 %v10926_v6, %v11871_v40  ;;  %v8100_v37 = vld [vmem:[%s11827_s5 + $0x3a4] ss:$16 sps:$4 sm:$0xff]  }
 0x459   :  { %6479 = vmatprep.subr.bf16.mxu0 %v8082_v52  ;;  %6723 = vmatprep.subr.bf16.mxu1 %v8085_v51  ;;  %v4514_v14 = vmul.f32 %v10900_v42, %v11872_v4  ;;  %v4522_v35 = vmul.f32 %v10926_v6, %v11873_v12  ;;  %v4785_v63 = vsel %vm4705_vm11, %v4665_v36, %v4745_v60  ;;  %v8094_v42 = vld [vmem:[%s11827_s5 + $0x384] ss:$16 sps:$4 sm:$0xff]   ;;  %v8097_v6 = vld [vmem:[%s11827_s5 + $0x38c] ss:$16 sps:$4 sm:$0xff]   ;;  %v8095_v52 = vld [vmem:[%s11827_s5 + $0x388] ss:$16 sps:$4 sm:$0xff]  }
 0x45a   :  { %v4793_v48 = vsel %vm4713_vm12, %v4673_v30, %v4753_v25  ;;  %v4664_v2 = vadd.f32 %v11169_v29, %v4581_v34  ;;  %v4672_v11 = vadd.f32 %v11169_v29, %v4589_v57  ;;  %v4598_v3 = vmul.f32 %v11083_v50, %v4515_v33  ;;  %v8103_v36 = vld [vmem:[%s11827_s5 + $0x3ac] ss:$16 sps:$4 sm:$0xff]   ;;  %v8098_v60 = vld [vmem:[%s11827_s5 + $0x3a0] ss:$16 sps:$4 sm:$0xff]   ;;  %v8101_v25 = vld [vmem:[%s11827_s5 + $0x3a8] ss:$16 sps:$4 sm:$0xff]  }
 0x45b   :  { %v11211_v27 = vpack.c.bf16 %v4793_v48, %v4785_v63  ;;  %v4606_v61 = vmul.f32 %v11083_v50, %v4523_v38  ;;  %v4597_v19 = vmul.f32 %v11155_v8, %v4514_v14  ;;  %v4605_v16 = vmul.f32 %v11155_v8, %v4522_v35  ;;  %v8109_v33 = vld [vmem:[%s11827_s5 + $0x3cc] ss:$16 sps:$4 sm:$0xff]   ;;  %v11875_v4 = vld [vmem:[#allocation10_spill] sm:$0xff]  ;;  %v8107_v35 = vld [vmem:[%s11827_s5 + $0x3c8] ss:$16 sps:$4 sm:$0xff]  }
 0x45c   :  { %6480 = vmatpush1.bf16.msra.mxu0 %v8080_v0  ;;  %6724 = vmatpush1.bf16.msra.mxu1 %v8083_v59  ;;  %vm4704_vm13 = vcmp.ge.f32.partialorder %v4664_v2, 0.0  ;;  %vm4712_vm14 = vcmp.ge.f32.partialorder %v4672_v11, 0.0  ;;  %v4744_v21 = vmul.f32 0.01, %v4664_v2  ;;  %v4752_v56 = vmul.f32 0.01, %v4672_v11 }
 0x45d   :  { %6481 = vmatprep.subr.bf16.mxu0 %v8088_v26  ;;  %6725 = vmatprep.subr.bf16.mxu1 %v8091_v24  ;;  %v4681_v44 = vadd.f32 %v11132_v46, %v4598_v3  ;;  %v4689_v7 = vadd.f32 %v11132_v46, %v4606_v61  ;;  %v4530_v49 = vmul.f32 %v10983_v45, %v11874_v17  ;;  %v8115_v63 = vld [vmem:[%s11827_s5 + $0x3ec] ss:$16 sps:$4 sm:$0xff]   ;;  %v8119_v3 = vld [vmem:[%s11827_s5 + $0x408] ss:$16 sps:$4 sm:$0xff]   ;;  %v8124_v61 = vld [vmem:[%s11827_s5 + $0x424] ss:$16 sps:$4 sm:$0xff]  }
 0x45e   :  { %v4784_v15 = vsel %vm4704_vm13, %v4664_v2, %v4744_v21  ;;  %v4792_v1 = vsel %vm4712_vm14, %v4672_v11, %v4752_v56  ;;  %v4680_v53 = vadd.f32 %v11169_v29, %v4597_v19  ;;  %v4688_v0 = vadd.f32 %v11169_v29, %v4605_v16  ;;  %v8110_v2 = vld [vmem:[%s11827_s5 + $0x3e0] ss:$16 sps:$4 sm:$0xff]   ;;  %v8113_v11 = vld [vmem:[%s11827_s5 + $0x3e8] ss:$16 sps:$4 sm:$0xff]  }
 0x45f   :  { %v11227_v51 = vpack.c.bf16 %v4792_v1, %v4784_v15  ;;  %vm4721_vm15 = vcmp.ge.f32.partialorder %v4681_v44, 0.0  ;;  %vm4729_vm0 = vcmp.ge.f32.partialorder %v4689_v7, 0.0  ;;  %v4761_v58 = vmul.f32 0.01, %v4681_v44  ;;  %v8122_v56 = vld [vmem:[%s11827_s5 + $0x420] ss:$16 sps:$4 sm:$0xff]  }
 0x460   :  { %6482 = vmatpush1.bf16.msra.mxu0 %v8086_v22  ;;  %6726 = vmatpush1.bf16.msra.mxu1 %v8089_v55  ;;  %v4769_v30 = vmul.f32 0.01, %v4689_v7  ;;  %v4613_v59 = vmul.f32 %v11155_v8, %v4530_v49  ;;  %vm4720_vm1 = vcmp.ge.f32.partialorder %v4680_v53, 0.0  ;;  %vm4728_vm2 = vcmp.ge.f32.partialorder %v4688_v0, 0.0  ;;  %v8106_v8 = vld [vmem:[%s11827_s5 + $0x3c4] ss:$16 sps:$4 sm:$0xff]  }
 0x461   :  { %6483 = vmatprep.subr.bf16.mxu0 %v8094_v42  ;;  %6727 = vmatprep.subr.bf16.mxu1 %v8097_v6  ;;  %v4801_v23 = vsel %vm4721_vm15, %v4681_v44, %v4761_v58  ;;  %v4760_v24 = vmul.f32 0.01, %v4680_v53  ;;  %v4768_v57 = vmul.f32 0.01, %v4688_v0  ;;  %v4527_v14 = vmul.f32 %v10983_v45, %v11875_v4  ;;  %v8112_v22 = vld [vmem:[%s11827_s5 + $0x3e4] ss:$16 sps:$4 sm:$0xff]  }
 0x462   :  { %v4809_v26 = vsel %vm4729_vm0, %v4689_v7, %v4769_v30  ;;  %v11247_v39 = vadd.f32 %v11169_v29, %v4613_v59  ;;  %v8104_v29 = vld [vmem:[%s11827_s5 + $0x3c0] ss:$16 sps:$4 sm:$0xff]   ;;  %v8118_v55 = vld [vmem:[%s11827_s5 + $0x404] ss:$16 sps:$4 sm:$0xff]   ;;  %v8125_v44 = vld [vmem:[%s11827_s5 + $0x428] ss:$16 sps:$4 sm:$0xff]  }
 0x463   :  { %v11244_v34 = vpack.c.bf16 %v4809_v26, %v4801_v23  ;;  %v4800_v40 = vsel %vm4720_vm1, %v4680_v53, %v4760_v24  ;;  %v4808_v38 = vsel %vm4728_vm2, %v4688_v0, %v4768_v57  ;;  %v4610_v48 = vmul.f32 %v10849_v62, %v4527_v14  ;;  %v8121_v62 = vld [vmem:[%s11827_s5 + $0x40c] ss:$16 sps:$4 sm:$0xff]   ;;  %v8116_v6 = vld [vmem:[%s11827_s5 + $0x400] ss:$16 sps:$4 sm:$0xff]   ;;  %v8131_v16 = vld [vmem:[%s11827_s5 + $0x448] ss:$16 sps:$4 sm:$0xff]  }
 0x464   :  { %6484 = vmatpush1.bf16.msra.mxu0 %v8092_v28  ;;  %6728 = vmatpush1.bf16.msra.mxu1 %v8095_v52  ;;  %v11257_v12 = vpack.c.bf16 %v4808_v38, %v4800_v40  ;;  %v8133_v7 = vld [vmem:[%s11827_s5 + $0x44c] ss:$16 sps:$4 sm:$0xff]   ;;  %v8136_v15 = vld [vmem:[%s11827_s5 + $0x464] ss:$16 sps:$4 sm:$0xff]   ;;  %v4772_v17 = vmul.f32 0.01, %v11062_v47 }
 0x465   :  { %6485 = vmatprep.subr.bf16.mxu0 %v8100_v37  ;;  %6729 = vmatprep.subr.bf16.mxu1 %v8103_v36  ;;  %v4693_v42 = vadd.f32 %v10883_v10, %v4610_v48  ;;  %v8127_v10 = vld [vmem:[%s11827_s5 + $0x42c] ss:$16 sps:$4 sm:$0xff]   ;;  %v8134_v49 = vld [vmem:[%s11827_s5 + $0x460] ss:$16 sps:$4 sm:$0xff]   ;;  %v8137_v52 = vld [vmem:[%s11827_s5 + $0x468] ss:$16 sps:$4 sm:$0xff]  }
 0x466   :  { %v8139_v1 = vld [vmem:[%s11827_s5 + $0x46c] ss:$16 sps:$4 sm:$0xff]   ;;  %v8142_v58 = vld [vmem:[%s11827_s5 + $0x484] ss:$16 sps:$4 sm:$0xff]   ;;  %v8140_v36 = vld [vmem:[%s11827_s5 + $0x480] ss:$16 sps:$4 sm:$0xff]  }
 0x467   :  { %v4773_v21 = vmul.f32 0.01, %v4693_v42  ;;  %vm4733_vm3 = vcmp.ge.f32.partialorder %v4693_v42, 0.0  ;;  %v8145_v37 = vld [vmem:[%s11827_s5 + $0x48c] ss:$16 sps:$4 sm:$0xff]   ;;  %vm4736_vm8 = vcmp.ge.f32.partialorder %v11247_v39, 0.0 }
 0x468   :  { %6486 = vmatpush1.bf16.msra.mxu0 %v8098_v60  ;;  %6730 = vmatpush1.bf16.msra.mxu1 %v8101_v25  ;;  %v8143_v53 = vld [vmem:[%s11827_s5 + $0x488] ss:$16 sps:$4 sm:$0xff]   ;;  %v8151_v0 = vld [vmem:[%s11827_s5 + $0x4ac] ss:$16 sps:$4 sm:$0xff]   ;;  %v8146_v23 = vld [vmem:[%s11827_s5 + $0x4a0] ss:$16 sps:$4 sm:$0xff]  }
 0x469   :  { %6487 = vmatprep.subr.bf16.mxu0 %v8106_v8  ;;  %6731 = vmatprep.subr.bf16.mxu1 %v8109_v33  ;;  %v4813_v19 = vsel %vm4733_vm3, %v4693_v42, %v4773_v21  ;;  %v8149_v59 = vld [vmem:[%s11827_s5 + $0x4a8] ss:$16 sps:$4 sm:$0xff]   ;;  %v8154_v26 = vld [vmem:[%s11827_s5 + $0x4c4] ss:$16 sps:$4 sm:$0xff]   ;;  %v8157_v24 = vld [vmem:[%s11827_s5 + $0x4cc] ss:$16 sps:$4 sm:$0xff]  }
 0x46a   :  { %v4837_v28 = vpack.c.bf16 %v4813_v19, %v4813_v19  ;;  %v8152_v60 = vld [vmem:[%s11827_s5 + $0x4c0] ss:$16 sps:$4 sm:$0xff]   ;;  %v8160_v25 = vld [vmem:[%s11827_s5 + $0x4e4] ss:$16 sps:$4 sm:$0xff]   ;;  %v8163_v57 = vld [vmem:[%s11827_s5 + $0x4ec] ss:$16 sps:$4 sm:$0xff]  }
 0x46b   :  { %v8158_v8 = vld [vmem:[%s11827_s5 + $0x4e0] ss:$16 sps:$4 sm:$0xff]   ;;  %v8161_v33 = vld [vmem:[%s11827_s5 + $0x4e8] ss:$16 sps:$4 sm:$0xff]   ;;  %v8166_v40 = vld [vmem:[%s11827_s5 + $0x504] ss:$16 sps:$4 sm:$0xff]  }
 0x46c   :  { %6488 = vmatpush1.bf16.msra.mxu0 %v8104_v29  ;;  %6732 = vmatpush1.bf16.msra.mxu1 %v8107_v35  ;;  %v8169_v38 = vld [vmem:[%s11827_s5 + $0x50c] ss:$16 sps:$4 sm:$0xff]   ;;  %v8164_v4 = vld [vmem:[%s11827_s5 + $0x500] ss:$16 sps:$4 sm:$0xff]   ;;  %v8167_v14 = vld [vmem:[%s11827_s5 + $0x508] ss:$16 sps:$4 sm:$0xff]  }
 0x46d   :  { %6489 = vmatprep.subr.bf16.mxu0 %v8112_v22  ;;  %6733 = vmatprep.subr.bf16.mxu1 %v8115_v63  ;;  %v8172_v29 = vld [vmem:[%s11827_s5 + $0x524] ss:$16 sps:$4 sm:$0xff]   ;;  %v8175_v35 = vld [vmem:[%s11827_s5 + $0x52c] ss:$16 sps:$4 sm:$0xff]   ;;  %v8170_v22 = vld [vmem:[%s11827_s5 + $0x520] ss:$16 sps:$4 sm:$0xff]  }
 0x46e   :  { %v8173_v63 = vld [vmem:[%s11827_s5 + $0x528] ss:$16 sps:$4 sm:$0xff]   ;;  %v8178_v48 = vld [vmem:[%s11827_s5 + $0x544] ss:$16 sps:$4 sm:$0xff]   ;;  %v8187_v42 = vld [vmem:[%s11827_s5 + $0x56c] ss:$16 sps:$4 sm:$0xff]  }
 0x46f   :  { %v8188_v21 = vld [vmem:[%s11827_s5 + $0x580] ss:$16 sps:$4 sm:$0xff]   ;;  %v8197_v19 = vld [vmem:[%s11827_s5 + $0x5a8] ss:$16 sps:$4 sm:$0xff]  }
 0x470   :  { %6490 = vmatpush1.bf16.msra.mxu0 %v8110_v2  ;;  %6734 = vmatpush1.bf16.msra.mxu1 %v8113_v11  ;;  %v8181_v2 = vld [vmem:[%s11827_s5 + $0x54c] ss:$16 sps:$4 sm:$0xff]   ;;  %v8176_v11 = vld [vmem:[%s11827_s5 + $0x540] ss:$16 sps:$4 sm:$0xff]  }
 0x471   :  { %6520 = vmatprep.subr.bf16.mxu0 %v8118_v55  ;;  %6764 = vmatprep.subr.bf16.mxu1 %v8121_v62  ;;  %v8179_v55 = vld [vmem:[%s11827_s5 + $0x548] ss:$16 sps:$4 sm:$0xff]   ;;  %v8184_v62 = vld [vmem:[%s11827_s5 + $0x564] ss:$16 sps:$4 sm:$0xff]  }
 0x473   :  { %6492 = vmatmul.mubr.bf16.vlgmr.msra.gmra.mrb[48].mxu0 %v10956_v20  ;;  %6736 = vmatmul.mubr.bf16.vlgmr.msra.gmra.mrb[48].mxu1 %v10956_v20  ;;  %v8130_v20 = vld [vmem:[%s11827_s5 + $0x444] ss:$16 sps:$4 sm:$0xff]  }
 0x474   :  { %6501 = vmatprep.mubr.bf16.mxu0 %v11032_v43  ;;  %6521 = vmatpush1.bf16.msra.mxu0 %v8116_v6  ;;  %v8182_v6 = vld [vmem:[%s11827_s5 + $0x560] ss:$16 sps:$4 sm:$0xff]  }
 0x475   :  { %6745 = vmatprep.mubr.bf16.mxu1 %v11032_v43  ;;  %6765 = vmatpush1.bf16.msra.mxu1 %v8119_v3  ;;  %v8128_v43 = vld [vmem:[%s11827_s5 + $0x440] ss:$16 sps:$4 sm:$0xff]   ;;  %v8185_v3 = vld [vmem:[%s11827_s5 + $0x568] ss:$16 sps:$4 sm:$0xff]  }
 0x476   :  { %6522 = vmatprep.subr.bf16.mxu0 %v8124_v61  ;;  %6766 = vmatprep.subr.bf16.mxu1 %v8127_v10  ;;  %v8190_v61 = vld [vmem:[%s11827_s5 + $0x584] ss:$16 sps:$4 sm:$0xff]   ;;  %v8193_v10 = vld [vmem:[%s11827_s5 + $0x58c] ss:$16 sps:$4 sm:$0xff]  }
 0x478   :  { %6523 = vmatpush1.bf16.msra.mxu0 %v8122_v56  ;;  %v8191_v56 = vld [vmem:[%s11827_s5 + $0x588] ss:$16 sps:$4 sm:$0xff]  }
 0x479   :  { %6767 = vmatpush1.bf16.msra.mxu1 %v8125_v44  ;;  %6524 = vmatprep.subr.bf16.mxu0 %v8130_v20  ;;  %v8196_v44 = vld [vmem:[%s11827_s5 + $0x5a4] ss:$16 sps:$4 sm:$0xff]   ;;  %v8199_v20 = vld [vmem:[%s11827_s5 + $0x5ac] ss:$16 sps:$4 sm:$0xff]  }
 0x47a   :  { %6768 = vmatprep.subr.bf16.mxu1 %v8133_v7  ;;  %v8194_v7 = vld [vmem:[%s11827_s5 + $0x5a0] ss:$16 sps:$4 sm:$0xff]  }
 0x47b   :  { %6502 = vmatmul.mubr.bf16.gmra.mrb[52].mxu0 %v11047_v31  ;;  %6746 = vmatmul.mubr.bf16.gmra.mrb[52].mxu1 %v11047_v31  ;;  %v4812_v31 = vsel %vm4732_vm4, %v11062_v47, %v4772_v17  ;;  %v8148_v47 = vld [vmem:[%s11827_s5 + $0x4a4] ss:$16 sps:$4 sm:$0xff]   ;;  %v8203_v17 = vld [vmem:[%s11827_s5 + $0x5c8] ss:$16 sps:$4 sm:$0xff]  }
 0x47c   :  { %6511 = vmatprep.mubr.bf16.mxu0 %v4837_v28  ;;  %6525 = vmatpush1.bf16.msra.mxu0 %v8128_v43  ;;  %v4836_v30 = vpack.c.bf16 %v4812_v31, %v4812_v31  ;;  %v8202_v43 = vld [vmem:[%s11827_s5 + $0x5c4] ss:$16 sps:$4 sm:$0xff]   ;;  %v8206_v31 = vld [vmem:[%s11827_s5 + $0x5e0] ss:$16 sps:$4 sm:$0xff]  }
 0x47d   :  { %6755 = vmatprep.mubr.bf16.mxu1 %v4837_v28  ;;  %6769 = vmatpush1.bf16.msra.mxu1 %v8131_v16  ;;  %v8205_v16 = vld [vmem:[%s11827_s5 + $0x5cc] ss:$16 sps:$4 sm:$0xff]  }
 0x47e   :  { %6526 = vmatprep.subr.bf16.mxu0 %v8136_v15  ;;  %6770 = vmatprep.subr.bf16.mxu1 %v8139_v1  ;;  %v11876_v28 = vld [vmem:[#allocation13_spill] sm:$0xff]  ;;  %v8200_v1 = vld [vmem:[%s11827_s5 + $0x5c0] ss:$16 sps:$4 sm:$0xff]  }
 0x47f   :  { %v4529_v15 = vmul.f32 %v10983_v45, %v11876_v28  ;;  %v8277_v28 = vld [vmem:[%s11827_s5 + $0x74c] ss:$16 sps:$4 sm:$0xff]  }
 0x480   :  { %6527 = vmatpush1.bf16.msra.mxu0 %v8134_v49  ;;  %v8208_v49 = vld [vmem:[%s11827_s5 + $0x5e4] ss:$16 sps:$4 sm:$0xff]  }
 0x481   :  { %6771 = vmatpush1.bf16.msra.mxu1 %v8137_v52  ;;  %6528 = vmatprep.subr.bf16.mxu0 %v8142_v58  ;;  %v8211_v52 = vld [vmem:[%s11827_s5 + $0x5ec] ss:$16 sps:$4 sm:$0xff]   ;;  %v4612_v58 = vmul.f32 %v10861_v18, %v4529_v15  ;;  %v8272_v15 = vld [vmem:[%s11827_s5 + $0x740] ss:$16 sps:$4 sm:$0xff]  }
 0x482   :  { %6772 = vmatprep.subr.bf16.mxu1 %v8145_v37  ;;  %v8209_v37 = vld [vmem:[%s11827_s5 + $0x5e8] ss:$16 sps:$4 sm:$0xff]   ;;  %v8217_v18 = vld [vmem:[%s11827_s5 + $0x60c] ss:$16 sps:$4 sm:$0xff]  }
 0x483   :  { %6512 = vmatmul.mubr.bf16.gmra.mrb[56].mxu0 %v4836_v30  ;;  %6756 = vmatmul.mubr.bf16.gmra.mrb[56].mxu1 %v4836_v30  ;;  %v4695_v30 = vadd.f32 %v10890_v54, %v4612_v58  ;;  %v8223_v54 = vld [vmem:[%s11827_s5 + $0x62c] ss:$16 sps:$4 sm:$0xff]   ;;  %v8281_v58 = vld [vmem:[%s11827_s5 + $0x768] ss:$16 sps:$4 sm:$0xff]  }
 0x484   :  { %6529 = vmatpush1.bf16.msra.mxu0 %v8140_v36  ;;  %6552 = vmatprep.mubr.bf16.mxu0 %v11095_v5  ;;  %v8214_v36 = vld [vmem:[%s11827_s5 + $0x604] ss:$16 sps:$4 sm:$0xff]  }
 0x485   :  { %6773 = vmatpush1.bf16.msra.mxu1 %v8143_v53  ;;  %6796 = vmatprep.mubr.bf16.mxu1 %v11095_v5  ;;  %v8155_v5 = vld [vmem:[%s11827_s5 + $0x4c8] ss:$16 sps:$4 sm:$0xff]   ;;  %v8212_v53 = vld [vmem:[%s11827_s5 + $0x600] ss:$16 sps:$4 sm:$0xff]   ;;  %vm4735_vm5 = vcmp.ge.f32.partialorder %v4695_v30, 0.0 }
 0x486   :  { %6530 = vmatprep.subr.bf16.mxu0 %v8148_v47  ;;  %6774 = vmatprep.subr.bf16.mxu1 %v8151_v0  ;;  %v8215_v47 = vld [vmem:[%s11827_s5 + $0x608] ss:$16 sps:$4 sm:$0xff]   ;;  %v8220_v0 = vld [vmem:[%s11827_s5 + $0x624] ss:$16 sps:$4 sm:$0xff]  }
 0x488   :  { %6531 = vmatpush1.bf16.msra.mxu0 %v8146_v23  ;;  %v4775_v23 = vmul.f32 0.01, %v4695_v30 }
 0x489   :  { %6775 = vmatpush1.bf16.msra.mxu1 %v8149_v59  ;;  %6532 = vmatprep.subr.bf16.mxu0 %v8154_v26  ;;  %v8218_v59 = vld [vmem:[%s11827_s5 + $0x620] ss:$16 sps:$4 sm:$0xff]   ;;  %v8221_v26 = vld [vmem:[%s11827_s5 + $0x628] ss:$16 sps:$4 sm:$0xff]  }
 0x48a   :  { %6776 = vmatprep.subr.bf16.mxu1 %v8157_v24  ;;  %v8229_v24 = vld [vmem:[%s11827_s5 + $0x64c] ss:$16 sps:$4 sm:$0xff]  }
 0x48c   :  { %6533 = vmatpush1.bf16.msra.mxu0 %v8152_v60  ;;  %v8224_v60 = vld [vmem:[%s11827_s5 + $0x640] ss:$16 sps:$4 sm:$0xff]  }
 0x48d   :  { %6777 = vmatpush1.bf16.msra.mxu1 %v8155_v5  ;;  %6534 = vmatprep.subr.bf16.mxu0 %v8160_v25  ;;  %v8227_v5 = vld [vmem:[%s11827_s5 + $0x648] ss:$16 sps:$4 sm:$0xff]  }
 0x48e   :  { %6778 = vmatprep.subr.bf16.mxu1 %v8163_v57  ;;  %v8232_v57 = vld [vmem:[%s11827_s5 + $0x664] ss:$16 sps:$4 sm:$0xff]  }
 0x490   :  { %6535 = vmatpush1.bf16.msra.mxu0 %v8158_v8  ;;  %v4774_v8 = vmul.f32 0.01, %v11146_v41 }
 0x491   :  { %6779 = vmatpush1.bf16.msra.mxu1 %v8161_v33  ;;  %6536 = vmatprep.subr.bf16.mxu0 %v8166_v40  ;;  %v8235_v33 = vld [vmem:[%s11827_s5 + $0x66c] ss:$16 sps:$4 sm:$0xff]   ;;  %v8230_v40 = vld [vmem:[%s11827_s5 + $0x660] ss:$16 sps:$4 sm:$0xff]  }
 0x492   :  { %6780 = vmatprep.subr.bf16.mxu1 %v8169_v38  ;;  %v8233_v38 = vld [vmem:[%s11827_s5 + $0x668] ss:$16 sps:$4 sm:$0xff]  }
 0x494   :  { %6537 = vmatpush1.bf16.msra.mxu0 %v8164_v4  ;;  %v4814_v4 = vsel %vm4734_vm6, %v11146_v41, %v4774_v8  ;;  %v8239_v41 = vld [vmem:[%s11827_s5 + $0x688] ss:$16 sps:$4 sm:$0xff]  }
 0x495   :  { %6781 = vmatpush1.bf16.msra.mxu1 %v8167_v14  ;;  %6538 = vmatprep.subr.bf16.mxu0 %v8172_v29  ;;  %v8238_v14 = vld [vmem:[%s11827_s5 + $0x684] ss:$16 sps:$4 sm:$0xff]   ;;  %v4838_v29 = vpack.c.bf16 %v4814_v4, %v4814_v4  ;;  %v5099_v4 = vld [vmem:[%s11828_s6 + $0x8] sm:$0xff] }
 0x496   :  { %6782 = vmatprep.subr.bf16.mxu1 %v8175_v35  ;;  %v8236_v35 = vld [vmem:[%s11827_s5 + $0x680] ss:$16 sps:$4 sm:$0xff]  }
 0x498   :  { %6539 = vmatpush1.bf16.msra.mxu0 %v8170_v22  ;;  %v8244_v22 = vld [vmem:[%s11827_s5 + $0x6a4] ss:$16 sps:$4 sm:$0xff]  }
 0x499   :  { %6783 = vmatpush1.bf16.msra.mxu1 %v8173_v63  ;;  %6540 = vmatprep.subr.bf16.mxu0 %v8178_v48  ;;  %v8247_v63 = vld [vmem:[%s11827_s5 + $0x6ac] ss:$16 sps:$4 sm:$0xff]   ;;  %v8242_v48 = vld [vmem:[%s11827_s5 + $0x6a0] ss:$16 sps:$4 sm:$0xff]  }
 0x49a   :  { %6784 = vmatprep.subr.bf16.mxu1 %v8181_v2  ;;  %v8245_v2 = vld [vmem:[%s11827_s5 + $0x6a8] ss:$16 sps:$4 sm:$0xff]  }
 0x49c   :  { %6541 = vmatpush1.bf16.msra.mxu0 %v8176_v11  ;;  %v8250_v11 = vld [vmem:[%s11827_s5 + $0x6c4] ss:$16 sps:$4 sm:$0xff]  }
 0x49d   :  { %6785 = vmatpush1.bf16.msra.mxu1 %v8179_v55  ;;  %6542 = vmatprep.subr.bf16.mxu0 %v8184_v62  ;;  %v8253_v55 = vld [vmem:[%s11827_s5 + $0x6cc] ss:$16 sps:$4 sm:$0xff]   ;;  %v8251_v62 = vld [vmem:[%s11827_s5 + $0x6c8] ss:$16 sps:$4 sm:$0xff]  }
 0x49e   :  { %6786 = vmatprep.subr.bf16.mxu1 %v8187_v42  ;;  %v8256_v42 = vld [vmem:[%s11827_s5 + $0x6e4] ss:$16 sps:$4 sm:$0xff]  }
 0x4a0   :  { %6543 = vmatpush1.bf16.msra.mxu0 %v8182_v6  ;;  %v8259_v6 = vld [vmem:[%s11827_s5 + $0x6ec] ss:$16 sps:$4 sm:$0xff]  }
 0x4a1   :  { %6787 = vmatpush1.bf16.msra.mxu1 %v8185_v3  ;;  %6544 = vmatprep.subr.bf16.mxu0 %v8190_v61  ;;  %v8254_v3 = vld [vmem:[%s11827_s5 + $0x6e0] ss:$16 sps:$4 sm:$0xff]   ;;  %v8257_v61 = vld [vmem:[%s11827_s5 + $0x6e8] ss:$16 sps:$4 sm:$0xff]  }
 0x4a2   :  { %6788 = vmatprep.subr.bf16.mxu1 %v8193_v10  ;;  %v8262_v10 = vld [vmem:[%s11827_s5 + $0x704] ss:$16 sps:$4 sm:$0xff]  }
 0x4a4   :  { %6545 = vmatpush1.bf16.msra.mxu0 %v8188_v21  ;;  %v8265_v21 = vld [vmem:[%s11827_s5 + $0x70c] ss:$16 sps:$4 sm:$0xff]  }
 0x4a5   :  { %6789 = vmatpush1.bf16.msra.mxu1 %v8191_v56  ;;  %6546 = vmatprep.subr.bf16.mxu0 %v8196_v44  ;;  %v8260_v56 = vld [vmem:[%s11827_s5 + $0x700] ss:$16 sps:$4 sm:$0xff]   ;;  %v8263_v44 = vld [vmem:[%s11827_s5 + $0x708] ss:$16 sps:$4 sm:$0xff]  }
 0x4a6   :  { %6790 = vmatprep.subr.bf16.mxu1 %v8199_v20  ;;  %v8268_v20 = vld [vmem:[%s11827_s5 + $0x724] ss:$16 sps:$4 sm:$0xff]  }
 0x4a8   :  { %6547 = vmatpush1.bf16.msra.mxu0 %v8194_v7  ;;  %v8271_v7 = vld [vmem:[%s11827_s5 + $0x72c] ss:$16 sps:$4 sm:$0xff]  }
 0x4a9   :  { %6791 = vmatpush1.bf16.msra.mxu1 %v8197_v19  ;;  %6548 = vmatprep.subr.bf16.mxu0 %v8202_v43  ;;  %v8266_v19 = vld [vmem:[%s11827_s5 + $0x720] ss:$16 sps:$4 sm:$0xff]   ;;  %v8269_v43 = vld [vmem:[%s11827_s5 + $0x728] ss:$16 sps:$4 sm:$0xff]  }
 0x4aa   :  { %6792 = vmatprep.subr.bf16.mxu1 %v8205_v16  ;;  %v8274_v16 = vld [vmem:[%s11827_s5 + $0x744] ss:$16 sps:$4 sm:$0xff]  }
 0x4ac   :  { %6549 = vmatpush1.bf16.msra.mxu0 %v8200_v1  ;;  %v8275_v1 = vld [vmem:[%s11827_s5 + $0x748] ss:$16 sps:$4 sm:$0xff]  }
 0x4ad   :  { %6793 = vmatpush1.bf16.msra.mxu1 %v8203_v17  ;;  %6550 = vmatprep.subr.bf16.mxu0 %v8208_v49  ;;  %v8280_v17 = vld [vmem:[%s11827_s5 + $0x764] ss:$16 sps:$4 sm:$0xff]   ;;  %v8283_v49 = vld [vmem:[%s11827_s5 + $0x76c] ss:$16 sps:$4 sm:$0xff]  }
 0x4ae   :  { %6794 = vmatprep.subr.bf16.mxu1 %v8211_v52  ;;  %v8278_v52 = vld [vmem:[%s11827_s5 + $0x760] ss:$16 sps:$4 sm:$0xff]  }
 0x4b0   :  { %6551 = vmatpush1.bf16.msra.mxu0 %v8206_v31  ;;  %v8286_v31 = vld [vmem:[%s11827_s5 + $0x784] ss:$16 sps:$4 sm:$0xff]  }
 0x4b1   :  { %6795 = vmatpush1.bf16.msra.mxu1 %v8209_v37  ;;  %6581 = vmatprep.subr.bf16.mxu0 %v8214_v36  ;;  %v8289_v37 = vld [vmem:[%s11827_s5 + $0x78c] ss:$16 sps:$4 sm:$0xff]   ;;  %v8284_v36 = vld [vmem:[%s11827_s5 + $0x780] ss:$16 sps:$4 sm:$0xff]  }
 0x4b2   :  { %6825 = vmatprep.subr.bf16.mxu1 %v8217_v18  ;;  %v8287_v18 = vld [vmem:[%s11827_s5 + $0x788] ss:$16 sps:$4 sm:$0xff]  }
 0x4b3   :  { %6553 = vmatmul.mubr.bf16.vlgmr.msra.gmra.mrb[48].mxu0 %v11107_v32 }
 0x4b4   :  { %6797 = vmatmul.mubr.bf16.vlgmr.msra.gmra.mrb[48].mxu1 %v11107_v32  ;;  %6562 = vmatprep.mubr.bf16.mxu0 %v11151_v13  ;;  %v8226_v32 = vld [vmem:[%s11827_s5 + $0x644] ss:$16 sps:$4 sm:$0xff]  }
 0x4b5   :  { %6582 = vmatpush1.bf16.msra.mxu0 %v8212_v53  ;;  %6806 = vmatprep.mubr.bf16.mxu1 %v11151_v13  ;;  %v4815_v13 = vsel %vm4735_vm5, %v4695_v30, %v4775_v23  ;;  %v8292_v30 = vld [vmem:[%s11827_s5 + $0x7a4] ss:$16 sps:$4 sm:$0xff]   ;;  %v8295_v53 = vld [vmem:[%s11827_s5 + $0x7ac] ss:$16 sps:$4 sm:$0xff]  }
 0x4b6   :  { %6826 = vmatpush1.bf16.msra.mxu1 %v8215_v47  ;;  %6583 = vmatprep.subr.bf16.mxu0 %v8220_v0  ;;  %v4839_v25 = vpack.c.bf16 %v4815_v13, %v4815_v13  ;;  %v8290_v47 = vld [vmem:[%s11827_s5 + $0x7a0] ss:$16 sps:$4 sm:$0xff]   ;;  %v8293_v0 = vld [vmem:[%s11827_s5 + $0x7a8] ss:$16 sps:$4 sm:$0xff]   ;;  %v8301_v23 = vld [vmem:[%s11827_s5 + $0x7cc] ss:$16 sps:$4 sm:$0xff]  }
 0x4b7   :  { %6827 = vmatprep.subr.bf16.mxu1 %v8223_v54  ;;  %v8298_v54 = vld [vmem:[%s11827_s5 + $0x7c4] ss:$16 sps:$4 sm:$0xff]  }
 0x4b8   :  { %v8304_v13 = vld [vmem:[%s11827_s5 + $0x7e4] ss:$16 sps:$4 sm:$0xff]  }
 0x4b9   :  { %6584 = vmatpush1.bf16.msra.mxu0 %v8218_v59  ;;  %v11877_v59 = vld [vmem:[#allocation15_spill] sm:$0xff] }
 0x4ba   :  { %6828 = vmatpush1.bf16.msra.mxu1 %v8221_v26  ;;  %6585 = vmatprep.subr.bf16.mxu0 %v8226_v32  ;;  %v4531_v26 = vmul.f32 %v10983_v45, %v11877_v59  ;;  %v8296_v32 = vld [vmem:[%s11827_s5 + $0x7c0] ss:$16 sps:$4 sm:$0xff]   ;;  %v8307_v45 = vld [vmem:[%s11827_s5 + $0x7ec] ss:$16 sps:$4 sm:$0xff]  }
 0x4bb   :  { %6563 = vmatmul.mubr.bf16.gmra.mrb[52].mxu0 %v11174_v9  ;;  %6829 = vmatprep.subr.bf16.mxu1 %v8229_v24  ;;  %v8299_v24 = vld [vmem:[%s11827_s5 + $0x7c8] ss:$16 sps:$4 sm:$0xff]   ;;  %v5114_v59 = vld [vmem:[%s11828_s6 + $0x80] sm:$0xf] }
 0x4bc   :  { %6807 = vmatmul.mubr.bf16.gmra.mrb[52].mxu1 %v11174_v9  ;;  %6572 = vmatprep.mubr.bf16.mxu0 %v4839_v25  ;;  %v8241_v9 = vld [vmem:[%s11827_s5 + $0x68c] ss:$16 sps:$4 sm:$0xff]  }
 0x4bd   :  { %6586 = vmatpush1.bf16.msra.mxu0 %v8224_v60  ;;  %6816 = vmatprep.mubr.bf16.mxu1 %v4839_v25  ;;  %v4614_v60 = vmul.f32 %v11083_v50, %v4531_v26  ;;  %v8305_v25 = vld [vmem:[%s11827_s5 + $0x7e8] ss:$16 sps:$4 sm:$0xff]   ;;  %v5116_v26 = vld [vmem:[%s11828_s6 + $0x90] sm:$0xf] }
 0x4be   :  { %6830 = vmatpush1.bf16.msra.mxu1 %v8227_v5  ;;  %6587 = vmatprep.subr.bf16.mxu0 %v8232_v57  ;;  %v8302_v5 = vld [vmem:[%s11827_s5 + $0x7e0] ss:$16 sps:$4 sm:$0xff]  }
 0x4bf   :  { %6831 = vmatprep.subr.bf16.mxu1 %v8235_v33  ;;  %v4697_v57 = vadd.f32 %v11132_v46, %v4614_v60 }
 0x4c1   :  { %6588 = vmatpush1.bf16.msra.mxu0 %v8230_v40  ;;  %v4777_v8 = vmul.f32 0.01, %v4697_v57  ;;  %vm4737_vm7 = vcmp.ge.f32.partialorder %v4697_v57, 0.0  ;;  %v4776_v40 = vmul.f32 0.01, %v11247_v39 }
 0x4c2   :  { %6832 = vmatpush1.bf16.msra.mxu1 %v8233_v38  ;;  %6589 = vmatprep.subr.bf16.mxu0 %v8238_v14  ;;  %v5100_v38 = vld [vmem:[%s11828_s6 + $0x10] sm:$0xff]  ;;  %v5102_v14 = vld [vmem:[%s11828_s6 + $0x20] sm:$0xff] }
 0x4c3   :  { %6573 = vmatmul.mubr.bf16.gmra.mrb[56].mxu0 %v4838_v29  ;;  %6833 = vmatprep.subr.bf16.mxu1 %v8241_v9  ;;  %v4817_v50 = vsel %vm4737_vm7, %v4697_v57, %v4777_v8  ;;  %v4816_v46 = vsel %vm4736_vm8, %v11247_v39, %v4776_v40  ;;  %v5101_v39 = vld [vmem:[%s11828_s6 + $0x18] sm:$0xff] }
 0x4c4   :  { %6817 = vmatmul.mubr.bf16.gmra.mrb[56].mxu1 %v4838_v29  ;;  %6613 = vmatprep.mubr.bf16.mxu0 %v11211_v27  ;;  %v4841_v33 = vpack.c.bf16 %v4817_v50, %v4817_v50 }
 0x4c5   :  { %6590 = vmatpush1.bf16.msra.mxu0 %v8236_v35  ;;  %6857 = vmatprep.mubr.bf16.mxu1 %v11211_v27  ;;  %v8248_v27 = vld [vmem:[%s11827_s5 + $0x6c0] ss:$16 sps:$4 sm:$0xff]  }
 0x4c6   :  { %6834 = vmatpush1.bf16.msra.mxu1 %v8239_v41  ;;  %6591 = vmatprep.subr.bf16.mxu0 %v8244_v22  ;;  %v5104_v41 = vld [vmem:[%s11828_s6 + $0x30] sm:$0xff]  ;;  %v5103_v22 = vld [vmem:[%s11828_s6 + $0x28] sm:$0xff] }
 0x4c7   :  { %6835 = vmatprep.subr.bf16.mxu1 %v8247_v63 }
 0x4c9   :  { %6592 = vmatpush1.bf16.msra.mxu0 %v8242_v48 }
 0x4ca   :  { %6836 = vmatpush1.bf16.msra.mxu1 %v8245_v2  ;;  %6593 = vmatprep.subr.bf16.mxu0 %v8250_v11 }
 0x4cb   :  { %6837 = vmatprep.subr.bf16.mxu1 %v8253_v55  ;;  %v5105_v55 = vld [vmem:[%s11828_s6 + $0x38] sm:$0xff] }
 0x4cd   :  { %6594 = vmatpush1.bf16.msra.mxu0 %v8248_v27 }
 0x4ce   :  { %6838 = vmatpush1.bf16.msra.mxu1 %v8251_v62  ;;  %6595 = vmatprep.subr.bf16.mxu0 %v8256_v42 }
 0x4cf   :  { %6839 = vmatprep.subr.bf16.mxu1 %v8259_v6 }
 0x4d1   :  { %6596 = vmatpush1.bf16.msra.mxu0 %v8254_v3 }
 0x4d2   :  { %6840 = vmatpush1.bf16.msra.mxu1 %v8257_v61  ;;  %6597 = vmatprep.subr.bf16.mxu0 %v8262_v10 }
 0x4d3   :  { %6841 = vmatprep.subr.bf16.mxu1 %v8265_v21 }
 0x4d5   :  { %6598 = vmatpush1.bf16.msra.mxu0 %v8260_v56  ;;  %v5106_v56 = vld [vmem:[%s11828_s6 + $0x40] sm:$0xff] }
 0x4d6   :  { %6842 = vmatpush1.bf16.msra.mxu1 %v8263_v44  ;;  %6599 = vmatprep.subr.bf16.mxu0 %v8268_v20  ;;  %v5108_v44 = vld [vmem:[%s11828_s6 + $0x50] sm:$0xff]  ;;  %v5107_v20 = vld [vmem:[%s11828_s6 + $0x48] sm:$0xff] }
 0x4d7   :  { %6843 = vmatprep.subr.bf16.mxu1 %v8271_v7 }
 0x4d9   :  { %6600 = vmatpush1.bf16.msra.mxu0 %v8266_v19  ;;  %v5109_v19 = vld [vmem:[%s11828_s6 + $0x58] sm:$0xff] }
 0x4da   :  { %6844 = vmatpush1.bf16.msra.mxu1 %v8269_v43  ;;  %6601 = vmatprep.subr.bf16.mxu0 %v8274_v16  ;;  %v5110_v43 = vld [vmem:[%s11828_s6 + $0x60] sm:$0xff] }
 0x4db   :  { %6845 = vmatprep.subr.bf16.mxu1 %v8277_v28 }
 0x4dd   :  { %6602 = vmatpush1.bf16.msra.mxu0 %v8272_v15 }
 0x4de   :  { %6846 = vmatpush1.bf16.msra.mxu1 %v8275_v1  ;;  %6603 = vmatprep.subr.bf16.mxu0 %v8280_v17  ;;  %v5112_v1 = vld [vmem:[%s11828_s6 + $0x70] sm:$0xff]  ;;  %v5111_v17 = vld [vmem:[%s11828_s6 + $0x68] sm:$0xff] }
 0x4df   :  { %6847 = vmatprep.subr.bf16.mxu1 %v8283_v49 }
 0x4e1   :  { %6604 = vmatpush1.bf16.msra.mxu0 %v8278_v52 }
 0x4e2   :  { %6848 = vmatpush1.bf16.msra.mxu1 %v8281_v58  ;;  %6605 = vmatprep.subr.bf16.mxu0 %v8286_v31 }
 0x4e3   :  { %6849 = vmatprep.subr.bf16.mxu1 %v8289_v37  ;;  %v5113_v37 = vld [vmem:[%s11828_s6 + $0x78] sm:$0xff] }
 0x4e5   :  { %6606 = vmatpush1.bf16.msra.mxu0 %v8284_v36 }
 0x4e6   :  { %6850 = vmatpush1.bf16.msra.mxu1 %v8287_v18  ;;  %6607 = vmatprep.subr.bf16.mxu0 %v8292_v30 }
 0x4e7   :  { %6851 = vmatprep.subr.bf16.mxu1 %v8295_v53 }
 0x4e9   :  { %6608 = vmatpush1.bf16.msra.mxu0 %v8290_v47 }
 0x4ea   :  { %6852 = vmatpush1.bf16.msra.mxu1 %v8293_v0  ;;  %6609 = vmatprep.subr.bf16.mxu0 %v8298_v54 }
 0x4eb   :  { %6853 = vmatprep.subr.bf16.mxu1 %v8301_v23 }
 0x4ed   :  { %6610 = vmatpush1.bf16.msra.mxu0 %v8296_v32  ;;  %v5115_v32 = vld [vmem:[%s11828_s6 + $0x88] sm:$0xf] }
 0x4ee   :  { %6854 = vmatpush1.bf16.msra.mxu1 %v8299_v24  ;;  %6611 = vmatprep.subr.bf16.mxu0 %v8304_v13  ;;  %v5117_v13 = vld [vmem:[%s11828_s6 + $0x98] sm:$0xf] }
 0x4ef   :  { %6855 = vmatprep.subr.bf16.mxu1 %v8307_v45 }
 0x4f1   :  { %6612 = vmatpush1.bf16.msra.mxu0 %v8302_v5 }
 0x4f2   :  { %6856 = vmatpush1.bf16.msra.mxu1 %v8305_v25 }
 0x4f4   :  { %6614 = vmatmul.mubr.bf16.vlgmr.msra.gmra.mrb[48].mxu0 %v11227_v51 }
 0x4f5   :  { %6858 = vmatmul.mubr.bf16.vlgmr.msra.gmra.mrb[48].mxu1 %v11227_v51  ;;  %6623 = vmatprep.mubr.bf16.mxu0 %v11244_v34  ;;  %v4840_v51 = vpack.c.bf16 %v4816_v46, %v4816_v46 }
 0x4f6   :  { %6867 = vmatprep.mubr.bf16.mxu1 %v11244_v34  ;;  %v5098_v34 = vld [vmem:[%s11828_s6] sm:$0xff] }
 0x4fc   :  { %6624 = vmatmul.mubr.bf16.gmra.mrb[52].mxu0 %v11257_v12 }
 0x4fd   :  { %6868 = vmatmul.mubr.bf16.gmra.mrb[52].mxu1 %v11257_v12  ;;  %6633 = vmatprep.mubr.bf16.mxu0 %v4841_v33 }
 0x4fe   :  { %6877 = vmatprep.mubr.bf16.mxu1 %v4841_v33 }
 0x504   :  { %6634 = vmatmul.mubr.bf16.gmra.mrb[56].mxu0 %v4840_v51 }
 0x505   :  { %6878 = vmatmul.mubr.bf16.gmra.mrb[56].mxu1 %v4840_v51 }
 0x5c7   :  { %v6615_v12 = vpop.f32.mrb[48].mxu0 }
 0x5c8   :  { %v7704_v9 = vadd.f32 %v6615_v12, %v5098_v34  ;;  %v6859_v29 = vpop.f32.mrb[48].mxu1  ;;  %v6617_v35 = vpop.f32.mrb[49].mxu0 }
 0x5c9   :  { %v7714_v63 = vadd.f32 %v6859_v29, %v5100_v38  ;;  %v7705_v48 = vadd.f32 %v6617_v35, %v5099_v4  ;;  %v6861_v2 = vpop.f32.mrb[49].mxu1  ;;  %v6619_v11 = vpop.f32.mrb[50].mxu0 }
 0x5ca   :  { %6886 = vst [vmem:[%s11829_s7] sm:$0xff] %v7704_v9  ;;  %v7715_v27 = vadd.f32 %v6861_v2, %v5101_v39  ;;  %v7706_v62 = vadd.f32 %v6619_v11, %v5102_v14  ;;  %v6863_v42 = vpop.f32.mrb[50].mxu1  ;;  %v6621_v6 = vpop.f32.mrb[51].mxu0 }
 0x5cb   :  { %6888 = vst [vmem:[%s11829_s7 + $0x10] sm:$0xff] %v7714_v63  ;;  %6887 = vst [vmem:[%s11829_s7 + $0x8] sm:$0xff] %v7705_v48  ;;  %v7716_v3 = vadd.f32 %v6863_v42, %v5104_v41  ;;  %v7707_v61 = vadd.f32 %v6621_v6, %v5103_v22  ;;  %v6865_v10 = vpop.f32.mrb[51].mxu1 }
 0x5cc   :  { %6889 = vst [vmem:[%s11829_s7 + $0x18] sm:$0xff] %v7715_v27  ;;  %6890 = vst [vmem:[%s11829_s7 + $0x20] sm:$0xff] %v7706_v62  ;;  %v7717_v21 = vadd.f32 %v6865_v10, %v5105_v55 }
 0x5cd   :  { %6892 = vst [vmem:[%s11829_s7 + $0x30] sm:$0xff] %v7716_v3  ;;  %6891 = vst [vmem:[%s11829_s7 + $0x28] sm:$0xff] %v7707_v61 }
 0x5ce   :  { %6893 = vst [vmem:[%s11829_s7 + $0x38] sm:$0xff] %v7717_v21 }
 0x5cf   :  { %v6625_v7 = vpop.f32.mrb[52].mxu0 }
 0x5d0   :  { %v7708_v16 = vadd.f32 %v6625_v7, %v5106_v56  ;;  %v6869_v28 = vpop.f32.mrb[52].mxu1  ;;  %v6627_v15 = vpop.f32.mrb[53].mxu0 }
 0x5d1   :  { %v7718_v49 = vadd.f32 %v6869_v28, %v5108_v44  ;;  %v7709_v52 = vadd.f32 %v6627_v15, %v5107_v20  ;;  %v6871_v58 = vpop.f32.mrb[53].mxu1  ;;  %v6629_v31 = vpop.f32.mrb[54].mxu0 }
 0x5d2   :  { %6894 = vst [vmem:[%s11829_s7 + $0x40] sm:$0xff] %v7708_v16  ;;  %v7719_v36 = vadd.f32 %v6871_v58, %v5109_v19  ;;  %v7710_v18 = vadd.f32 %v6629_v31, %v5110_v43  ;;  %v6873_v30 = vpop.f32.mrb[54].mxu1  ;;  %v6631_v53 = vpop.f32.mrb[55].mxu0 }
 0x5d3   :  { %6896 = vst [vmem:[%s11829_s7 + $0x50] sm:$0xff] %v7718_v49  ;;  %6895 = vst [vmem:[%s11829_s7 + $0x48] sm:$0xff] %v7709_v52  ;;  %v7720_v47 = vadd.f32 %v6873_v30, %v5112_v1  ;;  %v7711_v0 = vadd.f32 %v6631_v53, %v5111_v17  ;;  %v6875_v54 = vpop.f32.mrb[55].mxu1 }
 0x5d4   :  { %6897 = vst [vmem:[%s11829_s7 + $0x58] sm:$0xff] %v7719_v36  ;;  %6898 = vst [vmem:[%s11829_s7 + $0x60] sm:$0xff] %v7710_v18  ;;  %v7721_v23 = vadd.f32 %v6875_v54, %v5113_v37 }
 0x5d5   :  { %6900 = vst [vmem:[%s11829_s7 + $0x70] sm:$0xff] %v7720_v47  ;;  %6899 = vst [vmem:[%s11829_s7 + $0x68] sm:$0xff] %v7711_v0 }
 0x5d6   :  { %6901 = vst [vmem:[%s11829_s7 + $0x78] sm:$0xff] %v7721_v23 }
 0x5d7   :  { %v6635_v24 = vpop.f32.mrb[56].mxu0 }
 0x5d8   :  { %v7712_v45 = vadd.f32 %v6635_v24, %v5114_v59  ;;  %v6879_v60 = vpop.f32.mrb[56].mxu1  ;;  %v6637_v5 = vpop.f32.mrb[57].mxu0 }
 0x5d9   :  { %v7722_v25 = vadd.f32 %v6879_v60, %v5116_v26  ;;  %v7713_v57 = vadd.f32 %v6637_v5, %v5115_v32  ;;  %v6881_v8 = vpop.f32.mrb[57].mxu1  ;;  %v6639_v50 = vpop.f32.mrb[58].mxu0 }
 0x5da   :  { %6902 = vst [vmem:[%s11829_s7 + $0x80] sm:$0xf] %v7712_v45  ;;  %v7723_v33 = vadd.f32 %v6881_v8, %v5117_v13  ;;  %v6883_v40 = vpop.f32.mrb[58].mxu1  ;;  %v6640_v46 = vpop.f32.mrb[59].mxu0 }
 0x5db   :  { %6904 = vst [vmem:[%s11829_s7 + $0x90] sm:$0xf] %v7722_v25  ;;  %6903 = vst [vmem:[%s11829_s7 + $0x88] sm:$0xf] %v7713_v57  ;;  %v6884_v51 = vpop.f32.mrb[59].mxu1 }
 0x5dc   :  { %6905 = vst [vmem:[%s11829_s7 + $0x98] sm:$0xf] %v7723_v33 }

</bundles_post_ra>
